<compile_context>
chip_gen: v5e
topology: v5e:2x2
jax: 0.10.0
libtpu: 0.0.40
codegen_flags: <defaults>
</compile_context>

<pallas_src>
import functools

import numpy as np
import jax
import jax.numpy as jnp
from jax import lax
from jax.experimental import pallas as pl
from jax.experimental.pallas import tpu as pltpu


# ----------------------------- static geometry ------------------------------

def _sizes(input_hw):
    H, W = input_hw
    c1h, c1w = (H - 3) // 2 + 1, (W - 3) // 2 + 1          # conv1 (k=3, s=2)
    p1h, p1w = (c1h - 2) // 2 + 1, (c1w - 2) // 2 + 1      # maxpool1 (2, 2)
    c2h, c2w = (p1h - 3) // 2 + 1, (p1w - 3) // 2 + 1      # conv2 (k=3, s=2)
    p2h, p2w = (c2h - 2) // 2 + 1, (c2w - 2) // 2 + 1      # maxpool2 (2, 2)
    np1 = p1h * p1w                                        # pool1 output pixels
    grp1 = ((np1 + 127) // 128) * 128                      # lane-aligned group
    nsp2 = p2h * p2w                                       # pool2 output pixels
    return dict(c1=(c1h, c1w), p1=(p1h, p1w), c2=(c2h, c2w), p2=(p2h, p2w),
                np1=np1, grp1=grp1, nsp2=nsp2)


# ------------------------------ fused kernel --------------------------------

def _dqn2_kernel(p1_ref, w1_ref, b1_ref, gcat_ref, w2_ref, b2_ref,
                 wf1s_ref, bf1_ref, sel_ref, wf2_ref, bf2_ref, out_ref,
                 *, bblk, grp1, nsp2):
    f32 = jnp.float32
    bf16 = jnp.bfloat16
    n36 = 4 * nsp2
    nh = wf1s_ref.shape[2]

    # conv1 (+bias, ReLU): one block-diagonal matmul for the whole image block.
    y1 = jnp.dot(w1_ref[...], p1_ref[...], preferred_element_type=f32)
    y1 = jnp.maximum(y1 + b1_ref[...], 0.0)                   # (bblk*16, 4*grp1)

    # maxpool1: elementwise max over the 4 lane-aligned pool-corner groups.
    y1p = jnp.maximum(
        jnp.maximum(y1[:, 0 * grp1:1 * grp1], y1[:, 1 * grp1:2 * grp1]),
        jnp.maximum(y1[:, 2 * grp1:3 * grp1], y1[:, 3 * grp1:4 * grp1]),
    )                                                         # (bblk*16, grp1)

    # conv2 im2col: ONE concatenated one-hot gather matmul over all 9 taps.
    gb = jnp.dot(y1p.astype(bf16), gcat_ref[...], preferred_element_type=f32)
    gb = gb.astype(bf16)                                      # (bblk*16, 9*n36)

    # conv2 (+bias, ReLU): 9 block-diagonal per-tap matmuls on contiguous lane
    # slices of gb, accumulated as a pairwise tree (no serial MRF chain).
    d = [jnp.dot(w2_ref[t], gb[:, t * n36:(t + 1) * n36],
                 preferred_element_type=f32) for t in range(9)]
    acc = (((d[0] + d[1]) + (d[2] + d[3]))
           + ((d[4] + d[5]) + (d[6] + d[7]))) + d[8]
    y2 = jnp.maximum(acc + b2_ref[...], 0.0)                  # (bblk*32, n36)

    # maxpool2: max over the 4 contiguous nsp2-lane corner groups.
    y2p = jnp.maximum(
        jnp.maximum(y2[:, 0 * nsp2:1 * nsp2], y2[:, 1 * nsp2:2 * nsp2]),
        jnp.maximum(y2[:, 2 * nsp2:3 * nsp2], y2[:, 3 * nsp2:4 * nsp2]),
    )                                                         # (bblk*32, nsp2)

    # fc1 without any sublane->lane relayout (no reshape / 32 tiny matmuls):
    #   z[b*32+c, o] = sum_s y2p[b*32+c, s] * fc1_w[o, c*nsp2+s]  (VPU FMAs)
    #   h[b, o]      = sum_c z[b*32+c, o]                         (one-hot matmul)
    z = y2p[:, 0:1] * wf1s_ref[0]
    for s in range(1, nsp2):
        z = z + y2p[:, s:s + 1] * wf1s_ref[s]                 # (bblk*32, nh) f32
    h = jnp.dot(sel_ref[...], z, preferred_element_type=f32)  # (bblk, nh)
    h = jnp.maximum(h + bf1_ref[...], 0.0)

    # fc2
    out = jnp.dot(h.astype(bf16), wf2_ref[...], preferred_element_type=f32)
    out_ref[0] = out + bf2_ref[...]                           # (bblk, n_actions)


# ------------------------------ weight prep ----------------------------------

def prepare(params, input_hw, n_actions, bblk):
    """One-time weight / constant preparation (outside the per-step hot path)."""
    cfg = _sizes(input_hw)
    grp1, nsp2 = cfg["grp1"], cfg["nsp2"]
    p1w = cfg["p1"][1]
    p2h, p2w = cfg["p2"]
    n36 = 4 * nsp2
    nh = 256

    # conv1: block-diagonal (over images) weight, taps padded 9 -> 16.
    w1 = np.asarray(params["conv1_w"], np.float32).reshape(16, 9)
    w1bd = np.zeros((bblk * 16, bblk * 16), np.float32)
    b1bd = np.zeros((bblk * 16, 1), np.float32)
    for b in range(bblk):
        w1bd[b * 16:b * 16 + 16, b * 16:b * 16 + 9] = w1
        b1bd[b * 16:b * 16 + 16, 0] = np.asarray(params["conv1_b"], np.float32)

    # One-hot gather matrix for conv2's im2col, all 9 taps concatenated on lanes:
    # column = t*4*nsp2 + (pool2 corner)*nsp2 + u*p2w + v.
    gcat = np.zeros((grp1, 9 * n36), np.float32)
    for di in range(3):
        for dj in range(3):
            t = di * 3 + dj
            for p in range(2):
                for q in range(2):
                    for u in range(p2h):
                        for v in range(p2w):
                            col = t * n36 + (p * 2 + q) * nsp2 + u * p2w + v
                            si, sj = 4 * u + 2 * p + di, 4 * v + 2 * q + dj
                            gcat[si * p1w + sj, col] = 1.0

    # conv2: per-tap block-diagonal weights and bias.
    w2 = np.asarray(params["conv2_w"], np.float32)             # (32, 16, 3, 3)
    w2bd = np.zeros((9, bblk * 32, bblk * 16), np.float32)
    b2bd = np.zeros((bblk * 32, 1), np.float32)
    for di in range(3):
        for dj in range(3):
            t = di * 3 + dj
            for b in range(bblk):
                w2bd[t, b * 32:b * 32 + 32, b * 16:b * 16 + 16] = w2[:, :, di, dj]
    for b in range(bblk):
        b2bd[b * 32:b * 32 + 32, 0] = np.asarray(params["conv2_b"], np.float32)

    # fc1: per-spatial-position weight slabs (PyTorch NCHW flatten order folded),
    # tiled over the bblk images stacked on sublanes.
    fc1w = np.asarray(params["fc1_w"], np.float32)             # (256, 32*nsp2)
    wf1_3d = fc1w.T.reshape(32, nsp2, nh)                      # [c, s, o]
    wf1s = np.transpose(wf1_3d, (1, 0, 2))                     # (nsp2, 32, nh)
    wf1s = np.tile(wf1s, (1, bblk, 1))                         # (nsp2, bblk*32, nh)

    # One-hot per-image row selector (sums the 32 channel rows of each image).
    sel = np.zeros((bblk, bblk * 32), np.float32)
    for b in range(bblk):
        sel[b, b * 32:b * 32 + 32] = 1.0

    consts = dict(
        w1bd=jnp.asarray(w1bd, jnp.bfloat16),
        b1bd=jnp.asarray(b1bd, jnp.float32),
        gcat=jnp.asarray(gcat, jnp.bfloat16),
        w2bd=jnp.asarray(w2bd, jnp.bfloat16),
        b2bd=jnp.asarray(b2bd, jnp.float32),
        wf1s=jnp.asarray(wf1s, jnp.float32),
        bf1=jnp.asarray(params["fc1_b"], jnp.float32).reshape(1, nh),
        sel=jnp.asarray(sel, jnp.float32),
        wf2=jnp.asarray(params["fc2_w"], jnp.float32).T.astype(jnp.bfloat16),
        bf2=jnp.asarray(params["fc2_b"], jnp.float32).reshape(1, n_actions),
    )
    return consts, cfg


# ------------------------------- host wrapper --------------------------------

def _build_p1(x, cfg):
    """conv1 im2col via 36 strided slices (no advanced-index gather): output
    (B*16, 4*grp1) bf16, row = b*16 + tap (taps padded 9->16), column =
    (pool1 corner)*grp1 + pooled_row*p1w + pooled_col (padded np1->grp1)."""
    B = x.shape[0]
    p1h, p1w = cfg["p1"]
    np1, grp1 = cfg["np1"], cfg["grp1"]
    taps = []
    for di in range(3):
        for dj in range(3):
            corners = []
            for p in range(2):
                for q in range(2):
                    r0, c0 = 2 * p + di, 2 * q + dj
                    sl = lax.slice(x, (0, r0, c0),
                                   (B, r0 + 4 * (p1h - 1) + 1,
                                    c0 + 4 * (p1w - 1) + 1),
                                   (1, 4, 4))                  # (B, p1h, p1w)
                    sl = sl.reshape(B, np1)
                    if grp1 > np1:
                        sl = jnp.pad(sl, ((0, 0), (0, grp1 - np1)))
                    corners.append(sl)
            taps.append(jnp.concatenate(corners, axis=1))      # (B, 4*grp1)
    p1 = jnp.stack(taps, axis=1)                               # (B, 9, 4*grp1)
    p1 = jnp.pad(p1, ((0, 0), (0, 16 - 9), (0, 0)))            # (B, 16, 4*grp1)
    return p1.reshape(B * 16, 4 * grp1).astype(jnp.bfloat16)


def dqn2_forward(x, consts, cfg, bblk):
    """x: (B, H, W) float32 — the batched path of DQN2.forward."""
    B = x.shape[0]
    assert B % bblk == 0, "batch must be a multiple of the per-step block"
    grp1, nsp2 = cfg["grp1"], cfg["nsp2"]
    n36 = 4 * nsp2
    n_act = consts["wf2"].shape[1]
    nh = consts["wf1s"].shape[2]
    nblk = B // bblk

    p1 = _build_p1(x, cfg)                                     # (B*16, 4*grp1)

    # Advisory cost: real conv/fc MACs only (one-hot gather/selector matmuls are
    # data movement, not math).
    flops = B * (2 * 16 * 9 * 4 * grp1
                 + 2 * 32 * 16 * 9 * n36
                 + 2 * 32 * nsp2 * nh
                 + 2 * nh * n_act)
    const_bytes = sum(int(np.prod(v.shape)) * v.dtype.itemsize
                      for v in consts.values())
    bytes_accessed = p1.size * p1.dtype.itemsize + const_bytes + B * n_act * 4

    kernel = functools.partial(_dqn2_kernel, bblk=bblk, grp1=grp1, nsp2=nsp2)
    out = pl.pallas_call(
        kernel,
        grid=(nblk,),
        out_shape=jax.ShapeDtypeStruct((nblk, bblk, n_act), jnp.float32),
        in_specs=[
            pl.BlockSpec((bblk * 16, 4 * grp1), lambda i: (i, 0)),       # p1
            pl.BlockSpec((bblk * 16, bblk * 16), lambda i: (0, 0)),      # w1bd
            pl.BlockSpec((bblk * 16, 1), lambda i: (0, 0)),              # b1bd
            pl.BlockSpec((grp1, 9 * n36), lambda i: (0, 0)),             # gcat
            pl.BlockSpec((9, bblk * 32, bblk * 16), lambda i: (0, 0, 0)),  # w2bd
            pl.BlockSpec((bblk * 32, 1), lambda i: (0, 0)),              # b2bd
            pl.BlockSpec((nsp2, bblk * 32, nh), lambda i: (0, 0, 0)),    # wf1s
            pl.BlockSpec((1, nh), lambda i: (0, 0)),                     # bf1
            pl.BlockSpec((bblk, bblk * 32), lambda i: (0, 0)),           # sel
            pl.BlockSpec((nh, n_act), lambda i: (0, 0)),                 # wf2
            pl.BlockSpec((1, n_act), lambda i: (0, 0)),                  # bf2
        ],
        out_specs=pl.BlockSpec((1, bblk, n_act), lambda i: (i, 0, 0)),
        compiler_params=pltpu.CompilerParams(
            dimension_semantics=("parallel",)),
        cost_estimate=pl.CostEstimate(
            flops=int(flops), transcendentals=0,
            bytes_accessed=int(bytes_accessed)),
    )(p1, consts["w1bd"], consts["b1bd"], consts["gcat"], consts["w2bd"],
      consts["b2bd"], consts["wf1s"], consts["bf1"], consts["sel"],
      consts["wf2"], consts["bf2"])
    return out.reshape(B, n_act)


# ------------------------- params init & pure-JAX ref ------------------------

def init_params(key, input_hw, n_actions):
    cfg = _sizes(input_hw)
    fc1_in = 32 * cfg["nsp2"]
    ks = jax.random.split(key, 8)

    def u(k, shape, fan_in):
        bound = 1.0 / float(fan_in) ** 0.5
        return jax.random.uniform(k, shape, jnp.float32, -bound, bound)

    return dict(
        conv1_w=u(ks[0], (16, 1, 3, 3), 9),                 # OIHW (PyTorch layout)
        conv1_b=u(ks[1], (16,), 9),
        conv2_w=u(ks[2], (32, 16, 3, 3), 16 * 9),
        conv2_b=u(ks[3], (32,), 16 * 9),
        fc1_w=u(ks[4], (256, fc1_in), fc1_in),              # [out, in]
        fc1_b=u(ks[5], (256,), fc1_in),
        fc2_w=u(ks[6], (n_actions, 256), 256),
        fc2_b=u(ks[7], (n_actions,), 256),
    )


def reference_forward(x_bhw, params):
    """Pure-JAX reference reproducing PyTorch semantics (NCHW, OIHW, f32)."""
    x = x_bhw[:, None, :, :]
    dn = ("NCHW", "OIHW", "NCHW")
    y = lax.conv_general_dilated(x, params["conv1_w"], (2, 2), "VALID",
                                 dimension_numbers=dn)
    y = jnp.maximum(y + params["conv1_b"][None, :, None, None], 0.0)
    y = lax.reduce_window(y, -jnp.inf, lax.max, (1, 1, 2, 2), (1, 1, 2, 2), "VALID")
    y = lax.conv_general_dilated(y, params["conv2_w"], (2, 2), "VALID",
                                 dimension_numbers=dn)
    y = jnp.maximum(y + params["conv2_b"][None, :, None, None], 0.0)
    y = lax.reduce_window(y, -jnp.inf, lax.max, (1, 1, 2, 2), (1, 1, 2, 2), "VALID")
    flat = y.reshape(y.shape[0], -1)
    h = jnp.maximum(flat @ params["fc1_w"].T + params["fc1_b"], 0.0)
    return h @ params["fc2_w"].T + params["fc2_b"]


# ------------------------------------ main -----------------------------------

if __name__ == "__main__":
    key = jax.random.PRNGKey(0)
    kx, kp = jax.random.split(key)

    B, H, W, A = 8, 64, 64, 6        # input_shape=(64, 64), output_shape=6
    BBLK = 4                         # images per grid step -> grid=(2,) (v7x megacore)
    x = jax.random.normal(kx, (B, H, W), jnp.float32)
    params = init_params(kp, (H, W), A)

    consts, cfg = prepare(params, (H, W), A, BBLK)   # one-time weight prep

    fwd = jax.jit(functools.partial(dqn2_forward, cfg=cfg, bblk=BBLK))
    out = jax.block_until_ready(fwd(x, consts))

    ref = reference_forward(x, params)
    assert out.shape == (B, A), out.shape
    # bf16 matmul operands -> looser tolerance than the pure-f32 version.
    assert jnp.allclose(out, ref, atol=3e-2, rtol=3e-2), float(
        jnp.max(jnp.abs(out - ref)))
    print("KERNEL_OK")
</pallas_src>

<mosaic_0001>
module attributes {stable_mosaic.version = 11 : i64} {
  func.func @_dqn2_kernel(%arg0: i32, %arg1: memref<64x1024xbf16, #tpu.memory_space<vmem>>, %arg2: memref<64x64xbf16, #tpu.memory_space<vmem>>, %arg3: memref<64x1xf32, #tpu.memory_space<vmem>>, %arg4: memref<256x324xbf16, #tpu.memory_space<vmem>>, %arg5: memref<9x128x64xbf16, #tpu.memory_space<vmem>>, %arg6: memref<128x1xf32, #tpu.memory_space<vmem>>, %arg7: memref<9x128x256xf32, #tpu.memory_space<vmem>>, %arg8: memref<1x256xf32, #tpu.memory_space<vmem>>, %arg9: memref<4x128xf32, #tpu.memory_space<vmem>>, %arg10: memref<256x6xbf16, #tpu.memory_space<vmem>>, %arg11: memref<1x6xf32, #tpu.memory_space<vmem>>, %arg12: memref<1x4x6xf32, #tpu.memory_space<vmem>>) attributes {dimension_semantics = [#tpu.dimension_semantics<parallel>], iteration_bounds = array<i64: 2>, scalar_prefetch = 0 : i64, scratch_operands = 0 : i64, tpu.core_type = #tpu.core_type<tc>, window_params = [{transform_indices = @transform_0, window_bounds = array<i64: 64, 1024>}, {pipeline_mode = #tpu.pipeline_mode<synchronous>, transform_indices = @transform_1, window_bounds = array<i64: 64, 64>}, {pipeline_mode = #tpu.pipeline_mode<synchronous>, transform_indices = @transform_2, window_bounds = array<i64: 64, 1>}, {pipeline_mode = #tpu.pipeline_mode<synchronous>, transform_indices = @transform_3, window_bounds = array<i64: 256, 324>}, {pipeline_mode = #tpu.pipeline_mode<synchronous>, transform_indices = @transform_4, window_bounds = array<i64: 9, 128, 64>}, {pipeline_mode = #tpu.pipeline_mode<synchronous>, transform_indices = @transform_5, window_bounds = array<i64: 128, 1>}, {pipeline_mode = #tpu.pipeline_mode<synchronous>, transform_indices = @transform_6, window_bounds = array<i64: 9, 128, 256>}, {pipeline_mode = #tpu.pipeline_mode<synchronous>, transform_indices = @transform_7, window_bounds = array<i64: 1, 256>}, {pipeline_mode = #tpu.pipeline_mode<synchronous>, transform_indices = @transform_8, window_bounds = array<i64: 4, 128>}, {pipeline_mode = #tpu.pipeline_mode<synchronous>, transform_indices = @transform_9, window_bounds = array<i64: 256, 6>}, {pipeline_mode = #tpu.pipeline_mode<synchronous>, transform_indices = @transform_10, window_bounds = array<i64: 1, 6>}, {transform_indices = @transform_11, window_bounds = array<i64: 1, 4, 6>}]} {
    %c0 = arith.constant 0 : index
    %c0_0 = arith.constant 0 : index
    %0 = vector.load %arg2[%c0, %c0_0] : memref<64x64xbf16, #tpu.memory_space<vmem>>, vector<64x64xbf16>
    %c0_1 = arith.constant 0 : index
    %c0_2 = arith.constant 0 : index
    %1 = vector.load %arg1[%c0_1, %c0_2] : memref<64x1024xbf16, #tpu.memory_space<vmem>>, vector<64x1024xbf16>
    %cst = arith.constant dense<0.000000e+00> : vector<64x1024xf32>
    %2 = tpu.matmul %0, %1, %cst {dimension_numbers = #tpu.dot_dimension_numbers<[1], [0], [0], [1], [0, 0, 1, 1], [], []>} : vector<64x64xbf16>, vector<64x1024xbf16>, vector<64x1024xf32> -> vector<64x1024xf32>
    %c0_3 = arith.constant 0 : index
    %c0_4 = arith.constant 0 : index
    %3 = vector.load %arg3[%c0_3, %c0_4] : memref<64x1xf32, #tpu.memory_space<vmem>>, vector<64x1xf32>
    %4 = vector.broadcast %3 : vector<64x1xf32> to vector<64x1024xf32>
    %5 = arith.addf %2, %4 : vector<64x1024xf32>
    %cst_5 = arith.constant 0.000000e+00 : f32
    %6 = vector.broadcast %cst_5 : f32 to vector<64x1024xf32>
    %7 = arith.maximumf %5, %6 : vector<64x1024xf32>
    %8 = vector.extract_strided_slice %7 {offsets = [0, 0], sizes = [64, 256], strides = [1, 1]} : vector<64x1024xf32> to vector<64x256xf32>
    %9 = vector.extract_strided_slice %7 {offsets = [0, 256], sizes = [64, 256], strides = [1, 1]} : vector<64x1024xf32> to vector<64x256xf32>
    %10 = arith.maximumf %8, %9 : vector<64x256xf32>
    %11 = vector.extract_strided_slice %7 {offsets = [0, 512], sizes = [64, 256], strides = [1, 1]} : vector<64x1024xf32> to vector<64x256xf32>
    %12 = vector.extract_strided_slice %7 {offsets = [0, 768], sizes = [64, 256], strides = [1, 1]} : vector<64x1024xf32> to vector<64x256xf32>
    %13 = arith.maximumf %11, %12 : vector<64x256xf32>
    %14 = arith.maximumf %10, %13 : vector<64x256xf32>
    %15 = arith.truncf %14 : vector<64x256xf32> to vector<64x256xbf16>
    %c0_6 = arith.constant 0 : index
    %c0_7 = arith.constant 0 : index
    %16 = vector.load %arg4[%c0_6, %c0_7] : memref<256x324xbf16, #tpu.memory_space<vmem>>, vector<256x324xbf16>
    %cst_8 = arith.constant dense<0.000000e+00> : vector<64x324xf32>
    %17 = tpu.matmul %15, %16, %cst_8 {dimension_numbers = #tpu.dot_dimension_numbers<[1], [0], [0], [1], [0, 0, 1, 1], [], []>} : vector<64x256xbf16>, vector<256x324xbf16>, vector<64x324xf32> -> vector<64x324xf32>
    %18 = arith.truncf %17 : vector<64x324xf32> to vector<64x324xbf16>
    %c0_9 = arith.constant 0 : index
    %c0_10 = arith.constant 0 : index
    %c0_11 = arith.constant 0 : index
    %19 = vector.load %arg5[%c0_9, %c0_10, %c0_11] : memref<9x128x64xbf16, #tpu.memory_space<vmem>>, vector<1x128x64xbf16>
    %20 = vector.shape_cast %19 : vector<1x128x64xbf16> to vector<128x64xbf16>
    %21 = vector.extract_strided_slice %18 {offsets = [0, 0], sizes = [64, 36], strides = [1, 1]} : vector<64x324xbf16> to vector<64x36xbf16>
    %cst_12 = arith.constant dense<0.000000e+00> : vector<128x36xf32>
    %22 = tpu.matmul %20, %21, %cst_12 {dimension_numbers = #tpu.dot_dimension_numbers<[1], [0], [0], [1], [0, 0, 1, 1], [], []>} : vector<128x64xbf16>, vector<64x36xbf16>, vector<128x36xf32> -> vector<128x36xf32>
    %c1 = arith.constant 1 : index
    %c0_13 = arith.constant 0 : index
    %c0_14 = arith.constant 0 : index
    %23 = vector.load %arg5[%c1, %c0_13, %c0_14] : memref<9x128x64xbf16, #tpu.memory_space<vmem>>, vector<1x128x64xbf16>
    %24 = vector.shape_cast %23 : vector<1x128x64xbf16> to vector<128x64xbf16>
    %25 = vector.extract_strided_slice %18 {offsets = [0, 36], sizes = [64, 36], strides = [1, 1]} : vector<64x324xbf16> to vector<64x36xbf16>
    %cst_15 = arith.constant dense<0.000000e+00> : vector<128x36xf32>
    %26 = tpu.matmul %24, %25, %cst_15 {dimension_numbers = #tpu.dot_dimension_numbers<[1], [0], [0], [1], [0, 0, 1, 1], [], []>} : vector<128x64xbf16>, vector<64x36xbf16>, vector<128x36xf32> -> vector<128x36xf32>
    %c2 = arith.constant 2 : index
    %c0_16 = arith.constant 0 : index
    %c0_17 = arith.constant 0 : index
    %27 = vector.load %arg5[%c2, %c0_16, %c0_17] : memref<9x128x64xbf16, #tpu.memory_space<vmem>>, vector<1x128x64xbf16>
    %28 = vector.shape_cast %27 : vector<1x128x64xbf16> to vector<128x64xbf16>
    %29 = vector.extract_strided_slice %18 {offsets = [0, 72], sizes = [64, 36], strides = [1, 1]} : vector<64x324xbf16> to vector<64x36xbf16>
    %cst_18 = arith.constant dense<0.000000e+00> : vector<128x36xf32>
    %30 = tpu.matmul %28, %29, %cst_18 {dimension_numbers = #tpu.dot_dimension_numbers<[1], [0], [0], [1], [0, 0, 1, 1], [], []>} : vector<128x64xbf16>, vector<64x36xbf16>, vector<128x36xf32> -> vector<128x36xf32>
    %c3 = arith.constant 3 : index
    %c0_19 = arith.constant 0 : index
    %c0_20 = arith.constant 0 : index
    %31 = vector.load %arg5[%c3, %c0_19, %c0_20] : memref<9x128x64xbf16, #tpu.memory_space<vmem>>, vector<1x128x64xbf16>
    %32 = vector.shape_cast %31 : vector<1x128x64xbf16> to vector<128x64xbf16>
    %33 = vector.extract_strided_slice %18 {offsets = [0, 108], sizes = [64, 36], strides = [1, 1]} : vector<64x324xbf16> to vector<64x36xbf16>
    %cst_21 = arith.constant dense<0.000000e+00> : vector<128x36xf32>
    %34 = tpu.matmul %32, %33, %cst_21 {dimension_numbers = #tpu.dot_dimension_numbers<[1], [0], [0], [1], [0, 0, 1, 1], [], []>} : vector<128x64xbf16>, vector<64x36xbf16>, vector<128x36xf32> -> vector<128x36xf32>
    %c4 = arith.constant 4 : index
    %c0_22 = arith.constant 0 : index
    %c0_23 = arith.constant 0 : index
    %35 = vector.load %arg5[%c4, %c0_22, %c0_23] : memref<9x128x64xbf16, #tpu.memory_space<vmem>>, vector<1x128x64xbf16>
    %36 = vector.shape_cast %35 : vector<1x128x64xbf16> to vector<128x64xbf16>
    %37 = vector.extract_strided_slice %18 {offsets = [0, 144], sizes = [64, 36], strides = [1, 1]} : vector<64x324xbf16> to vector<64x36xbf16>
    %cst_24 = arith.constant dense<0.000000e+00> : vector<128x36xf32>
    %38 = tpu.matmul %36, %37, %cst_24 {dimension_numbers = #tpu.dot_dimension_numbers<[1], [0], [0], [1], [0, 0, 1, 1], [], []>} : vector<128x64xbf16>, vector<64x36xbf16>, vector<128x36xf32> -> vector<128x36xf32>
    %c5 = arith.constant 5 : index
    %c0_25 = arith.constant 0 : index
    %c0_26 = arith.constant 0 : index
    %39 = vector.load %arg5[%c5, %c0_25, %c0_26] : memref<9x128x64xbf16, #tpu.memory_space<vmem>>, vector<1x128x64xbf16>
    %40 = vector.shape_cast %39 : vector<1x128x64xbf16> to vector<128x64xbf16>
    %41 = vector.extract_strided_slice %18 {offsets = [0, 180], sizes = [64, 36], strides = [1, 1]} : vector<64x324xbf16> to vector<64x36xbf16>
    %cst_27 = arith.constant dense<0.000000e+00> : vector<128x36xf32>
    %42 = tpu.matmul %40, %41, %cst_27 {dimension_numbers = #tpu.dot_dimension_numbers<[1], [0], [0], [1], [0, 0, 1, 1], [], []>} : vector<128x64xbf16>, vector<64x36xbf16>, vector<128x36xf32> -> vector<128x36xf32>
    %c6 = arith.constant 6 : index
    %c0_28 = arith.constant 0 : index
    %c0_29 = arith.constant 0 : index
    %43 = vector.load %arg5[%c6, %c0_28, %c0_29] : memref<9x128x64xbf16, #tpu.memory_space<vmem>>, vector<1x128x64xbf16>
    %44 = vector.shape_cast %43 : vector<1x128x64xbf16> to vector<128x64xbf16>
    %45 = vector.extract_strided_slice %18 {offsets = [0, 216], sizes = [64, 36], strides = [1, 1]} : vector<64x324xbf16> to vector<64x36xbf16>
    %cst_30 = arith.constant dense<0.000000e+00> : vector<128x36xf32>
    %46 = tpu.matmul %44, %45, %cst_30 {dimension_numbers = #tpu.dot_dimension_numbers<[1], [0], [0], [1], [0, 0, 1, 1], [], []>} : vector<128x64xbf16>, vector<64x36xbf16>, vector<128x36xf32> -> vector<128x36xf32>
    %c7 = arith.constant 7 : index
    %c0_31 = arith.constant 0 : index
    %c0_32 = arith.constant 0 : index
    %47 = vector.load %arg5[%c7, %c0_31, %c0_32] : memref<9x128x64xbf16, #tpu.memory_space<vmem>>, vector<1x128x64xbf16>
    %48 = vector.shape_cast %47 : vector<1x128x64xbf16> to vector<128x64xbf16>
    %49 = vector.extract_strided_slice %18 {offsets = [0, 252], sizes = [64, 36], strides = [1, 1]} : vector<64x324xbf16> to vector<64x36xbf16>
    %cst_33 = arith.constant dense<0.000000e+00> : vector<128x36xf32>
    %50 = tpu.matmul %48, %49, %cst_33 {dimension_numbers = #tpu.dot_dimension_numbers<[1], [0], [0], [1], [0, 0, 1, 1], [], []>} : vector<128x64xbf16>, vector<64x36xbf16>, vector<128x36xf32> -> vector<128x36xf32>
    %c8 = arith.constant 8 : index
    %c0_34 = arith.constant 0 : index
    %c0_35 = arith.constant 0 : index
    %51 = vector.load %arg5[%c8, %c0_34, %c0_35] : memref<9x128x64xbf16, #tpu.memory_space<vmem>>, vector<1x128x64xbf16>
    %52 = vector.shape_cast %51 : vector<1x128x64xbf16> to vector<128x64xbf16>
    %53 = vector.extract_strided_slice %18 {offsets = [0, 288], sizes = [64, 36], strides = [1, 1]} : vector<64x324xbf16> to vector<64x36xbf16>
    %cst_36 = arith.constant dense<0.000000e+00> : vector<128x36xf32>
    %54 = tpu.matmul %52, %53, %cst_36 {dimension_numbers = #tpu.dot_dimension_numbers<[1], [0], [0], [1], [0, 0, 1, 1], [], []>} : vector<128x64xbf16>, vector<64x36xbf16>, vector<128x36xf32> -> vector<128x36xf32>
    %55 = arith.addf %22, %26 : vector<128x36xf32>
    %56 = arith.addf %30, %34 : vector<128x36xf32>
    %57 = arith.addf %55, %56 : vector<128x36xf32>
    %58 = arith.addf %38, %42 : vector<128x36xf32>
    %59 = arith.addf %46, %50 : vector<128x36xf32>
    %60 = arith.addf %58, %59 : vector<128x36xf32>
    %61 = arith.addf %57, %60 : vector<128x36xf32>
    %62 = arith.addf %61, %54 : vector<128x36xf32>
    %c0_37 = arith.constant 0 : index
    %c0_38 = arith.constant 0 : index
    %63 = vector.load %arg6[%c0_37, %c0_38] : memref<128x1xf32, #tpu.memory_space<vmem>>, vector<128x1xf32>
    %64 = vector.broadcast %63 : vector<128x1xf32> to vector<128x36xf32>
    %65 = arith.addf %62, %64 : vector<128x36xf32>
    %cst_39 = arith.constant 0.000000e+00 : f32
    %66 = vector.broadcast %cst_39 : f32 to vector<128x36xf32>
    %67 = arith.maximumf %65, %66 : vector<128x36xf32>
    %68 = vector.extract_strided_slice %67 {offsets = [0, 0], sizes = [128, 9], strides = [1, 1]} : vector<128x36xf32> to vector<128x9xf32>
    %69 = vector.extract_strided_slice %67 {offsets = [0, 9], sizes = [128, 9], strides = [1, 1]} : vector<128x36xf32> to vector<128x9xf32>
    %70 = arith.maximumf %68, %69 : vector<128x9xf32>
    %71 = vector.extract_strided_slice %67 {offsets = [0, 18], sizes = [128, 9], strides = [1, 1]} : vector<128x36xf32> to vector<128x9xf32>
    %72 = vector.extract_strided_slice %67 {offsets = [0, 27], sizes = [128, 9], strides = [1, 1]} : vector<128x36xf32> to vector<128x9xf32>
    %73 = arith.maximumf %71, %72 : vector<128x9xf32>
    %74 = arith.maximumf %70, %73 : vector<128x9xf32>
    %75 = vector.extract_strided_slice %74 {offsets = [0, 0], sizes = [128, 1], strides = [1, 1]} : vector<128x9xf32> to vector<128x1xf32>
    %c0_40 = arith.constant 0 : index
    %c0_41 = arith.constant 0 : index
    %c0_42 = arith.constant 0 : index
    %76 = vector.load %arg7[%c0_40, %c0_41, %c0_42] : memref<9x128x256xf32, #tpu.memory_space<vmem>>, vector<1x128x256xf32>
    %77 = vector.shape_cast %76 : vector<1x128x256xf32> to vector<128x256xf32>
    %78 = vector.broadcast %75 : vector<128x1xf32> to vector<128x256xf32>
    %79 = arith.mulf %78, %77 : vector<128x256xf32>
    %80 = vector.extract_strided_slice %74 {offsets = [0, 1], sizes = [128, 1], strides = [1, 1]} : vector<128x9xf32> to vector<128x1xf32>
    %c1_43 = arith.constant 1 : index
    %c0_44 = arith.constant 0 : index
    %c0_45 = arith.constant 0 : index
    %81 = vector.load %arg7[%c1_43, %c0_44, %c0_45] : memref<9x128x256xf32, #tpu.memory_space<vmem>>, vector<1x128x256xf32>
    %82 = vector.shape_cast %81 : vector<1x128x256xf32> to vector<128x256xf32>
    %83 = vector.broadcast %80 : vector<128x1xf32> to vector<128x256xf32>
    %84 = arith.mulf %83, %82 : vector<128x256xf32>
    %85 = arith.addf %79, %84 : vector<128x256xf32>
    %86 = vector.extract_strided_slice %74 {offsets = [0, 2], sizes = [128, 1], strides = [1, 1]} : vector<128x9xf32> to vector<128x1xf32>
    %c2_46 = arith.constant 2 : index
    %c0_47 = arith.constant 0 : index
    %c0_48 = arith.constant 0 : index
    %87 = vector.load %arg7[%c2_46, %c0_47, %c0_48] : memref<9x128x256xf32, #tpu.memory_space<vmem>>, vector<1x128x256xf32>
    %88 = vector.shape_cast %87 : vector<1x128x256xf32> to vector<128x256xf32>
    %89 = vector.broadcast %86 : vector<128x1xf32> to vector<128x256xf32>
    %90 = arith.mulf %89, %88 : vector<128x256xf32>
    %91 = arith.addf %85, %90 : vector<128x256xf32>
    %92 = vector.extract_strided_slice %74 {offsets = [0, 3], sizes = [128, 1], strides = [1, 1]} : vector<128x9xf32> to vector<128x1xf32>
    %c3_49 = arith.constant 3 : index
    %c0_50 = arith.constant 0 : index
    %c0_51 = arith.constant 0 : index
    %93 = vector.load %arg7[%c3_49, %c0_50, %c0_51] : memref<9x128x256xf32, #tpu.memory_space<vmem>>, vector<1x128x256xf32>
    %94 = vector.shape_cast %93 : vector<1x128x256xf32> to vector<128x256xf32>
    %95 = vector.broadcast %92 : vector<128x1xf32> to vector<128x256xf32>
    %96 = arith.mulf %95, %94 : vector<128x256xf32>
    %97 = arith.addf %91, %96 : vector<128x256xf32>
    %98 = vector.extract_strided_slice %74 {offsets = [0, 4], sizes = [128, 1], strides = [1, 1]} : vector<128x9xf32> to vector<128x1xf32>
    %c4_52 = arith.constant 4 : index
    %c0_53 = arith.constant 0 : index
    %c0_54 = arith.constant 0 : index
    %99 = vector.load %arg7[%c4_52, %c0_53, %c0_54] : memref<9x128x256xf32, #tpu.memory_space<vmem>>, vector<1x128x256xf32>
    %100 = vector.shape_cast %99 : vector<1x128x256xf32> to vector<128x256xf32>
    %101 = vector.broadcast %98 : vector<128x1xf32> to vector<128x256xf32>
    %102 = arith.mulf %101, %100 : vector<128x256xf32>
    %103 = arith.addf %97, %102 : vector<128x256xf32>
    %104 = vector.extract_strided_slice %74 {offsets = [0, 5], sizes = [128, 1], strides = [1, 1]} : vector<128x9xf32> to vector<128x1xf32>
    %c5_55 = arith.constant 5 : index
    %c0_56 = arith.constant 0 : index
    %c0_57 = arith.constant 0 : index
    %105 = vector.load %arg7[%c5_55, %c0_56, %c0_57] : memref<9x128x256xf32, #tpu.memory_space<vmem>>, vector<1x128x256xf32>
    %106 = vector.shape_cast %105 : vector<1x128x256xf32> to vector<128x256xf32>
    %107 = vector.broadcast %104 : vector<128x1xf32> to vector<128x256xf32>
    %108 = arith.mulf %107, %106 : vector<128x256xf32>
    %109 = arith.addf %103, %108 : vector<128x256xf32>
    %110 = vector.extract_strided_slice %74 {offsets = [0, 6], sizes = [128, 1], strides = [1, 1]} : vector<128x9xf32> to vector<128x1xf32>
    %c6_58 = arith.constant 6 : index
    %c0_59 = arith.constant 0 : index
    %c0_60 = arith.constant 0 : index
    %111 = vector.load %arg7[%c6_58, %c0_59, %c0_60] : memref<9x128x256xf32, #tpu.memory_space<vmem>>, vector<1x128x256xf32>
    %112 = vector.shape_cast %111 : vector<1x128x256xf32> to vector<128x256xf32>
    %113 = vector.broadcast %110 : vector<128x1xf32> to vector<128x256xf32>
    %114 = arith.mulf %113, %112 : vector<128x256xf32>
    %115 = arith.addf %109, %114 : vector<128x256xf32>
    %116 = vector.extract_strided_slice %74 {offsets = [0, 7], sizes = [128, 1], strides = [1, 1]} : vector<128x9xf32> to vector<128x1xf32>
    %c7_61 = arith.constant 7 : index
    %c0_62 = arith.constant 0 : index
    %c0_63 = arith.constant 0 : index
    %117 = vector.load %arg7[%c7_61, %c0_62, %c0_63] : memref<9x128x256xf32, #tpu.memory_space<vmem>>, vector<1x128x256xf32>
    %118 = vector.shape_cast %117 : vector<1x128x256xf32> to vector<128x256xf32>
    %119 = vector.broadcast %116 : vector<128x1xf32> to vector<128x256xf32>
    %120 = arith.mulf %119, %118 : vector<128x256xf32>
    %121 = arith.addf %115, %120 : vector<128x256xf32>
    %122 = vector.extract_strided_slice %74 {offsets = [0, 8], sizes = [128, 1], strides = [1, 1]} : vector<128x9xf32> to vector<128x1xf32>
    %c8_64 = arith.constant 8 : index
    %c0_65 = arith.constant 0 : index
    %c0_66 = arith.constant 0 : index
    %123 = vector.load %arg7[%c8_64, %c0_65, %c0_66] : memref<9x128x256xf32, #tpu.memory_space<vmem>>, vector<1x128x256xf32>
    %124 = vector.shape_cast %123 : vector<1x128x256xf32> to vector<128x256xf32>
    %125 = vector.broadcast %122 : vector<128x1xf32> to vector<128x256xf32>
    %126 = arith.mulf %125, %124 : vector<128x256xf32>
    %127 = arith.addf %121, %126 : vector<128x256xf32>
    %c0_67 = arith.constant 0 : index
    %c0_68 = arith.constant 0 : index
    %128 = vector.load %arg9[%c0_67, %c0_68] : memref<4x128xf32, #tpu.memory_space<vmem>>, vector<4x128xf32>
    %cst_69 = arith.constant dense<0.000000e+00> : vector<4x256xf32>
    %129 = tpu.matmul %128, %127, %cst_69 {dimension_numbers = #tpu.dot_dimension_numbers<[1], [0], [0], [1], [0, 0, 1, 1], [], []>} : vector<4x128xf32>, vector<128x256xf32>, vector<4x256xf32> -> vector<4x256xf32>
    %c0_70 = arith.constant 0 : index
    %c0_71 = arith.constant 0 : index
    %130 = vector.load %arg8[%c0_70, %c0_71] : memref<1x256xf32, #tpu.memory_space<vmem>>, vector<1x256xf32>
    %131 = vector.broadcast %130 : vector<1x256xf32> to vector<4x256xf32>
    %132 = arith.addf %129, %131 : vector<4x256xf32>
    %cst_72 = arith.constant 0.000000e+00 : f32
    %133 = vector.broadcast %cst_72 : f32 to vector<4x256xf32>
    %134 = arith.maximumf %132, %133 : vector<4x256xf32>
    %135 = arith.truncf %134 : vector<4x256xf32> to vector<4x256xbf16>
    %c0_73 = arith.constant 0 : index
    %c0_74 = arith.constant 0 : index
    %136 = vector.load %arg10[%c0_73, %c0_74] : memref<256x6xbf16, #tpu.memory_space<vmem>>, vector<256x6xbf16>
    %cst_75 = arith.constant dense<0.000000e+00> : vector<4x6xf32>
    %137 = tpu.matmul %135, %136, %cst_75 {dimension_numbers = #tpu.dot_dimension_numbers<[1], [0], [0], [1], [0, 0, 1, 1], [], []>} : vector<4x256xbf16>, vector<256x6xbf16>, vector<4x6xf32> -> vector<4x6xf32>
    %c0_76 = arith.constant 0 : index
    %c0_77 = arith.constant 0 : index
    %138 = vector.load %arg11[%c0_76, %c0_77] : memref<1x6xf32, #tpu.memory_space<vmem>>, vector<1x6xf32>
    %139 = vector.broadcast %138 : vector<1x6xf32> to vector<4x6xf32>
    %140 = arith.addf %137, %139 : vector<4x6xf32>
    %c0_78 = arith.constant 0 : index
    %c0_79 = arith.constant 0 : index
    %c0_80 = arith.constant 0 : index
    %141 = vector.load %arg12[%c0_78, %c0_79, %c0_80] : memref<1x4x6xf32, #tpu.memory_space<vmem>>, vector<1x4x6xf32>
    %142 = vector.shape_cast %141 : vector<1x4x6xf32> to vector<4x6xf32>
    %143 = vector.shape_cast %140 : vector<4x6xf32> to vector<1x4x6xf32>
    tpu.vector_store %arg12[%c0_78, %c0_79, %c0_80], %143 {strides = array<i32>} : memref<1x4x6xf32, #tpu.memory_space<vmem>>, vector<1x4x6xf32>,
    return
  }
  func.func @transform_0(%arg0: i32) -> (i32, i32) {
    %c0_i32 = arith.constant 0 : i32
    %c0_i32_0 = arith.constant 0 : i32
    return %arg0, %c0_i32 : i32, i32
  }
  func.func @transform_1(%arg0: i32) -> (i32, i32) {
    %c0_i32 = arith.constant 0 : i32
    %c0_i32_0 = arith.constant 0 : i32
    %c0_i32_1 = arith.constant 0 : i32
    return %c0_i32, %c0_i32_0 : i32, i32
  }
  func.func @transform_2(%arg0: i32) -> (i32, i32) {
    %c0_i32 = arith.constant 0 : i32
    %c0_i32_0 = arith.constant 0 : i32
    %c0_i32_1 = arith.constant 0 : i32
    return %c0_i32, %c0_i32_0 : i32, i32
  }
  func.func @transform_3(%arg0: i32) -> (i32, i32) {
    %c0_i32 = arith.constant 0 : i32
    %c0_i32_0 = arith.constant 0 : i32
    %c0_i32_1 = arith.constant 0 : i32
    return %c0_i32, %c0_i32_0 : i32, i32
  }
  func.func @transform_4(%arg0: i32) -> (i32, i32, i32) {
    %c0_i32 = arith.constant 0 : i32
    %c0_i32_0 = arith.constant 0 : i32
    %c0_i32_1 = arith.constant 0 : i32
    %c0_i32_2 = arith.constant 0 : i32
    return %c0_i32, %c0_i32_0, %c0_i32_1 : i32, i32, i32
  }
  func.func @transform_5(%arg0: i32) -> (i32, i32) {
    %c0_i32 = arith.constant 0 : i32
    %c0_i32_0 = arith.constant 0 : i32
    %c0_i32_1 = arith.constant 0 : i32
    return %c0_i32, %c0_i32_0 : i32, i32
  }
  func.func @transform_6(%arg0: i32) -> (i32, i32, i32) {
    %c0_i32 = arith.constant 0 : i32
    %c0_i32_0 = arith.constant 0 : i32
    %c0_i32_1 = arith.constant 0 : i32
    %c0_i32_2 = arith.constant 0 : i32
    return %c0_i32, %c0_i32_0, %c0_i32_1 : i32, i32, i32
  }
  func.func @transform_7(%arg0: i32) -> (i32, i32) {
    %c0_i32 = arith.constant 0 : i32
    %c0_i32_0 = arith.constant 0 : i32
    %c0_i32_1 = arith.constant 0 : i32
    return %c0_i32, %c0_i32_0 : i32, i32
  }
  func.func @transform_8(%arg0: i32) -> (i32, i32) {
    %c0_i32 = arith.constant 0 : i32
    %c0_i32_0 = arith.constant 0 : i32
    %c0_i32_1 = arith.constant 0 : i32
    return %c0_i32, %c0_i32_0 : i32, i32
  }
  func.func @transform_9(%arg0: i32) -> (i32, i32) {
    %c0_i32 = arith.constant 0 : i32
    %c0_i32_0 = arith.constant 0 : i32
    %c0_i32_1 = arith.constant 0 : i32
    return %c0_i32, %c0_i32_0 : i32, i32
  }
  func.func @transform_10(%arg0: i32) -> (i32, i32) {
    %c0_i32 = arith.constant 0 : i32
    %c0_i32_0 = arith.constant 0 : i32
    %c0_i32_1 = arith.constant 0 : i32
    return %c0_i32, %c0_i32_0 : i32, i32
  }
  func.func @transform_11(%arg0: i32) -> (i32, i32, i32) {
    %c0_i32 = arith.constant 0 : i32
    %c0_i32_0 = arith.constant 0 : i32
    %c0_i32_1 = arith.constant 0 : i32
    return %arg0, %c0_i32, %c0_i32_0 : i32, i32, i32
  }
}

</mosaic_0001>

<bundles_post_ra>
// kernel: dqn2_forward.1
= control target key start
LH: loop header
LB: loop body
LE: loop exit
PB: predicated region body
PF: predicated region fallthrough
CT: control target
= control target key end

     0   :  { %s9925_s0 = inlined_call_operand.vmem [shape: bf16[128,1024], index: 0, kind: input, shape index: {}]   ;;  %s9926_s1 = inlined_call_operand.vmem [shape: bf16[64,64], index: 1, kind: input, shape index: {}]   ;;  %s9927_s2 = inlined_call_operand.vmem [shape: f32[64,1], index: 2, kind: input, shape index: {}]   ;;  %s9928_s3 = inlined_call_operand.vmem [shape: bf16[256,324], index: 3, kind: input, shape index: {}]   ;;  %s9929_s4 = inlined_call_operand.vmem [shape: bf16[9,128,64], index: 4, kind: input, shape index: {}]   ;;  %s9930_s5 = inlined_call_operand.vmem [shape: f32[128,1], index: 5, kind: input, shape index: {}]   ;;  %s9931_s6 = inlined_call_operand.vmem [shape: f32[9,128,256], index: 6, kind: input, shape index: {}]   ;;  %s9932_s7 = inlined_call_operand.vmem [shape: f32[1,256], index: 7, kind: input, shape index: {}]   ;;  %s9933_s8 = inlined_call_operand.vmem [shape: f32[4,128], index: 8, kind: input, shape index: {}]   ;;  %s9934_s9 = inlined_call_operand.vmem [shape: bf16[256,6], index: 9, kind: input, shape index: {}]   ;;  %s9935_s10 = inlined_call_operand.vmem [shape: f32[1,6], index: 10, kind: input, shape index: {}]   ;;  %s9936_s11 = inlined_call_operand.hbm [shape: f32[2,4,6], index: 11, kind: output, shape index: {}]  }
   0x1   :  { %9949 = sst [smem:[#allocation48_spill]] %s9925_s0 }
   0x2   :  { %9950 = sst [smem:[#allocation49_spill]] %s9926_s1 }
   0x3   :  { %16 = vsyncpa [#allocation3], 0 }
   0x4   :  { %18 = vsyncpa [#allocation3 + $0x1], 0  ;;  %s6659_s17 = smov 0   ;;  %s6661_s18 = smov 0  }
   0x5   :  { %s6663_s19 = smov 0   ;;  %s6665_s20 = smov 0  }
   0x6 LB: > { %s6680_s21 = sadd.s32 4294967295, %s6578_s20   ;;  %s4951_s22 = sadd.s32 4294967294, %s6578_s20   ;;  %s6578_s20 = sphi %s6665_s20, %s10053_s20   ;;  %s6574_s19 = sphi %s6663_s19, %s10052_s19   ;;  %s6570_s18 = sphi %s6661_s18, %s10051_s18   ;;  %s6566_s17 = sphi %s6659_s17, %s10050_s17  }
   0x7   : > { %s6684_s23 = sadd.s32 1, %s6578_s20   ;;  %s267_s24 = sadd.s32 1, %s6574_s19 }
   0x8   : > { %s264_s25 = ssub.s32 %s6578_s20, %s6684_s23  ;;  %p277_p0 = scmp.ne.s32.totalorder %s6574_s19, %s6570_s18 }
   0x9   : > { %p265_p1 = scmp.eq.s32.totalorder %s264_s25, 0  ;;  %p278_p2 = scmp.eq.s32.totalorder %s6680_s21, 1 }
   0xa   : > { %p283_p3 = scmp.ne.s32.totalorder %s6570_s18, %s6566_s17  ;;  %p284_p4 = scmp.eq.s32.totalorder %s4951_s22, 1 }
   0xb   : > { %s6695_s26 = scalar_select %p265_p1, %s6574_s19, %s267_s24  }
   0xc   : > { %p6697_p5 = por %p278_p2, %p277_p0  ;;  %p6701_p6 = por %p284_p4, %p283_p3 }
   0xd   : > { %p4954_p7 = scmp.ge.s32.totalorder %s6578_s20, 1  ;;  %p342_p8 = scmp.lt.s32.totalorder %s6578_s20, 3 }
   0xf   : > { %p343_p9 = pnand %p4954_p7, %p342_p8 }
  0x11   : > { %346 = sbr.rel (%p343_p9) target bundleno = 2144 (0x860), region = 64 }
  0x16   : > { %s4956_s29 = sshll.u32 %s6680_s21, 3  ;;  %v9937_v0 = vmov 0   ;;  %s9953_s0 = sld [smem:[#allocation48_spill]]  ;;  %v433_v29 = vld [vmem:[%s9927_s2 + $0x10] sm:$0xff]  ;;  %v434_v39 = vld [vmem:[%s9927_s2 + $0x18] sm:$0xff]  ;;  %vm659_vm0 = vcmask 523264  }
  0x17   : > { %p384_p10 = scmp.lt.s32.totalorder %s4956_s29, 15  ;;  %6375 = vset.pattern.permute.xlu1 %v9937_v0  ;;  %6374 = vset.pattern.permute.xlu0 %v9937_v0  ;;  %s9954_s1 = sld [smem:[#allocation49_spill]]  ;;  %v431_v44 = vld [vmem:[%s9927_s2] sm:$0xff]  ;;  %v432_v56 = vld [vmem:[%s9927_s2 + $0x8] sm:$0xff]  ;;  %vm1814_vm1 = vcmask 162816   ;;  %vm2165_vm2 = vcmask 31744  }
  0x18   : > { %6376 = vset.pattern.permute.xlu2 %v9937_v0  ;;  %451 = vperm.xlu1 %6375, %v433_v29   ;;  %s6581_s12 = smov 92   ;;  %s6582_s13 = smov 20   ;;  %vm4874_vm3 = vcmask 44032  }
  0x19   : > { %s10055_s29 = smov (!%p384_p10, %s4956_s29), 15  ;;  %441 = vperm.xlu0 %6374, %v431_v44   ;;  %s6583_s15 = smov 76  }
  0x1a   : > { %s6139_s30 = sshll.u32 %s10055_s29, 5  ;;  %s6584_s16 = smov 4  }
  0x1b   : > { %s6585_s22 = smov 56   ;;  %s6586_s24 = smov 112  }
  0x1c   : > { %s6714_s14 = scalar_lea.vmem %s9953_s0, %s6139_s30  ;;  %s6587_s25 = smov 96  }
  0x1d   : > { %v5073_v1 = vld [vmem:[%s6714_s14 + $0xc0] sm:$0xf]  ;;  %v5081_v3 = vld [vmem:[%s6714_s14 + $0xc8] sm:$0xf]  ;;  %v6168_v11 = vld [vmem:[%s6714_s14 + $0xc4] sm:$0xf] }
  0x1e   : > { %v6172_v2 = vld [vmem:[%s6714_s14 + $0xdc] sm:$0xf0]  ;;  %v6173_v5 = vld [vmem:[%s6714_s14 + $0xe4] sm:$0xf0]  ;;  %v5075_v13 = vld [vmem:[%s6714_s14 + $0xe0] sm:$0xf0] }
  0x1f   : > { %v5074_v4 = vor.u32 %v6172_v2, %v5073_v1  ;;  %v5041_v6 = vld [vmem:[%s6714_s14 + $0x80] sm:$0xf]  ;;  %v5082_v8 = vor.u32 %v6173_v5, %v5081_v3  ;;  %v5049_v9 = vld [vmem:[%s6714_s14 + $0x88] sm:$0xf]  ;;  %v5078_v15 = vor.u32 %v6168_v11, %v5075_v13  ;;  %v6160_v18 = vld [vmem:[%s6714_s14 + $0x84] sm:$0xf] }
  0x20   : > { %v6164_v7 = vld [vmem:[%s6714_s14 + $0x9c] sm:$0xf0]  ;;  %v6165_v10 = vld [vmem:[%s6714_s14 + $0xa4] sm:$0xf0]  ;;  %v5043_v21 = vld [vmem:[%s6714_s14 + $0xa0] sm:$0xf0]  ;;  %456 = vperm.xlu1 %6375, %v434_v39  }
  0x21   : > { %676 = vmatpush.bf16.msra.mxu0 %v5074_v4  ;;  %v5042_v12 = vor.u32 %v6164_v7, %v5041_v6  ;;  %6312 = vmatpush.bf16.msra.mxu3 %v5082_v8  ;;  %v5050_v14 = vor.u32 %v6165_v10, %v5049_v9  ;;  %v5009_v16 = vld [vmem:[%s6714_s14 + $0x40] sm:$0xf]  ;;  %v5017_v19 = vld [vmem:[%s6714_s14 + $0x48] sm:$0xf]  ;;  %v5046_v22 = vor.u32 %v6160_v18, %v5043_v21  ;;  %v6152_v24 = vld [vmem:[%s6714_s14 + $0x44] sm:$0xf] }
  0x22   : > { %v6156_v17 = vld [vmem:[%s6714_s14 + $0x5c] sm:$0xf0]  ;;  %734 = vmatpush.bf16.msra.mxu2 %v5082_v8  ;;  %v6157_v20 = vld [vmem:[%s6714_s14 + $0x64] sm:$0xf0]  ;;  %705 = vmatpush.bf16.msra.mxu1 %v5078_v15  ;;  %v5011_v25 = vld [vmem:[%s6714_s14 + $0x60] sm:$0xf0] }
  0x23   : > { %v5010_v23 = vor.u32 %v6156_v17, %v5009_v16  ;;  %v5018_v26 = vor.u32 %v6157_v20, %v5017_v19  ;;  %v4977_v27 = vld [vmem:[%s6714_s14] sm:$0xf]  ;;  %v4985_v30 = vld [vmem:[%s6714_s14 + $0x8] sm:$0xf]  ;;  %v5014_v32 = vor.u32 %v6152_v24, %v5011_v25  ;;  %v6144_v34 = vld [vmem:[%s6714_s14 + $0x4] sm:$0xf]  ;;  %446 = vperm.xlu0 %6374, %v432_v56  }
  0x24   : > { %v6148_v28 = vld [vmem:[%s6714_s14 + $0x1c] sm:$0xf0]  ;;  %v6149_v31 = vld [vmem:[%s6714_s14 + $0x24] sm:$0xf0]  ;;  %v4979_v35 = vld [vmem:[%s6714_s14 + $0x20] sm:$0xf0] }
  0x25   : > { %677 = vmatpush.bf16.msra.mxu0 %v5042_v12  ;;  %6313 = vmatpush.bf16.msra.mxu3 %v5050_v14  ;;  %v4978_v33 = vor.u32 %v6148_v28, %v4977_v27  ;;  %v4986_v36 = vor.u32 %v6149_v31, %v4985_v30  ;;  %v6746_v37 = vld [vmem:[%s9954_s1] sm:$0xff]  ;;  %v4982_v38 = vor.u32 %v6144_v34, %v4979_v35  ;;  %v6754_v40 = vld [vmem:[%s9954_s1 + $0x8] sm:$0xff]  ;;  %v5097_v50 = vld [vmem:[%s6714_s14 + $0xd8] sm:$0xf]  ;;  %s6588_s29 = smov 40   ;;  %s380_s0 = sand.u32 1, %s6570_s18  }
  0x26   : > { %735 = vmatpush.bf16.msra.mxu2 %v5050_v14  ;;  %706 = vmatpush.bf16.msra.mxu1 %v5046_v22  ;;  %v6169_v41 = vld [vmem:[%s6714_s14 + $0xcc] sm:$0xf]  ;;  %v6175_v51 = vld [vmem:[%s6714_s14 + $0xf4] sm:$0xf0]  ;;  %v6785_v61 = vld [vmem:[%s9954_s1 + $0x10] sm:$0xff] }
  0x27   : > { %v5083_v42 = vld [vmem:[%s6714_s14 + $0xe8] sm:$0xf0]  ;;  %v5098_v52 = vor.u32 %v6175_v51, %v5097_v50  ;;  %v5065_v53 = vld [vmem:[%s6714_s14 + $0x98] sm:$0xf]  ;;  %v5089_v62 = vld [vmem:[%s6714_s14 + $0xd0] sm:$0xf] }
  0x28   : > { %v5086_v43 = vor.u32 %v6169_v41, %v5083_v42  ;;  %v6161_v45 = vld [vmem:[%s6714_s14 + $0x8c] sm:$0xf]  ;;  %v6167_v54 = vld [vmem:[%s6714_s14 + $0xb4] sm:$0xf0]  ;;  %v6174_v63 = vld [vmem:[%s6714_s14 + $0xec] sm:$0xf0] }
  0x29   : > { %678 = vmatpush.bf16.msra.mxu0 %v5010_v23  ;;  %6314 = vmatpush.bf16.msra.mxu3 %v5018_v26  ;;  %v5051_v46 = vld [vmem:[%s6714_s14 + $0xa8] sm:$0xf0]  ;;  %v5066_v59 = vor.u32 %v6167_v54, %v5065_v53  ;;  %v5090_v1 = vor.u32 %v6174_v63, %v5089_v62  ;;  %v437_v2 = vld [vmem:[%s9927_s2 + $0x30] sm:$0xff]  ;;  %v5033_v3 = vld [vmem:[%s6714_s14 + $0x58] sm:$0xf] }
  0x2a   : > { %736 = vmatpush.bf16.msra.mxu2 %v5018_v26  ;;  %707 = vmatpush.bf16.msra.mxu1 %v5014_v32  ;;  %v5054_v47 = vor.u32 %v6161_v45, %v5051_v46  ;;  %v6153_v48 = vld [vmem:[%s6714_s14 + $0x4c] sm:$0xf]  ;;  %v6159_v4 = vld [vmem:[%s6714_s14 + $0x74] sm:$0xf0]  ;;  %v5057_v6 = vld [vmem:[%s6714_s14 + $0x90] sm:$0xf] }
  0x2b   : > { %v5019_v49 = vld [vmem:[%s6714_s14 + $0x68] sm:$0xf0]  ;;  %471 = vperm.xlu0 %6374, %v437_v2   ;;  %v5034_v5 = vor.u32 %v6159_v4, %v5033_v3  ;;  %v6166_v7 = vld [vmem:[%s6714_s14 + $0xac] sm:$0xf0]  ;;  %v6170_v9 = vld [vmem:[%s6714_s14 + $0xd4] sm:$0xf] }
  0x2c   : > { %v5022_v55 = vor.u32 %v6153_v48, %v5019_v49  ;;  %v6145_v57 = vld [vmem:[%s6714_s14 + $0xc] sm:$0xf]  ;;  %v5058_v8 = vor.u32 %v6166_v7, %v5057_v6  ;;  %v5091_v10 = vld [vmem:[%s6714_s14 + $0xf0] sm:$0xf0]  ;;  %v5001_v11 = vld [vmem:[%s6714_s14 + $0x18] sm:$0xf] }
  0x2d   : > { %679 = vmatpush.bf16.msra.mxu0 %v4978_v33  ;;  %6315 = vmatpush.bf16.msra.mxu3 %v4986_v36  ;;  %v4987_v58 = vld [vmem:[%s6714_s14 + $0x28] sm:$0xf0]  ;;  %v5094_v12 = vor.u32 %v6170_v9, %v5091_v10  ;;  %v6151_v13 = vld [vmem:[%s6714_s14 + $0x34] sm:$0xf0]  ;;  %v435_v14 = vld [vmem:[%s9927_s2 + $0x20] sm:$0xff] }
  0x2e   : > { %737 = vmatpush.bf16.msra.mxu2 %v4986_v36  ;;  %708 = vmatpush.bf16.msra.mxu1 %v4982_v38  ;;  %v4990_v60 = vor.u32 %v6145_v57, %v4987_v58  ;;  %v438_v15 = vld [vmem:[%s9927_s2 + $0x38] sm:$0xff]  ;;  %v5002_v16 = vor.u32 %v6151_v13, %v5001_v11  ;;  %v5025_v17 = vld [vmem:[%s6714_s14 + $0x50] sm:$0xf]  ;;  %v6162_v19 = vld [vmem:[%s6714_s14 + $0x94] sm:$0xf] }
  0x2f   : > { %461 = vperm.xlu2 %6376, %v435_v14   ;;  %476 = vperm.xlu1 %6375, %v438_v15   ;;  %v6158_v18 = vld [vmem:[%s6714_s14 + $0x6c] sm:$0xf0]  ;;  %v5059_v21 = vld [vmem:[%s6714_s14 + $0xb0] sm:$0xf0]  ;;  %v6825_v29 = vld [vmem:[%s9954_s1 + $0x18] sm:$0xff] }
  0x30   : > { %5103 = vmatmul.msk.bf16.vlgmr.msra.gmra.mxu0 %vm659_vm0, %v6746_v37  ;;  %5112 = vmatmul.msk.bf16.vlgmr.msra.gmra.mxu3 %vm659_vm0, %v6754_v40  ;;  %v5026_v20 = vor.u32 %v6158_v18, %v5025_v17  ;;  %v4993_v22 = vld [vmem:[%s6714_s14 + $0x10] sm:$0xf]  ;;  %v5062_v23 = vor.u32 %v6162_v19, %v5059_v21  ;;  %v6154_v25 = vld [vmem:[%s6714_s14 + $0x54] sm:$0xf]  ;;  %v436_v30 = vld [vmem:[%s9927_s2 + $0x28] sm:$0xff] }
  0x31   : > { %5111 = vmatmul.msk.bf16.vlgmr.msra.gmra.mxu2 %vm659_vm0, %v6746_v37  ;;  %763 = vmatpush.bf16.msrb.mxu3 %v5086_v43  ;;  %v6150_v24 = vld [vmem:[%s6714_s14 + $0x2c] sm:$0xf0]  ;;  %v5027_v26 = vld [vmem:[%s6714_s14 + $0x70] sm:$0xf0]  ;;  %v6171_v34 = vld [vmem:[%s6714_s14 + $0xdc] sm:$0xf] }
  0x32   : > { %5107 = vmatmul.msk.bf16.vlgmr.msra.gmra.mxu1 %vm659_vm0, %v6746_v37  ;;  %850 = vmatpush.bf16.msrb.mxu2 %v5098_v52  ;;  %v4994_v27 = vor.u32 %v6150_v24, %v4993_v22  ;;  %v5030_v28 = vor.u32 %v6154_v25, %v5027_v26  ;;  %v6146_v31 = vld [vmem:[%s6714_s14 + $0x14] sm:$0xf]  ;;  %v5099_v35 = vld [vmem:[%s6714_s14 + $0xf8] sm:$0xf0]  ;;  %v5211_v6 = vld [vmem:[%s9928_s3 + $0x9c] sm:$0xf0] }
  0x33   : > { %792 = vmatpush.bf16.msrb.mxu0 %v5090_v1  ;;  %821 = vmatpush.bf16.msrb.mxu1 %v5094_v12  ;;  %v4995_v32 = vld [vmem:[%s6714_s14 + $0x30] sm:$0xf0]  ;;  %v5102_v36 = vor.u32 %v6171_v34, %v5099_v35  ;;  %v6163_v38 = vld [vmem:[%s6714_s14 + $0x9c] sm:$0xf]  ;;  %v5209_v1 = vld [vmem:[%s9928_s3 + $0x90] sm:$0xf] }
  0x34   : > { %v4998_v33 = vor.u32 %v6146_v31, %v4995_v32  ;;  %v5067_v39 = vld [vmem:[%s6714_s14 + $0xb8] sm:$0xf0]  ;;  %v5197_v11 = vld [vmem:[%s9928_s3 + $0x78] sm:$0xf]  ;;  %v6192_v12 = vld [vmem:[%s9928_s3 + $0x80] sm:$0xf0] }
  0x35   : > { %764 = vmatpush.bf16.msrb.mxu3 %v5054_v47  ;;  %v5070_v41 = vor.u32 %v6163_v38, %v5067_v39  ;;  %v6155_v42 = vld [vmem:[%s6714_s14 + $0x5c] sm:$0xf]  ;;  %v5198_v13 = vor.u32 %v6192_v12, %v5197_v11  ;;  %v5199_v15 = vld [vmem:[%s9928_s3 + $0x84] sm:$0xf0]  ;;  %v5185_v18 = vld [vmem:[%s9928_s3 + $0x60] sm:$0xf] }
  0x36   : > { %851 = vmatpush.bf16.msrb.mxu2 %v5066_v59  ;;  %v5035_v43 = vld [vmem:[%s6714_s14 + $0x78] sm:$0xf0]  ;;  %v6197_v59 = vld [vmem:[%s9928_s3 + $0xac] sm:$0xf]  ;;  %v5187_v24 = vld [vmem:[%s9928_s3 + $0x6c] sm:$0xf0] }
  0x37   : > { %793 = vmatpush.bf16.msrb.mxu0 %v5058_v8  ;;  %822 = vmatpush.bf16.msrb.mxu1 %v5062_v23  ;;  %v5038_v44 = vor.u32 %v6155_v42, %v5035_v43  ;;  %v6147_v45 = vld [vmem:[%s6714_s14 + $0x1c] sm:$0xf]  ;;  %v6189_v19 = vld [vmem:[%s9928_s3 + $0x68] sm:$0xf0]  ;;  %v6188_v23 = vld [vmem:[%s9928_s3 + $0x64] sm:$0xf] }
  0x38   : > { %466 = vperm.xlu2 %6376, %v436_v30   ;;  %v5003_v46 = vld [vmem:[%s6714_s14 + $0x38] sm:$0xf0]  ;;  %v5186_v22 = vor.u32 %v6189_v19, %v5185_v18  ;;  %v5190_v26 = vor.u32 %v6188_v23, %v5187_v24  ;;  %v5173_v31 = vld [vmem:[%s9928_s3 + $0x48] sm:$0xf]  ;;  %v6186_v32 = vld [vmem:[%s9928_s3 + $0x50] sm:$0xf0] }
  0x39   : > { %765 = vmatpush.bf16.msrb.mxu3 %v5022_v55  ;;  %v5006_v47 = vor.u32 %v6147_v45, %v5003_v46  ;;  %v5221_v55 = vld [vmem:[%s9928_s3 + $0xa8] sm:$0xf]  ;;  %v6195_v2 = vld [vmem:[%s9928_s3 + $0x98] sm:$0xf0]  ;;  %v5174_v35 = vor.u32 %v6186_v32, %v5173_v31  ;;  %v5175_v38 = vld [vmem:[%s9928_s3 + $0x54] sm:$0xf0] }
  0x3a   : > { %852 = vmatpush.bf16.msrb.mxu2 %v5034_v5  ;;  %v5210_v5 = vor.u32 %v6195_v2, %v5209_v1  ;;  %v6191_v14 = vld [vmem:[%s9928_s3 + $0x7c] sm:$0xf]  ;;  %v5161_v43 = vld [vmem:[%s9928_s3 + $0x30] sm:$0xf]  ;;  %v6177_v1 = vld [vmem:[%s9928_s3 + $0x8] sm:$0xf0] }
  0x3b   : > { %794 = vmatpush.bf16.msrb.mxu0 %v5026_v20  ;;  %823 = vmatpush.bf16.msrb.mxu1 %v5030_v28  ;;  %v5202_v17 = vor.u32 %v6191_v14, %v5199_v15  ;;  %s6589_s14 = smov 119  }
  0x3d   : > { %766 = vmatpush.bf16.msrb.mxu3 %v4990_v60  ;;  %v5223_v60 = vld [vmem:[%s9928_s3 + $0xb4] sm:$0xf0] }
  0x3e   : > { %853 = vmatpush.bf16.msrb.mxu2 %v5002_v16  ;;  %v5226_v62 = vor.u32 %v6197_v59, %v5223_v60 }
  0x3f   : > { %795 = vmatpush.bf16.msrb.mxu0 %v4994_v27  ;;  %824 = vmatpush.bf16.msrb.mxu1 %v4998_v33 }
  0x40   : > { %5104 = vmatmul.msk.bf16.gmra.mxu0 %vm659_vm0, %v6754_v40  ;;  %5113 = vmatmul.msk.bf16.gmra.mxu3 %vm659_vm0, %v6785_v61 }
  0x41   : > { %5127 = vmatmul.msk.bf16.vlgmr.msrb.gmra.mxu2 %vm659_vm0, %v6746_v37  ;;  %879 = vmatpush.bf16.msra.mxu3 %v5102_v36  ;;  %v6185_v36 = vld [vmem:[%s9928_s3 + $0x4c] sm:$0xf] }
  0x42   : > { %5108 = vmatmul.msk.bf16.gmra.mxu1 %vm659_vm0, %v6754_v40  ;;  %1402 = vmatpush.bf16.msra.mxu2 %v5226_v62  ;;  %v5137_v62 = vld [vmem:[%s9928_s3] sm:$0xf] }
  0x45   : > { %880 = vmatpush.bf16.msra.mxu3 %v5070_v41  ;;  %v5178_v41 = vor.u32 %v6185_v36, %v5175_v38 }
  0x49   : > { %881 = vmatpush.bf16.msra.mxu3 %v5038_v44  ;;  %v6183_v44 = vld [vmem:[%s9928_s3 + $0x38] sm:$0xf0] }
  0x4a   : > { %v5162_v46 = vor.u32 %v6183_v44, %v5161_v43 }
  0x4d   : > { %882 = vmatpush.bf16.msra.mxu3 %v5006_v47  ;;  %v5163_v47 = vld [vmem:[%s9928_s3 + $0x3c] sm:$0xf0] }
  0x50   : > { %5105 = vmatmul.msk.bf16.gmra.mxu0 %vm659_vm0, %v6785_v61  ;;  %5114 = vmatmul.msk.bf16.gmra.mxu3 %vm659_vm0, %v6825_v29 }
  0x51   : > { %5128 = vmatmul.msk.bf16.gmra.mxu2 %vm659_vm0, %v6754_v40 }
  0x52   : > { %5109 = vmatmul.msk.bf16.gmra.mxu1 %vm659_vm0, %v6785_v61 }
  0x60   : > { %5106 = vmatmul.msk.bf16.gmra.mxu0 %vm659_vm0, %v6825_v29  ;;  %5115 = vmatmul.msk.bf16.vlgmr.msrb.gmra.mxu3 %vm659_vm0, %v6746_v37 }
  0x61   : > { %5129 = vmatmul.msk.bf16.gmra.mxu2 %vm659_vm0, %v6785_v61 }
  0x62   : > { %5110 = vmatmul.msk.bf16.gmra.mxu1 %vm659_vm0, %v6825_v29 }
  0x70   : > { %5119 = vmatmul.msk.bf16.vlgmr.msrb.gmra.mxu0 %vm659_vm0, %v6746_v37  ;;  %5116 = vmatmul.msk.bf16.gmra.mxu3 %vm659_vm0, %v6754_v40 }
  0x71   : > { %5130 = vmatmul.msk.bf16.gmra.mxu2 %vm659_vm0, %v6825_v29 }
  0x72   : > { %5123 = vmatmul.msk.bf16.vlgmr.msrb.gmra.mxu1 %vm659_vm0, %v6746_v37 }
  0x80   : > { %5120 = vmatmul.msk.bf16.gmra.mxu0 %vm659_vm0, %v6754_v40  ;;  %5117 = vmatmul.msk.bf16.gmra.mxu3 %vm659_vm0, %v6785_v61 }
  0x82   : > { %5124 = vmatmul.msk.bf16.gmra.mxu1 %vm659_vm0, %v6754_v40 }
  0x89   : > { %v6942_v16 = vpop.permute.xlu2 %461 }
  0x8a   : > { %v6888_v51 = vpop.permute.xlu1 %451 }
  0x8b   : > { %v6924_v7 = vpop.permute.xlu0 %441 }
  0x90   : > { %5121 = vmatmul.msk.bf16.gmra.mxu0 %vm659_vm0, %v6785_v61  ;;  %5118 = vmatmul.msk.bf16.gmra.mxu3 %vm659_vm0, %v6825_v29 }
  0x92   : > { %5125 = vmatmul.msk.bf16.gmra.mxu1 %vm659_vm0, %v6785_v61 }
  0x95   : > { %v6962_v30 = vpop.permute.xlu0 %446 }
  0xa0   : > { %5122 = vmatmul.msk.bf16.gmra.mxu0 %vm659_vm0, %v6825_v29  ;;  %5131 = vmatmul.msk.bf16.vlgmr.msra.gmra.mxu3 %vm659_vm0, %v6746_v37 }
  0xa2   : > { %5126 = vmatmul.msk.bf16.gmra.mxu1 %vm659_vm0, %v6825_v29 }
  0xad   : > { %v6882_v48 = vpop.f32.mrf.mxu0 }
  0xaf   : > { %v6916_v3 = vpop.f32.mrf.mxu1 }
  0xb0   : > { %5132 = vmatmul.msk.bf16.gmra.mxu3 %vm659_vm0, %v6754_v40  ;;  %v6198_v40 = vld [vmem:[%s9928_s3 + $0xb0] sm:$0xf0]  ;;  %v711_v15 = vadd.f32 %v6916_v3, %v6924_v7  ;;  %v682_v3 = vadd.f32 %v6882_v48, %v6924_v7 }
  0xb1   : > { %v5222_v58 = vor.u32 %v6198_v40, %v5221_v55 }
  0xb2   : > { %v905_v23 = vmax.f32 %v711_v15, 0.0 }
  0xb3   : > { %v744_v49 = vpop.f32.mrf.mxu3  ;;  %1344 = vmatpush.bf16.msra.mxu0 %v5222_v58  ;;  %v7006_v58 = vpop.permute.xlu0 %471 }
  0xb4   : > { %v745_v52 = vadd.f32 %v744_v49, %v6888_v51  ;;  %v6928_v10 = vpop.f32.mrf.mxu2 }
  0xb5   : > { %v6886_v50 = vpop.f32.mrf.mxu0 }
  0xb6   : > { %v922_v56 = vmax.f32 %v745_v52, 0.0  ;;  %v684_v36 = vadd.f32 %v6886_v50, %v6962_v30  ;;  %v5317_v50 = vld [vmem:[%s9928_s3 + $0x168] sm:$0xf] }
  0xb7   : > { %1345 = vmatpush.bf16.msra.mxu0 %v5210_v5  ;;  %v6959_v27 = vpop.f32.mrf.mxu1  ;;  %v5138_v5 = vor.u32 %v6177_v1, %v5137_v62  ;;  %v5319_v62 = vld [vmem:[%s9928_s3 + $0x174] sm:$0xf0] }
  0xb8   : > { %v912_v48 = vmax.f32 %v684_v36, 0.0  ;;  %v6216_v36 = vld [vmem:[%s9928_s3 + $0x140] sm:$0xf0] }
  0xbb   : > { %v6891_v53 = vpop.f32.mrf.mxu3  ;;  %1346 = vmatpush.bf16.msra.mxu0 %v5198_v13 }
  0xbc   : > { %v741_v39 = vpop.f32.mrf.mxu2 }
  0xbd   : > { %v686_v54 = vpop.f32.mrf.mxu0  ;;  %v742_v43 = vadd.f32 %v741_v39, %v6962_v30  ;;  %v6222_v39 = vld [vmem:[%s9928_s3 + $0x170] sm:$0xf0] }
  0xbe   : > { %v687_v37 = vadd.f32 %v686_v54, %v6888_v51  ;;  %v5149_v54 = vld [vmem:[%s9928_s3 + $0x18] sm:$0xf] }
  0xbf   : > { %1347 = vmatpush.bf16.msra.mxu0 %v5186_v22  ;;  %v715_v55 = vpop.f32.mrf.mxu1 }
  0xc0   : > { %v920_v57 = vmax.f32 %v687_v37, 0.0  ;;  %5133 = vmatmul.msk.bf16.gmra.mxu3 %vm659_vm0, %v6785_v61  ;;  %v6194_v61 = vld [vmem:[%s9928_s3 + $0x94] sm:$0xf]  ;;  %v6180_v37 = vld [vmem:[%s9928_s3 + $0x20] sm:$0xf0] }
  0xc1   : > { %v5214_v9 = vor.u32 %v6194_v61, %v5211_v6  ;;  %v5150_v40 = vor.u32 %v6180_v37, %v5149_v54  ;;  %v6176_v61 = vld [vmem:[%s9928_s3 + $0x4] sm:$0xf]  ;;  %v5139_v6 = vld [vmem:[%s9928_s3 + $0xc] sm:$0xf0] }
  0xc2   : > { %v6908_v63 = vmax.f32 %v920_v57, %v922_v56  ;;  %v6179_v56 = vld [vmem:[%s9928_s3 + $0x1c] sm:$0xf]  ;;  %v5151_v57 = vld [vmem:[%s9928_s3 + $0x24] sm:$0xf0]  ;;  %v5142_v11 = vor.u32 %v6176_v61, %v5139_v6 }
  0xc3   : > { %v749_v4 = vpop.f32.mrf.mxu3  ;;  %1403 = vmatpush.bf16.msra.mxu2 %v5214_v9  ;;  %1348 = vmatpush.bf16.msra.mxu0 %v5174_v35  ;;  %v5154_v60 = vor.u32 %v6179_v56, %v5151_v57  ;;  %v716_v35 = vadd.f32 %v715_v55, %v6888_v51  ;;  %v6221_v55 = vld [vmem:[%s9928_s3 + $0x16c] sm:$0xf]  ;;  %v914_v56 = vmax.f32 %v742_v43, 0.0 }
  0xc4   : > { %v750_v20 = vadd.f32 %v749_v4, %v6942_v16  ;;  %v855_v59 = vpop.f32.mrf.mxu2 }
  0xc5   : > { %v6926_v8 = vpop.f32.mrf.mxu0 }
  0xc6   : > { %v938_v33 = vmax.f32 %v750_v20, 0.0 }
  0xc7   : > { %1404 = vmatpush.bf16.msra.mxu2 %v5202_v17  ;;  %1349 = vmatpush.bf16.msra.mxu0 %v5162_v46  ;;  %v7026_v17 = vpop.f32.mrf.mxu1 }
  0xcb   : > { %v6951_v21 = vpop.f32.mrf.mxu3  ;;  %1405 = vmatpush.bf16.msra.mxu2 %v5190_v26  ;;  %1350 = vmatpush.bf16.msra.mxu0 %v5150_v40 }
  0xcc   : > { %v857_v19 = vpop.f32.mrf.mxu2 }
  0xcd   : > { %v691_v25 = vpop.f32.mrf.mxu0  ;;  %v858_v44 = vadd.f32 %v857_v19, %v6962_v30 }
  0xce   : > { %v692_v28 = vadd.f32 %v691_v25, %v6942_v16 }
  0xcf   : > { %1406 = vmatpush.bf16.msra.mxu2 %v5178_v41  ;;  %1351 = vmatpush.bf16.msra.mxu0 %v5138_v5  ;;  %v856_v41 = vadd.f32 %v855_v59, %v6924_v7  ;;  %v918_v59 = vmax.f32 %v858_v44, 0.0  ;;  %v5322_v5 = vor.u32 %v6221_v55, %v5319_v62  ;;  %v5295_v44 = vld [vmem:[%s9928_s3 + $0x144] sm:$0xf0] }
  0xd0   : > { %v936_v34 = vmax.f32 %v692_v28, 0.0  ;;  %5134 = vmatmul.msk.bf16.gmra.mxu3 %vm659_vm0, %v6825_v29  ;;  %v6182_v29 = vld [vmem:[%s9928_s3 + $0x34] sm:$0xf]  ;;  %v720_v28 = vpop.f32.mrf.mxu1 }
  0xd1   : > { %v5166_v52 = vor.u32 %v6182_v29, %v5163_v47  ;;  %v921_v29 = vmax.f32 %v716_v35, 0.0  ;;  %1431 = vmatpush.bf16.msrb.mxu3 %v5322_v5  ;;  %v5293_v35 = vld [vmem:[%s9928_s3 + $0x138] sm:$0xf] }
  0xd2   : > { %v6978_v42 = vmax.f32 %v936_v34, %v938_v33  ;;  %v740_v34 = vadd.f32 %v6928_v10, %v6924_v7  ;;  %v5294_v43 = vor.u32 %v6216_v36, %v5293_v35  ;;  %v5205_v35 = vld [vmem:[%s9928_s3 + $0x80] sm:$0xf]  ;;  %v6193_v36 = vld [vmem:[%s9928_s3 + $0x88] sm:$0xf0] }
  0xd3   : > { %v754_v45 = vpop.f32.mrf.mxu3  ;;  %1407 = vmatpush.bf16.msra.mxu2 %v5166_v52  ;;  %v910_v52 = vmax.f32 %v856_v41, 0.0 }
  0xd4   : > { %v755_v2 = vadd.f32 %v754_v45, %v7006_v58  ;;  %v7037_v33 = vpop.f32.mrf.mxu2  ;;  %v904_v45 = vmax.f32 %v682_v3, 0.0  ;;  %v906_v46 = vmax.f32 %v740_v34, 0.0 }
  0xd5   : > { %v6992_v49 = vpop.f32.mrf.mxu0 }
  0xd6   : > { %v954_v13 = vmax.f32 %v755_v2, 0.0 }
  0xd7   : > { %1408 = vmatpush.bf16.msra.mxu2 %v5154_v60  ;;  %v5318_v60 = vor.u32 %v6222_v39, %v5317_v50  ;;  %v5281_v50 = vld [vmem:[%s9928_s3 + $0x120] sm:$0xf]  ;;  %v6213_v39 = vld [vmem:[%s9928_s3 + $0x128] sm:$0xf0] }
  0xd8   : > { %v7060_v40 = vpop.f32.mrf.mxu1 }
  0xd9   : > { %1373 = vmatpush.bf16.msra.mxu1 %v5318_v60 }
  0xdb   : > { %v7015_v4 = vpop.f32.mrf.mxu3  ;;  %1409 = vmatpush.bf16.msra.mxu2 %v5142_v11  ;;  %v5305_v11 = vld [vmem:[%s9928_s3 + $0x150] sm:$0xf] }
  0xdc   : > { %v862_v2 = vpop.f32.mrf.mxu2 }
  0xdd   : > { %v696_v9 = vpop.f32.mrf.mxu0 }
  0xde   : > { %v697_v12 = vadd.f32 %v696_v9, %v7006_v58 }
  0xe0   : > { %v952_v14 = vmax.f32 %v697_v12, 0.0  ;;  %v6219_v12 = vld [vmem:[%s9928_s3 + $0x158] sm:$0xf0] }
  0xe1   : > { %v5306_v19 = vor.u32 %v6219_v12, %v5305_v11 }
  0xe2   : > { %v7028_v18 = vmax.f32 %v952_v14, %v954_v13  ;;  %v968_v13 = vmax.f32 %v904_v45, %v906_v46  ;;  %v970_v14 = vmax.f32 %v912_v48, %v914_v56  ;;  %v721_v45 = vadd.f32 %v720_v28, %v6942_v16  ;;  %v6199_v48 = vld [vmem:[%s9928_s3 + $0xb8] sm:$0xf0] }
  0xe3   : > { %v768_v20 = vpop.f32.mrf.mxu3  ;;  %1374 = vmatpush.bf16.msra.mxu1 %v5306_v19  ;;  %v5282_v56 = vor.u32 %v6213_v39, %v5281_v50  ;;  %v6206_v39 = vld [vmem:[%s9928_s3 + $0xf4] sm:$0xf] }
  0xe4   : > { %v769_v22 = vadd.f32 %v768_v20, %v6924_v7  ;;  %v6218_v20 = vld [vmem:[%s9928_s3 + $0x154] sm:$0xf] }
  0xe5   : > { %v7031_v24 = vpop.f32.mrf.mxu0 }
  0xe6   : > { %v907_v25 = vmax.f32 %v769_v22, 0.0  ;;  %v5307_v22 = vld [vmem:[%s9928_s3 + $0x15c] sm:$0xf0] }
  0xe7   : > { %1375 = vmatpush.bf16.msra.mxu1 %v5294_v43 }
  0xe8   : > { %v7033_v26 = vmax.f32 %v905_v23, %v907_v25  ;;  %v5310_v23 = vor.u32 %v6218_v20, %v5307_v22 }
  0xea   : > { %1432 = vmatpush.bf16.msrb.mxu3 %v5310_v23 }
  0xeb   : > { %v7035_v31 = vpop.f32.mrf.mxu3  ;;  %1376 = vmatpush.bf16.msra.mxu1 %v5282_v56 }
  0xed   : > { %v797_v32 = vpop.f32.mrf.mxu0 }
  0xee   : > { %v798_v38 = vadd.f32 %v797_v32, %v6924_v7 }
  0xf0   : > { %v908_v47 = vmax.f32 %v798_v38, 0.0  ;;  %v6215_v38 = vld [vmem:[%s9928_s3 + $0x13c] sm:$0xf] }
  0xf1   : > { %v5298_v46 = vor.u32 %v6215_v38, %v5295_v44 }
  0xf2   : > { %v984_v61 = vmax.f32 %v908_v47, %v910_v52  ;;  %v7103_v47 = vpop.permute.xlu1 %456  ;;  %v7105_v52 = vpop.f32.mrf.mxu1 }
  0xf3   : > { %v773_v10 = vpop.f32.mrf.mxu3  ;;  %1433 = vmatpush.bf16.msrb.mxu3 %v5298_v46  ;;  %v863_v55 = vadd.f32 %v862_v2, %v7103_v47  ;;  %v747_v60 = vadd.f32 %v6891_v53, %v7103_v47  ;;  %v937_v2 = vmax.f32 %v721_v45, 0.0  ;;  %v5269_v53 = vld [vmem:[%s9928_s3 + $0x108] sm:$0xf]  ;;  %v5206_v45 = vor.u32 %v6193_v36, %v5205_v35  ;;  %v5235_v36 = vld [vmem:[%s9928_s3 + $0xcc] sm:$0xf0] }
  0xf4   : > { %v774_v54 = vadd.f32 %v773_v10, %v6888_v51  ;;  %v1000_v25 = vmax.f32 %v968_v13, %v984_v61 }
  0xf5   : > { %v799_v37 = vpop.f32.mrf.mxu0  ;;  %v934_v22 = vmax.f32 %v863_v55, 0.0  ;;  %v930_v38 = vmax.f32 %v747_v60, 0.0 }
  0xf6   : > { %v800_v57 = vadd.f32 %v799_v37, %v6962_v30  ;;  %v923_v1 = vmax.f32 %v774_v54, 0.0  ;;  %v861_v54 = vadd.f32 %v7037_v33, %v6888_v51  ;;  %v7112_v37 = vpop.f32.mrf.mxu2  ;;  %v689_v33 = vadd.f32 %v6926_v8, %v7103_v47  ;;  %v5217_v8 = vld [vmem:[%s9928_s3 + $0x98] sm:$0xf] }
  0xf8   : > { %v916_v6 = vmax.f32 %v800_v57, 0.0  ;;  %v7066_v9 = vmax.f32 %v921_v29, %v923_v1  ;;  %v5229_v29 = vld [vmem:[%s9928_s3 + $0xb0] sm:$0xf]  ;;  %v6212_v57 = vld [vmem:[%s9928_s3 + $0x124] sm:$0xf]  ;;  %v926_v61 = vmax.f32 %v861_v54, 0.0 }
  0xf9   : > { %v5230_v28 = vor.u32 %v6199_v48, %v5229_v29  ;;  %v6196_v1 = vld [vmem:[%s9928_s3 + $0xa0] sm:$0xf0]  ;;  %v928_v19 = vmax.f32 %v689_v33, 0.0  ;;  %v5257_v29 = vld [vmem:[%s9928_s3 + $0xf0] sm:$0xf] }
  0xfa   : > { %v986_v15 = vmax.f32 %v916_v6, %v918_v59  ;;  %v5283_v59 = vld [vmem:[%s9928_s3 + $0x12c] sm:$0xf0]  ;;  %v5218_v11 = vor.u32 %v6196_v1, %v5217_v8  ;;  %v6207_v48 = vld [vmem:[%s9928_s3 + $0xf8] sm:$0xf0]  ;;  %v7165_v54 = vpop.f32.mrf.mxu1  ;;  %v5259_v33 = vld [vmem:[%s9928_s3 + $0xfc] sm:$0xf0] }
  0xfb   : > { %v7080_v3 = vpop.f32.mrf.mxu3  ;;  %1460 = vmatpush.bf16.msrb.mxu0 %v5230_v28  ;;  %v5286_v62 = vor.u32 %v6212_v57, %v5283_v59  ;;  %v5258_v50 = vor.u32 %v6207_v48, %v5257_v29  ;;  %v5262_v56 = vor.u32 %v6206_v39, %v5259_v33  ;;  %v5193_v57 = vld [vmem:[%s9928_s3 + $0x68] sm:$0xf]  ;;  %v6190_v59 = vld [vmem:[%s9928_s3 + $0x70] sm:$0xf0] }
  0xfc   : > { %v1002_v32 = vmax.f32 %v970_v14, %v986_v15  ;;  %v6210_v14 = vld [vmem:[%s9928_s3 + $0x110] sm:$0xf0]  ;;  %v6209_v15 = vld [vmem:[%s9928_s3 + $0x10c] sm:$0xf]  ;;  %v5194_v1 = vor.u32 %v6190_v59, %v5193_v57 }
  0xfd   : > { %v802_v34 = vpop.f32.mrf.mxu0  ;;  %1434 = vmatpush.bf16.msrb.mxu3 %v5286_v62  ;;  %v5270_v23 = vor.u32 %v6210_v14, %v5269_v53  ;;  %v5181_v53 = vld [vmem:[%s9928_s3 + $0x50] sm:$0xf]  ;;  %v6187_v14 = vld [vmem:[%s9928_s3 + $0x58] sm:$0xf0] }
  0xfe   : > { %v7091_v41 = vpack.c.bf16 %v1002_v32, %v1000_v25  ;;  %v803_v10 = vadd.f32 %v802_v34, %v6888_v51  ;;  %v5271_v25 = vld [vmem:[%s9928_s3 + $0x114] sm:$0xf0]  ;;  %v867_v55 = vpop.f32.mrf.mxu2 }
  0xff   : > { %1461 = vmatpush.bf16.msrb.mxu0 %v5218_v11  ;;  %v5274_v34 = vor.u32 %v6209_v15, %v5271_v25  ;;  %1377 = vmatpush.bf16.msra.mxu1 %v5270_v23  ;;  %v726_v23 = vadd.f32 %v7105_v52, %v7006_v58  ;;  %v5233_v25 = vld [vmem:[%s9928_s3 + $0xc0] sm:$0xf] }
 0x100   : > { %1352 = vmatmul.bf16.vlgmr.msra.gmra.mxu0 %v7091_v41  ;;  %1410 = vmatmul.bf16.vlgmr.msra.gmra.mxu2 %v7091_v41  ;;  %v924_v5 = vmax.f32 %v803_v10, 0.0  ;;  %v974_v10 = vmax.f32 %v928_v19, %v930_v38  ;;  %v866_v19 = vadd.f32 %v7112_v37, %v6942_v16  ;;  %v6201_v37 = vld [vmem:[%s9928_s3 + $0xc8] sm:$0xf0] }
 0x101   : > { %1435 = vmatpush.bf16.msrb.mxu3 %v5274_v34  ;;  %v5234_v52 = vor.u32 %v6201_v37, %v5233_v25 }
 0x102   : > { %v988_v43 = vmax.f32 %v924_v5, %v926_v61  ;;  %v5245_v5 = vld [vmem:[%s9928_s3 + $0xd8] sm:$0xf]  ;;  %v6204_v61 = vld [vmem:[%s9928_s3 + $0xe0] sm:$0xf0]  ;;  %v942_v48 = vmax.f32 %v866_v19, 0.0 }
 0x103   : > { %v778_v6 = vpop.f32.mrf.mxu3  ;;  %1462 = vmatpush.bf16.msrb.mxu0 %v5206_v45  ;;  %1378 = vmatpush.bf16.msra.mxu1 %v5258_v50  ;;  %v5246_v11 = vor.u32 %v6204_v61, %v5245_v5  ;;  %v826_v45 = vpop.f32.mrf.mxu1  ;;  %v953_v50 = vmax.f32 %v726_v23, 0.0 }
 0x104   : > { %v779_v12 = vadd.f32 %v778_v6, %v6942_v16  ;;  %v1004_v60 = vmax.f32 %v6908_v63, %v988_v43  ;;  %v6203_v6 = vld [vmem:[%s9928_s3 + $0xdc] sm:$0xf]  ;;  %v5169_v43 = vld [vmem:[%s9928_s3 + $0x38] sm:$0xf] }
 0x105   : > { %v804_v13 = vpop.f32.mrf.mxu0  ;;  %1436 = vmatpush.bf16.msrb.mxu3 %v5262_v56 }
 0x106   : > { %v805_v20 = vadd.f32 %v804_v13, %v7103_v47  ;;  %v939_v32 = vmax.f32 %v779_v12, 0.0  ;;  %v5247_v12 = vld [vmem:[%s9928_s3 + $0xe4] sm:$0xf0] }
 0x107   : > { %1463 = vmatpush.bf16.msrb.mxu0 %v5194_v1  ;;  %v5250_v13 = vor.u32 %v6203_v6, %v5247_v12  ;;  %1379 = vmatpush.bf16.msra.mxu1 %v5246_v11 }
 0x108   : > { %v932_v44 = vmax.f32 %v805_v20, 0.0  ;;  %v7157_v46 = vmax.f32 %v937_v2, %v939_v32  ;;  %v5182_v20 = vor.u32 %v6187_v14, %v5181_v53  ;;  %v6200_v32 = vld [vmem:[%s9928_s3 + $0xc4] sm:$0xf]  ;;  %v6178_v53 = vld [vmem:[%s9928_s3 + $0x10] sm:$0xf0] }
 0x109   : > { %1437 = vmatpush.bf16.msrb.mxu3 %v5250_v13  ;;  %v5238_v38 = vor.u32 %v6200_v32, %v5235_v36  ;;  %v5145_v13 = vld [vmem:[%s9928_s3 + $0x8] sm:$0xf] }
 0x10a   : > { %v990_v28 = vmax.f32 %v932_v44, %v934_v22  ;;  %v7207_v22 = vpop.permute.xlu2 %466  ;;  %v6184_v44 = vld [vmem:[%s9928_s3 + $0x40] sm:$0xf0] }
 0x10b   : > { %v7180_v62 = vpop.f32.mrf.mxu3  ;;  %v694_v34 = vadd.f32 %v6992_v49, %v7207_v22  ;;  %v868_v35 = vadd.f32 %v867_v55, %v7207_v22  ;;  %1464 = vmatpush.bf16.msrb.mxu0 %v5182_v20  ;;  %v752_v49 = vadd.f32 %v6951_v21, %v7207_v22  ;;  %v870_v55 = vpop.f32.mrf.mxu2  ;;  %1380 = vmatpush.bf16.msra.mxu1 %v5234_v52  ;;  %v5157_v21 = vld [vmem:[%s9928_s3 + $0x20] sm:$0xf] }
 0x10c   : > { %v1006_v8 = vmax.f32 %v974_v10, %v990_v28  ;;  %v5170_v28 = vor.u32 %v6184_v44, %v5169_v43  ;;  %v5146_v20 = vor.u32 %v6178_v53, %v5145_v13  ;;  %v828_v25 = vpop.f32.mrf.mxu1  ;;  %v7259_v52 = vpop.permute.xlu1 %476 }
 0x10d   : > { %v807_v2 = vpop.f32.mrf.mxu0  ;;  %1438 = vmatpush.bf16.msrb.mxu3 %v5238_v38  ;;  %v944_v56 = vmax.f32 %v694_v34, 0.0  ;;  %v950_v59 = vmax.f32 %v868_v35, 0.0  ;;  %v946_v1 = vmax.f32 %v752_v49, 0.0  ;;  %v871_v35 = vadd.f32 %v870_v55, %v7006_v58 }
 0x10e   : > { %v7191_v63 = vpack.c.bf16 %v1006_v8, %v1004_v60  ;;  %v808_v15 = vadd.f32 %v807_v2, %v6942_v16  ;;  %v6181_v8 = vld [vmem:[%s9928_s3 + $0x28] sm:$0xf0]  ;;  %v757_v38 = vadd.f32 %v7015_v4, %v7259_v52 }
 0x10f   : > { %1465 = vmatpush.bf16.msrb.mxu0 %v5170_v28  ;;  %v5158_v61 = vor.u32 %v6181_v8, %v5157_v21  ;;  %v978_v11 = vmax.f32 %v944_v56, %v946_v1  ;;  %v958_v44 = vmax.f32 %v871_v35, 0.0  ;;  %v829_v8 = vadd.f32 %v828_v25, %v6962_v30 }
 0x110   : > { %1357 = vmatmul.bf16.gmra.mxu0 %v7191_v63  ;;  %1415 = vmatmul.bf16.gmra.mxu2 %v7191_v63  ;;  %v940_v29 = vmax.f32 %v808_v15, 0.0 }
 0x112   : > { %v992_v2 = vmax.f32 %v940_v29, %v942_v48 }
 0x113   : > { %v783_v10 = vpop.f32.mrf.mxu3  ;;  %1466 = vmatpush.bf16.msrb.mxu0 %v5158_v61  ;;  %v872_v32 = vpop.f32.mrf.mxu2 }
 0x114   : > { %v784_v39 = vadd.f32 %v783_v10, %v7006_v58  ;;  %v1008_v14 = vmax.f32 %v6978_v42, %v992_v2  ;;  %v699_v42 = vadd.f32 %v7031_v24, %v7259_v52  ;;  %v873_v36 = vadd.f32 %v872_v32, %v7259_v52  ;;  %v831_v55 = vpop.f32.mrf.mxu1  ;;  %v6223_v32 = vld [vmem:[%s9928_s3 + $0x178] sm:$0xf0] }
 0x115   : > { %v809_v33 = vpop.f32.mrf.mxu0  ;;  %v832_v35 = vadd.f32 %v831_v55, %v6888_v51 }
 0x116   : > { %v810_v57 = vadd.f32 %v809_v33, %v7207_v22  ;;  %v955_v60 = vmax.f32 %v784_v39, 0.0  ;;  %v960_v48 = vmax.f32 %v699_v42, 0.0  ;;  %v966_v28 = vmax.f32 %v873_v36, 0.0  ;;  %v5313_v36 = vld [vmem:[%s9928_s3 + $0x158] sm:$0xf] }
 0x117   : > { %1467 = vmatpush.bf16.msrb.mxu0 %v5146_v20  ;;  %v962_v33 = vmax.f32 %v757_v38, 0.0  ;;  %v6220_v38 = vld [vmem:[%s9928_s3 + $0x160] sm:$0xf0] }
 0x118   : > { %v948_v5 = vmax.f32 %v810_v57, 0.0  ;;  %v7242_v6 = vmax.f32 %v953_v50, %v955_v60  ;;  %v827_v50 = vadd.f32 %v826_v45, %v6924_v7  ;;  %v771_v57 = vadd.f32 %v7035_v31, %v6962_v30 }
 0x119   : > { %v982_v4 = vmax.f32 %v960_v48, %v962_v33  ;;  %v713_v60 = vadd.f32 %v6959_v27, %v6962_v30  ;;  %v917_v31 = vmax.f32 %v829_v8, 0.0 }
 0x11a   : > { %v994_v12 = vmax.f32 %v948_v5, %v950_v59  ;;  %v909_v21 = vmax.f32 %v827_v50, 0.0  ;;  %v915_v5 = vmax.f32 %v771_v57, 0.0  ;;  %v5301_v50 = vld [vmem:[%s9928_s3 + $0x140] sm:$0xf] }
 0x11b   : > { %v7251_v15 = vpop.f32.mrf.mxu3 }
 0x11c   : > { %v1010_v19 = vmax.f32 %v978_v11, %v994_v12  ;;  %v913_v12 = vmax.f32 %v713_v60, 0.0 }
 0x11d   : > { %v812_v23 = vpop.f32.mrf.mxu0 }
 0x11e   : > { %v7253_v37 = vpack.c.bf16 %v1010_v19, %v1008_v14  ;;  %v813_v34 = vadd.f32 %v812_v23, %v7006_v58  ;;  %v971_v27 = vmax.f32 %v913_v12, %v915_v5  ;;  %v833_v19 = vpop.f32.mrf.mxu1 }
 0x120   : > { %1362 = vmatmul.bf16.gmra.mxu0 %v7253_v37  ;;  %1420 = vmatmul.bf16.gmra.mxu2 %v7253_v37  ;;  %v956_v43 = vmax.f32 %v813_v34, 0.0 }
 0x122   : > { %v996_v24 = vmax.f32 %v956_v43, %v958_v44  ;;  %v5314_v43 = vor.u32 %v6220_v38, %v5313_v36  ;;  %v925_v44 = vmax.f32 %v832_v35, 0.0  ;;  %v6202_v38 = vld [vmem:[%s9928_s3 + $0xd0] sm:$0xf0] }
 0x123   : > { %v884_v49 = vpop.f32.mrf.mxu3 }
 0x124   : > { %v885_v39 = vadd.f32 %v884_v49, %v6924_v7  ;;  %v1012_v45 = vmax.f32 %v7028_v18, %v996_v24  ;;  %v834_v49 = vadd.f32 %v833_v19, %v7103_v47 }
 0x125   : > { %v814_v29 = vpop.f32.mrf.mxu0 }
 0x126   : > { %v815_v10 = vadd.f32 %v814_v29, %v7259_v52  ;;  %v911_v1 = vmax.f32 %v885_v39, 0.0  ;;  %v836_v48 = vpop.f32.mrf.mxu1  ;;  %v6217_v39 = vld [vmem:[%s9928_s3 + $0x148] sm:$0xf0]  ;;  %v933_v55 = vmax.f32 %v834_v49, 0.0 }
 0x127   : > { %v5302_v33 = vor.u32 %v6217_v39, %v5301_v50  ;;  %v728_v50 = vadd.f32 %v7165_v54, %v7259_v52 }
 0x128   : > { %v964_v56 = vmax.f32 %v815_v10, 0.0  ;;  %v985_v13 = vmax.f32 %v909_v21, %v911_v1 }
 0x12a   : > { %v998_v59 = vmax.f32 %v964_v56, %v966_v28  ;;  %v1001_v18 = vmax.f32 %v7033_v26, %v985_v13  ;;  %v776_v26 = vadd.f32 %v7080_v3, %v7103_v47 }
 0x12b   : > { %v886_v2 = vpop.f32.mrf.mxu3 }
 0x12c   : > { %v1014_v7 = vmax.f32 %v982_v4, %v998_v59  ;;  %v887_v61 = vadd.f32 %v886_v2, %v6962_v30  ;;  %v5325_v30 = vld [vmem:[%s9928_s3 + $0x170] sm:$0xf]  ;;  %v931_v3 = vmax.f32 %v776_v26, 0.0  ;;  %v6214_v59 = vld [vmem:[%s9928_s3 + $0x130] sm:$0xf0] }
 0x12d   : > { %v5326_v34 = vor.u32 %v6223_v32, %v5325_v30  ;;  %v6211_v2 = vld [vmem:[%s9928_s3 + $0x118] sm:$0xf0] }
 0x12e   : > { %v7276_v11 = vpack.c.bf16 %v1014_v7, %v1012_v45  ;;  %v919_v53 = vmax.f32 %v887_v61, 0.0  ;;  %v838_v7 = vpop.f32.mrf.mxu1  ;;  %v837_v61 = vadd.f32 %v836_v48, %v6942_v16 }
 0x12f   : > { %1489 = vmatpush.bf16.msrb.mxu1 %v5326_v34 }
 0x130   : > { %1367 = vmatmul.bf16.gmra.mxu0 %v7276_v11  ;;  %1425 = vmatmul.bf16.gmra.mxu2 %v7276_v11  ;;  %v987_v14 = vmax.f32 %v917_v31, %v919_v53  ;;  %v6208_v31 = vld [vmem:[%s9928_s3 + $0x100] sm:$0xf0]  ;;  %v781_v53 = vadd.f32 %v7180_v62, %v7207_v22  ;;  %v941_v19 = vmax.f32 %v837_v61, 0.0 }
 0x132   : > { %v1003_v20 = vmax.f32 %v971_v27, %v987_v14  ;;  %v6205_v27 = vld [vmem:[%s9928_s3 + $0xe8] sm:$0xf0]  ;;  %v723_v14 = vadd.f32 %v7060_v40, %v7207_v22  ;;  %v947_v32 = vmax.f32 %v781_v53, 0.0  ;;  %v5241_v40 = vld [vmem:[%s9928_s3 + $0xc8] sm:$0xf] }
 0x133   : > { %v889_v23 = vpop.f32.mrf.mxu3  ;;  %1490 = vmatpush.bf16.msrb.mxu1 %v5314_v43 }
 0x134   : > { %v7281_v25 = vpack.c.bf16 %v1003_v20, %v1001_v18  ;;  %v890_v42 = vadd.f32 %v889_v23, %v6888_v51  ;;  %v718_v51 = vadd.f32 %v7026_v17, %v7103_v47  ;;  %v839_v18 = vadd.f32 %v838_v7, %v7207_v22 }
 0x135   : > { %v945_v34 = vmax.f32 %v723_v14, 0.0 }
 0x136   : > { %1381 = vmatmul.bf16.vlgmr.msra.gmra.mxu1 %v7281_v25  ;;  %1439 = vmatmul.bf16.vlgmr.msrb.gmra.mxu3 %v7281_v25  ;;  %v927_v29 = vmax.f32 %v890_v42, 0.0  ;;  %v929_v17 = vmax.f32 %v718_v51, 0.0  ;;  %v949_v35 = vmax.f32 %v839_v18, 0.0  ;;  %v841_v36 = vpop.f32.mrf.mxu1 }
 0x137   : > { %1491 = vmatpush.bf16.msrb.mxu1 %v5302_v33  ;;  %v979_v43 = vmax.f32 %v945_v34, %v947_v32 }
 0x138   : > { %v989_v24 = vmax.f32 %v925_v44, %v927_v29  ;;  %v975_v57 = vmax.f32 %v929_v17, %v931_v3  ;;  %v5242_v44 = vor.u32 %v6202_v38, %v5241_v40  ;;  %v786_v3 = vadd.f32 %v7251_v15, %v7259_v52 }
 0x13a   : > { %v1005_v21 = vmax.f32 %v7066_v9, %v989_v24  ;;  %v5265_v9 = vld [vmem:[%s9928_s3 + $0xf8] sm:$0xf]  ;;  %v963_v17 = vmax.f32 %v786_v3, 0.0 }
 0x13b   : > { %v891_v10 = vpop.f32.mrf.mxu3  ;;  %v5266_v13 = vor.u32 %v6208_v31, %v5265_v9 }
 0x13c   : > { %v892_v28 = vadd.f32 %v891_v10, %v7103_v47  ;;  %v5289_v47 = vld [vmem:[%s9928_s3 + $0x128] sm:$0xf] }
 0x13d   : > { %v5290_v60 = vor.u32 %v6214_v59, %v5289_v47 }
 0x13e   : > { %v935_v56 = vmax.f32 %v892_v28, 0.0  ;;  %v843_v10 = vpop.f32.mrf.mxu1  ;;  %v842_v28 = vadd.f32 %v841_v36, %v7006_v58 }
 0x13f   : > { %1492 = vmatpush.bf16.msrb.mxu1 %v5290_v60  ;;  %v844_v39 = vadd.f32 %v843_v10, %v7259_v52 }
 0x140   : > { %1468 = vmatmul.bf16.vlgmr.msrb.gmra.mxu0 %v7091_v41  ;;  %v991_v4 = vmax.f32 %v933_v55, %v935_v56  ;;  %v5277_v41 = vld [vmem:[%s9928_s3 + $0x110] sm:$0xf]  ;;  %v957_v55 = vmax.f32 %v842_v28, 0.0  ;;  %v961_v56 = vmax.f32 %v728_v50, 0.0 }
 0x141   : > { %v5278_v5 = vor.u32 %v6211_v2, %v5277_v41 }
 0x142   : > { %v1007_v8 = vmax.f32 %v975_v57, %v991_v4  ;;  %v965_v57 = vmax.f32 %v844_v39, 0.0  ;;  %v983_v15 = vmax.f32 %v961_v56, %v963_v17 }
 0x143   : > { %v894_v1 = vpop.f32.mrf.mxu3  ;;  %1493 = vmatpush.bf16.msrb.mxu1 %v5278_v5 }
 0x144   : > { %v7319_v45 = vpack.c.bf16 %v1007_v8, %v1005_v21  ;;  %v895_v12 = vadd.f32 %v894_v1, %v6942_v16  ;;  %v5253_v16 = vld [vmem:[%s9928_s3 + $0xe0] sm:$0xf] }
 0x145   : > { %v5254_v30 = vor.u32 %v6205_v27, %v5253_v16 }
 0x146   : > { %1386 = vmatmul.bf16.gmra.mxu1 %v7319_v45  ;;  %1444 = vmatmul.bf16.gmra.mxu3 %v7319_v45  ;;  %v943_v20 = vmax.f32 %v895_v12, 0.0 }
 0x147   : > { %1494 = vmatpush.bf16.msrb.mxu1 %v5266_v13 }
 0x148   : > { %v993_v42 = vmax.f32 %v941_v19, %v943_v20 }
 0x14b   : > { %v896_v23 = vpop.f32.mrf.mxu3  ;;  %1495 = vmatpush.bf16.msrb.mxu1 %v5254_v30 }
 0x14c   : > { %v897_v62 = vadd.f32 %v896_v23, %v7207_v22  ;;  %v1009_v22 = vmax.f32 %v7157_v46, %v993_v42 }
 0x14e   : > { %v951_v26 = vmax.f32 %v897_v62, 0.0 }
 0x14f   : > { %1496 = vmatpush.bf16.msrb.mxu1 %v5242_v44 }
 0x150   : > { %1473 = vmatmul.bf16.gmra.mxu0 %v7191_v63  ;;  %v995_v51 = vmax.f32 %v949_v35, %v951_v26 }
 0x152   : > { %v1011_v49 = vmax.f32 %v979_v43, %v995_v51 }
 0x153   : > { %v899_v29 = vpop.f32.mrf.mxu3 }
 0x154   : > { %v1021_v48 = vpack.c.bf16 %v1011_v49, %v1009_v22  ;;  %v900_v63 = vadd.f32 %v899_v29, %v7006_v58 }
 0x156   : > { %1391 = vmatmul.bf16.gmra.mxu1 %v1021_v48  ;;  %1449 = vmatmul.bf16.gmra.mxu3 %v1021_v48  ;;  %v959_v46 = vmax.f32 %v900_v63, 0.0 }
 0x158   : > { %v997_v4 = vmax.f32 %v957_v55, %v959_v46 }
 0x15a   : > { %v1013_v58 = vmax.f32 %v7242_v6, %v997_v4 }
 0x15b   : > { %v901_v33 = vpop.f32.mrf.mxu3 }
 0x15c   : > { %v902_v24 = vadd.f32 %v901_v33, %v7259_v52 }
 0x15e   : > { %v967_v47 = vmax.f32 %v902_v24, 0.0 }
 0x160   : > { %1478 = vmatmul.bf16.gmra.mxu0 %v7253_v37  ;;  %v999_v59 = vmax.f32 %v965_v57, %v967_v47 }
 0x162   : > { %v1015_v60 = vmax.f32 %v983_v15, %v999_v59 }
 0x164   : > { %v1023_v54 = vpack.c.bf16 %v1015_v60, %v1013_v58 }
 0x166   : > { %1396 = vmatmul.bf16.gmra.mxu1 %v1023_v54  ;;  %1454 = vmatmul.bf16.gmra.mxu3 %v1023_v54 }
 0x170   : > { %1483 = vmatmul.bf16.gmra.mxu0 %v7276_v11 }
 0x176   : > { %1497 = vmatmul.bf16.vlgmr.msrb.gmra.mxu1 %v7281_v25 }
 0x17d   : > { %v1353_v52 = vpop.f32.mrf.mxu0 }
 0x183   : > { %v1411_v37 = vpop.f32.mrf.mxu2 }
 0x185   : > { %v1355_v21 = vpop.f32.mrf.mxu0 }
 0x186   : > { %1502 = vmatmul.bf16.gmra.mxu1 %v7319_v45 }
 0x18b   : > { %v1413_v2 = vpop.f32.mrf.mxu2 }
 0x18d   : > { %v1358_v8 = vpop.f32.mrf.mxu0 }
 0x193   : > { %v1416_v12 = vpop.f32.mrf.mxu2 }
 0x195   : > { %v1360_v1 = vpop.f32.mrf.mxu0 }
 0x196   : > { %1507 = vmatmul.bf16.gmra.mxu1 %v1021_v48 }
 0x19b   : > { %v1418_v18 = vpop.f32.mrf.mxu2 }
 0x19d   : > { %v1363_v5 = vpop.f32.mrf.mxu0 }
 0x1a3   : > { %v1421_v36 = vpop.f32.mrf.mxu2 }
 0x1a5   : > { %v1365_v14 = vpop.f32.mrf.mxu0 }
 0x1a6   : > { %1512 = vmatmul.bf16.gmra.mxu1 %v1023_v54 }
 0x1ab   : > { %v1423_v48 = vpop.f32.mrf.mxu2 }
 0x1ad   : > { %v1368_v62 = vpop.f32.mrf.mxu0 }
 0x1b3   : > { %v1382_v41 = vpop.f32.mrf.mxu1  ;;  %v1426_v4 = vpop.f32.mrf.mxu2 }
 0x1b4   : > { %v1383_v9 = vadd.f32 %v1382_v41, %v1353_v52 }
 0x1b5   : > { %v1370_v49 = vpop.f32.mrf.mxu0 }
 0x1b9   : > { %v1440_v6 = vpop.f32.mrf.mxu3 }
 0x1ba   : > { %v1441_v61 = vadd.f32 %v1440_v6, %v1411_v37 }
 0x1bb   : > { %v1384_v7 = vpop.f32.mrf.mxu1 }
 0x1bc   : > { %v1518_v31 = vpack.c.bf16 %v1441_v61, %v1383_v9  ;;  %v1385_v25 = vadd.f32 %v1384_v7, %v1355_v21 }
 0x1bd   : > { %v7380_v55 = vpop.f32.mrf.mxu0 }
 0x1be   : > { %v1615_v16 = vunpack.c.l.b16 %v1518_v31  ;;  %v1786_v54 = vunpack.c.h.b16 %v1518_v31 }
 0x1c1   : > { %v1442_v11 = vpop.f32.mrf.mxu3 }
 0x1c2   : > { %v1443_v13 = vadd.f32 %v1442_v11, %v1413_v2 }
 0x1c3   : > { %v1387_v45 = vpop.f32.mrf.mxu1 }
 0x1c4   : > { %v1520_v53 = vpack.c.bf16 %v1443_v13, %v1385_v25  ;;  %v1388_v32 = vadd.f32 %v1387_v45, %v1358_v8 }
 0x1c5   : > { %v1471_v21 = vpop.f32.mrf.mxu0 }
 0x1c6   : > { %v1616_v27 = vunpack.c.l.b16 %v1520_v53  ;;  %v1787_v60 = vunpack.c.h.b16 %v1520_v53 }
 0x1c8   : > { %v7370_v19 = vpack.c.b16 %v1616_v27, %v1615_v16  ;;  %v7390_v8 = vpack.c.b16 %v1787_v60, %v1786_v54 }
 0x1c9   : > { %v1445_v20 = vpop.f32.mrf.mxu3 }
 0x1ca   : > { %1627 = vrot.lane.b32.xlu2 %v7370_v19, %s6581_s12  ;;  %v1446_v30 = vadd.f32 %v1445_v20, %v1416_v12 }
 0x1cb   : > { %v1389_v23 = vpop.f32.mrf.mxu1 }
 0x1cc   : > { %v1522_v35 = vpack.c.bf16 %v1446_v30, %v1388_v32  ;;  %v1390_v42 = vadd.f32 %v1389_v23, %v1360_v1  ;;  %v1428_v1 = vpop.f32.mrf.mxu2 }
 0x1cd   : > { %v1474_v31 = vpop.f32.mrf.mxu0 }
 0x1ce   : > { %v1617_v43 = vunpack.c.l.b16 %v1522_v35  ;;  %v1788_v24 = vunpack.c.h.b16 %v1522_v35 }
 0x1d1   : > { %v1447_v34 = vpop.f32.mrf.mxu3 }
 0x1d2   : > { %v1448_v26 = vadd.f32 %v1447_v34, %v1418_v18 }
 0x1d3   : > { %v1392_v40 = vpop.f32.mrf.mxu1 }
 0x1d4   : > { %v1524_v38 = vpack.c.bf16 %v1448_v26, %v1390_v42  ;;  %v1393_v10 = vadd.f32 %v1392_v40, %v1363_v5 }
 0x1d5   : > { %v1476_v16 = vpop.f32.mrf.mxu0 }
 0x1d6   : > { %v1618_v51 = vunpack.c.l.b16 %v1524_v38  ;;  %v1789_v33 = vunpack.c.h.b16 %v1524_v38 }
 0x1d8   : > { %v7374_v44 = vpack.c.b16 %v1618_v51, %v1617_v43  ;;  %v7382_v47 = vpack.c.b16 %v1789_v33, %v1788_v24 }
 0x1d9   : > { %v1450_v22 = vpop.f32.mrf.mxu3 }
 0x1da   : > { %1629 = vrot.lane.b32.xlu0 %v7374_v44, %s6581_s12  ;;  %v1451_v63 = vadd.f32 %v1450_v22, %v1421_v36 }
 0x1db   : > { %v1394_v29 = vpop.f32.mrf.mxu1 }
 0x1dc   : > { %v1526_v28 = vpack.c.bf16 %v1451_v63, %v1393_v10  ;;  %v1395_v50 = vadd.f32 %v1394_v29, %v1365_v14 }
 0x1dd   : > { %v1479_v20 = vpop.f32.mrf.mxu0 }
 0x1de   : > { %v1619_v56 = vunpack.c.l.b16 %v1526_v28  ;;  %v1790_v45 = vunpack.c.h.b16 %v1526_v28 }
 0x1e1   : > { %v1452_v3 = vpop.f32.mrf.mxu3 }
 0x1e2   : > { %v1453_v39 = vadd.f32 %v1452_v3, %v1423_v48  ;;  %1798 = vrot.lane.b32.xlu0 %v7370_v19, %s6582_s13 }
 0x1e3   : > { %v1397_v46 = vpop.f32.mrf.mxu1 }
 0x1e4   : > { %v1528_v17 = vpack.c.bf16 %v1453_v39, %v1395_v50  ;;  %v1398_v37 = vadd.f32 %v1397_v46, %v1368_v62 }
 0x1e5   : > { %v1481_v35 = vpop.f32.mrf.mxu0 }
 0x1e6   : > { %v1620_v57 = vunpack.c.l.b16 %v1528_v17  ;;  %v1791_v13 = vunpack.c.h.b16 %v1528_v17 }
 0x1e8   : > { %v7384_v15 = vpack.c.b16 %v1620_v57, %v1619_v56  ;;  %v7404_v53 = vpack.c.b16 %v1791_v13, %v1790_v45  ;;  %v2957_v13 = vld [vmem:[%s9930_s5 + $0x60] sm:$0xff]  ;;  %v2947_v45 = vld [vmem:[%s9930_s5 + $0x10] sm:$0xff] }
 0x1e9   : > { %v1455_v59 = vpop.f32.mrf.mxu3 }
 0x1ea   : > { %1631 = vrot.lane.b32.xlu1 %v7384_v15, %s6581_s12  ;;  %1804 = vrot.lane.b32.xlu0 %v7382_v47, %s6582_s13  ;;  %v1456_v52 = vadd.f32 %v1455_v59, %v1426_v4 }
 0x1eb   : > { %v1399_v58 = vpop.f32.mrf.mxu1 }
 0x1ec   : > { %v1530_v2 = vpack.c.bf16 %v1456_v52, %v1398_v37  ;;  %v1400_v6 = vadd.f32 %v1399_v58, %v1370_v49  ;;  %v2945_v37 = vld [vmem:[%s9930_s5] sm:$0xff] }
 0x1ed   : > { %v1484_v29 = vpop.f32.mrf.mxu0 }
 0x1ee   : > { %v1621_v12 = vunpack.c.l.b16 %v1530_v2  ;;  %v1792_v23 = vunpack.c.h.b16 %v1530_v2 }
 0x1f1   : > { %v1457_v41 = vpop.f32.mrf.mxu3 }
 0x1f2   : > { %v1458_v7 = vadd.f32 %v1457_v41, %v1428_v1  ;;  %1800 = vrot.lane.b32.xlu1 %v7390_v8, %s6582_s13  ;;  %1972 = vrot.lane.b32.xlu0 %v7382_v47, %s6583_s15  ;;  %v2948_v1 = vld [vmem:[%s9930_s5 + $0x18] sm:$0xff] }
 0x1f3   : > { %v1498_v5 = vpop.f32.mrf.mxu1 }
 0x1f4   : > { %v1532_v61 = vpack.c.bf16 %v1458_v7, %v1400_v6  ;;  %v1499_v43 = vadd.f32 %v1498_v5, %v7380_v55  ;;  %v2946_v6 = vld [vmem:[%s9930_s5 + $0x8] sm:$0xff]  ;;  %v2951_v7 = vld [vmem:[%s9930_s5 + $0x30] sm:$0xff] }
 0x1f5   : > { %v1486_v17 = vpop.f32.mrf.mxu0 }
 0x1f6   : > { %v1622_v9 = vunpack.c.l.b16 %v1532_v61  ;;  %v1793_v18 = vunpack.c.h.b16 %v1532_v61  ;;  %v1519_v48 = vpack.c.bf16 %v1499_v43, %v1499_v43 }
 0x1f8   : > { %v7396_v11 = vpack.c.b16 %v1622_v9, %v1621_v12  ;;  %v7418_v30 = vpack.c.b16 %v1793_v18, %v1792_v23  ;;  %v2137_v28 = vunpack.c.l.b16 %v1519_v48  ;;  %v2954_v12 = vld [vmem:[%s9930_s5 + $0x48] sm:$0xff]  ;;  %v2955_v18 = vld [vmem:[%s9930_s5 + $0x50] sm:$0xff] }
 0x1f9   : > { %v2950_v23 = vld [vmem:[%s9930_s5 + $0x28] sm:$0xff]  ;;  %v6234_v48 = vld [vmem:[%s9929_s4 + $0x50] sm:$0xff] }
 0x1fa   : > { %1806 = vrot.lane.b32.xlu1 %v7384_v15, %s6582_s13  ;;  %2149 = vrot.lane.b32.xlu0 %v7390_v8, %s6584_s16 }
 0x1fb   : > { %1633 = vrot.lane.b32.xlu2 %v7396_v11, %s6581_s12  ;;  %v1500_v25 = vpop.f32.mrf.mxu1 }
 0x1fc   : > { %v1501_v40 = vadd.f32 %v1500_v25, %v1471_v21  ;;  %v2952_v25 = vld [vmem:[%s9930_s5 + $0x38] sm:$0xff] }
 0x1fe   : > { %v1521_v22 = vpack.c.bf16 %v1501_v40, %v1501_v40 }
 0x200   : > { %v2138_v10 = vunpack.c.l.b16 %v1521_v22 }
 0x202   : > { %1974 = vrot.lane.b32.xlu1 %v7404_v53, %s6583_s15  ;;  %2546 = vrot.lane.b32.xlu0 %v7370_v19, %s6585_s22  ;;  %v2145_v46 = vpack.c.b16 %v2138_v10, %v2137_v28 }
 0x203   : > { %1802 = vrot.lane.b32.xlu2 %v7374_v44, %s6582_s13  ;;  %v1503_v27 = vpop.f32.mrf.mxu1 }
 0x204   : > { %v1504_v34 = vadd.f32 %v1503_v27, %v1474_v31  ;;  %v6232_v27 = vld [vmem:[%s9929_s4 + $0x40] sm:$0xff] }
 0x206   : > { %v1523_v26 = vpack.c.bf16 %v1504_v34, %v1504_v34  ;;  %v2958_v34 = vld [vmem:[%s9930_s5 + $0x68] sm:$0xff] }
 0x208   : > { %v2139_v51 = vunpack.c.l.b16 %v1523_v26 }
 0x20a   : > { %2157 = vrot.lane.b32.xlu1 %v7404_v53, %s6584_s16  ;;  %1810 = vrot.lane.b32.xlu0 %v7396_v11, %s6582_s13 }
 0x20b   : > { %1808 = vrot.lane.b32.xlu2 %v7404_v53, %s6582_s13  ;;  %v1505_v14 = vpop.f32.mrf.mxu1 }
 0x20c   : > { %v1506_v62 = vadd.f32 %v1505_v14, %v1476_v16 }
 0x20e   : > { %v1525_v42 = vpack.c.bf16 %v1506_v62, %v1506_v62 }
 0x210   : > { %v2140_v38 = vunpack.c.l.b16 %v1525_v42 }
 0x212   : > { %2548 = vrot.lane.b32.xlu1 %v7374_v44, %s6585_s22  ;;  %2161 = vrot.lane.b32.xlu0 %v7418_v30, %s6584_s16  ;;  %v2146_v49 = vpack.c.b16 %v2140_v38, %v2139_v51  ;;  %v2956_v38 = vld [vmem:[%s9930_s5 + $0x58] sm:$0xff] }
 0x213   : > { %1970 = vrot.lane.b32.xlu2 %v7390_v8, %s6583_s15  ;;  %v1508_v32 = vpop.f32.mrf.mxu1 }
 0x214   : > { %v1509_v50 = vadd.f32 %v1508_v32, %v1479_v20  ;;  %v2960_v20 = vld [vmem:[%s9930_s5 + $0x78] sm:$0xff] }
 0x216   : > { %v1527_v33 = vpack.c.bf16 %v1509_v50, %v1509_v50  ;;  %v6264_v50 = vld [vmem:[%s9929_s4 + $0x140] sm:$0xff] }
 0x218   : > { %v2141_v57 = vunpack.c.l.b16 %v1527_v33  ;;  %v6235_v33 = vld [vmem:[%s9929_s4 + $0x58] sm:$0xff] }
 0x21a   : > { %2687 = vrot.lane.b32.xlu1 %v7390_v8, %s6586_s24  ;;  %2552 = vrot.lane.b32.xlu0 %v7396_v11, %s6585_s22 }
 0x21b   : > { %2153 = vrot.lane.b32.xlu2 %v7382_v47, %s6584_s16  ;;  %v1510_v36 = vpop.f32.mrf.mxu1 }
 0x21c   : > { %v1511_v3 = vadd.f32 %v1510_v36, %v1481_v35  ;;  %v2953_v35 = vld [vmem:[%s9930_s5 + $0x40] sm:$0xff]  ;;  %v6233_v36 = vld [vmem:[%s9929_s4 + $0x48] sm:$0xff] }
 0x21e   : > { %v1529_v39 = vpack.c.bf16 %v1511_v3, %v1511_v3 }
 0x220   : > { %v2142_v24 = vunpack.c.l.b16 %v1529_v39 }
 0x222   : > { %1812 = vrot.lane.b32.xlu1 %v7418_v30, %s6582_s13  ;;  %2155 = vrot.lane.b32.xlu0 %v2146_v49, %s6584_s16  ;;  %v2147_v58 = vpack.c.b16 %v2142_v24, %v2141_v57 }
 0x223   : > { %2550 = vrot.lane.b32.xlu2 %v7384_v15, %s6585_s22  ;;  %v1513_v63 = vpop.f32.mrf.mxu1 }
 0x224   : > { %v1514_v4 = vadd.f32 %v1513_v63, %v1484_v29  ;;  %v1628_v2 = vpop.permute.xlu2 %1627 }
 0x226   : > { %v1531_v60 = vpack.c.bf16 %v1514_v4, %v1514_v4 }
 0x228   : > { %v2143_v52 = vunpack.c.l.b16 %v1531_v60  ;;  %v6265_v60 = vld [vmem:[%s9929_s4 + $0x148] sm:$0xff] }
 0x22a   : > { %2151 = vrot.lane.b32.xlu1 %v2145_v46, %s6584_s16  ;;  %2306 = vrot.lane.b32.xlu0 %v2146_v49, %s6587_s25  ;;  %v2959_v49 = vld [vmem:[%s9930_s5 + $0x70] sm:$0xff] }
 0x22b   : > { %1976 = vrot.lane.b32.xlu2 %v7418_v30, %s6583_s15  ;;  %v1515_v55 = vpop.f32.mrf.mxu1 }
 0x22c   : > { %v1516_v56 = vadd.f32 %v1515_v55, %v1486_v17 }
 0x22e   : > { %v1533_v59 = vpack.c.bf16 %v1516_v56, %v1516_v56 }
 0x230   : > { %v2144_v54 = vunpack.c.l.b16 %v1533_v59 }
 0x232   : > { %2308 = vrot.lane.b32.xlu1 %v2147_v58, %s6587_s25  ;;  %2691 = vrot.lane.b32.xlu0 %v7404_v53, %s6586_s24  ;;  %v2148_v21 = vpack.c.b16 %v2144_v54, %v2143_v52  ;;  %v6248_v54 = vld [vmem:[%s9929_s4 + $0xc0] sm:$0xff] }
 0x233   : > { %2304 = vrot.lane.b32.xlu2 %v2145_v46, %s6587_s25 }
 0x23a   : > { %2163 = vrot.lane.b32.xlu1 %v2148_v21, %s6584_s16  ;;  %2814 = vrot.lane.b32.xlu0 %v7382_v47, %s6588_s29 }
 0x23b   : > { %2159 = vrot.lane.b32.xlu2 %v2147_v58, %s6584_s16 }
 0x242   : > { %2693 = vrot.lane.b32.xlu1 %v7418_v30, %s6586_s24  ;;  %2963 = vperm.xlu0 %6374, %v2945_v37  }
 0x243   : > { %2310 = vrot.lane.b32.xlu2 %v2148_v21, %s6587_s25  ;;  %v6236_v21 = vld [vmem:[%s9929_s4 + $0x60] sm:$0xff]  ;;  %s6590_s25 = smov 110  }
 0x24a   : > { %2816 = vrot.lane.b32.xlu1 %v7404_v53, %s6588_s29  ;;  %2978 = vperm.xlu0 %6374, %v2948_v1  }
 0x24b   : > { %2689 = vrot.lane.b32.xlu2 %v7382_v47, %s6586_s24  ;;  %v2949_v47 = vld [vmem:[%s9930_s5 + $0x20] sm:$0xff]  ;;  %s4955_s24 = sshll.u32 %s380_s0, 2 }
 0x24c   : > { %v1630_v41 = vpop.permute.xlu0 %1629  ;;  %s382_s16 = scalar_lea.vmem [#allocation2], %s4955_s24  ;;  %s6536_s24 = scalar_lea.hbm %s9936_s11, 8 }
 0x24d   : > { %s4889_s22 = sshll.u32 %s382_s16, 4  ;;  %s4890_s22 = int_to_ptr.vmem [resolvable:$true] %s4889_s22 }
 0x252   : > { %2968 = vperm.xlu1 %6375, %v2946_v6   ;;  %2993 = vperm.xlu0 %6374, %v2951_v7   ;;  %v6249_v7 = vld [vmem:[%s9929_s4 + $0xc8] sm:$0xff] }
 0x253   : > { %2812 = vrot.lane.b32.xlu2 %v7390_v8, %s6588_s29 }
 0x254   : > { %v7464_v5 = vpop.permute.xlu0 %1798 }
 0x255   : > { %v1634_v61 = vpop.permute.xlu2 %1633 }
 0x256   : > { %1667 = vmatpush.bf16.msrb.mxu2 %v1634_v61 }
 0x25a   : > { %2983 = vperm.xlu1 %6375, %v2949_v47   ;;  %3008 = vperm.xlu0 %6374, %v2954_v12  }
 0x25b   : > { %2818 = vrot.lane.b32.xlu2 %v7418_v30, %s6588_s29  ;;  %s6136_s29 = sshll.u32 %s6680_s21, 2  ;;  %s4877_s21 = scalar_lea.sflag [#allocation3], %s380_s0 }
 0x25c   : > { %v1632_v9 = vpop.permute.xlu1 %1631  ;;  %v7473_v31 = vpop.permute.xlu0 %1804  ;;  %s4887_s15 = scalar_lea.hbm %s9936_s11, %s6136_s29 }
 0x25d   : > { %v7475_v8 = vpop.permute.xlu2 %1802  ;;  %1668 = vmatpush.bf16.msrb.mxu2 %v1632_v9  ;;  %v6280_v9 = vld [vmem:[%s9929_s4 + $0x1c0] sm:$0xff] }
 0x25e   : > { %v1816_v4 = vsel %vm1814_vm1, %v7475_v8, %v7473_v31 }
 0x261   : > { %1669 = vmatpush.bf16.msrb.mxu2 %v1630_v41 }
 0x262   : > { %2998 = vperm.xlu1 %6375, %v2952_v25   ;;  %3023 = vperm.xlu0 %6374, %v2957_v13   ;;  %v6267_v25 = vld [vmem:[%s9929_s4 + $0x158] sm:$0xff]  ;;  %v6250_v13 = vld [vmem:[%s9929_s4 + $0xd0] sm:$0xff] }
 0x263   : > { %2973 = vperm.xlu2 %6376, %v2947_v45   ;;  %v6238_v45 = vld [vmem:[%s9929_s4 + $0x70] sm:$0xff] }
 0x264   : > { %v7486_v53 = vpop.permute.xlu1 %1800  ;;  %v1973_v16 = vpop.permute.xlu0 %1972 }
 0x265   : > { %v1809_v14 = vpop.permute.xlu2 %1808  ;;  %1670 = vmatpush.bf16.msrb.mxu2 %v1628_v2  ;;  %v1815_v58 = vsel %vm1814_vm1, %v7464_v5, %v7486_v53  ;;  %v6237_v5 = vld [vmem:[%s9929_s4 + $0x68] sm:$0xff] }
 0x266   : > { %v6281_v53 = vld [vmem:[%s9929_s4 + $0x1c8] sm:$0xff] }
 0x268   : > { %5375 = vmatmul.msk.bf16.vlgmr.msrb.gmra.mxu2 %vm659_vm0, %v6232_v27  ;;  %v6251_v27 = vld [vmem:[%s9929_s4 + $0xd8] sm:$0xff] }
 0x26a   : > { %3013 = vperm.xlu1 %6375, %v2955_v18   ;;  %3038 = vperm.xlu0 %6374, %v2960_v20   ;;  %v6282_v18 = vld [vmem:[%s9929_s4 + $0x1d0] sm:$0xff]  ;;  %v6269_v20 = vld [vmem:[%s9929_s4 + $0x168] sm:$0xff] }
 0x26b   : > { %2988 = vperm.xlu2 %6376, %v2950_v23   ;;  %v6252_v23 = vld [vmem:[%s9929_s4 + $0xe0] sm:$0xff] }
 0x26c   : > { %v1807_v30 = vpop.permute.xlu1 %1806  ;;  %v7501_v32 = vpop.permute.xlu0 %2149 }
 0x26d   : > { %v1971_v62 = vpop.permute.xlu2 %1970  ;;  %v1817_v24 = vsel %vm1814_vm1, %v1807_v30, %v1809_v14  ;;  %v6239_v14 = vld [vmem:[%s9929_s4 + $0x78] sm:$0xff]  ;;  %v6288_v30 = vld [vmem:[%s9929_s4 + $0x200] sm:$0xff] }
 0x272   : > { %3028 = vperm.xlu1 %6375, %v2958_v34   ;;  %v6270_v34 = vld [vmem:[%s9929_s4 + $0x170] sm:$0xff] }
 0x273   : > { %3003 = vperm.xlu2 %6376, %v2953_v35   ;;  %v6253_v35 = vld [vmem:[%s9929_s4 + $0xe8] sm:$0xff] }
 0x274   : > { %v1975_v42 = vpop.permute.xlu1 %1974  ;;  %v2547_v26 = vpop.permute.xlu0 %2546 }
 0x275   : > { %v7512_v40 = vpop.permute.xlu2 %2153 }
 0x278   : > { %5376 = vmatmul.msk.bf16.gmra.mxu2 %vm659_vm0, %v6233_v36  ;;  %v6284_v36 = vld [vmem:[%s9929_s4 + $0x1e0] sm:$0xff] }
 0x27b   : > { %3018 = vperm.xlu2 %6376, %v2956_v38   ;;  %v6271_v38 = vld [vmem:[%s9929_s4 + $0x178] sm:$0xff] }
 0x27c   : > { %v2158_v43 = vpop.permute.xlu1 %2157  ;;  %v1811_v22 = vpop.permute.xlu0 %1810 }
 0x27d   : > { %v2551_v51 = vpop.permute.xlu2 %2550 }
 0x283   : > { %3033 = vperm.xlu2 %6376, %v2959_v49   ;;  %v6285_v49 = vld [vmem:[%s9929_s4 + $0x1e8] sm:$0xff] }
 0x284   : > { %v2549_v29 = vpop.permute.xlu1 %2548  ;;  %v2162_v10 = vpop.permute.xlu0 %2161 }
 0x285   : > { %v1977_v63 = vpop.permute.xlu2 %1976 }
 0x286   : > { %2010 = vmatpush.bf16.msra.mxu0 %v1977_v63  ;;  %v6255_v63 = vld [vmem:[%s9929_s4 + $0xf8] sm:$0xff] }
 0x288   : > { %5377 = vmatmul.msk.bf16.gmra.mxu2 %vm659_vm0, %v6234_v48  ;;  %v6240_v48 = vld [vmem:[%s9929_s4 + $0x80] sm:$0xff] }
 0x28a   : > { %2011 = vmatpush.bf16.msra.mxu0 %v1975_v42 }
 0x28c   : > { %v7525_v3 = vpop.permute.xlu1 %2687  ;;  %v2553_v39 = vpop.permute.xlu0 %2552 }
 0x28d   : > { %v2305_v28 = vpop.permute.xlu2 %2304 }
 0x28e   : > { %2012 = vmatpush.bf16.msra.mxu0 %v1973_v16  ;;  %v6268_v16 = vld [vmem:[%s9929_s4 + $0x160] sm:$0xff] }
 0x292   : > { %2013 = vmatpush.bf16.msra.mxu0 %v1971_v62 }
 0x294   : > { %v1813_v46 = vpop.permute.xlu1 %1812  ;;  %v2156_v59 = vpop.permute.xlu0 %2155 }
 0x295   : > { %v1818_v17 = vsel %vm1814_vm1, %v1811_v22, %v1813_v46  ;;  %5519 = vmatmul.msk.bf16.vlgmr.msra.gmra.mxu0 %vm659_vm0, %v6264_v50  ;;  %v2160_v55 = vpop.permute.xlu2 %2159  ;;  %v6290_v22 = vld [vmem:[%s9929_s4 + $0x210] sm:$0xff]  ;;  %v6224_v46 = vld [vmem:[%s9929_s4] sm:$0xff] }
 0x296   : > { %2586 = vmatpush.bf16.msrb.mxu0 %v2553_v39  ;;  %1851 = vmatpush.bf16.msra.mxu3 %v1818_v17  ;;  %v2168_v6 = vsel %vm2165_vm2, %v2158_v43, %v2160_v55  ;;  %v6254_v43 = vld [vmem:[%s9929_s4 + $0xf0] sm:$0xff]  ;;  %v6241_v39 = vld [vmem:[%s9929_s4 + $0x88] sm:$0xff]  ;;  %v6292_v17 = vld [vmem:[%s9929_s4 + $0x220] sm:$0xff] }
 0x298   : > { %5378 = vmatmul.msk.bf16.gmra.mxu2 %vm659_vm0, %v6235_v33 }
 0x29a   : > { %2587 = vmatpush.bf16.msrb.mxu0 %v2551_v51  ;;  %1852 = vmatpush.bf16.msra.mxu3 %v1817_v24  ;;  %v6287_v24 = vld [vmem:[%s9929_s4 + $0x1f8] sm:$0xff] }
 0x29c   : > { %v2152_v56 = vpop.permute.xlu1 %2151  ;;  %v2307_v1 = vpop.permute.xlu0 %2306 }
 0x29d   : > { %v2311_v57 = vpop.permute.xlu2 %2310  ;;  %v2166_v12 = vsel %vm2165_vm2, %v7501_v32, %v2152_v56  ;;  %v6283_v32 = vld [vmem:[%s9929_s4 + $0x1d8] sm:$0xff] }
 0x29e   : > { %2588 = vmatpush.bf16.msrb.mxu0 %v2549_v29  ;;  %2344 = vmatpush.bf16.msra.mxu2 %v2311_v57 }
 0x29f   : > { %1853 = vmatpush.bf16.msra.mxu3 %v1816_v4  ;;  %v6242_v4 = vld [vmem:[%s9929_s4 + $0x90] sm:$0xff] }
 0x2a2   : > { %2589 = vmatpush.bf16.msrb.mxu0 %v2547_v26  ;;  %v6289_v26 = vld [vmem:[%s9929_s4 + $0x208] sm:$0xff] }
 0x2a3   : > { %1854 = vmatpush.bf16.msra.mxu3 %v1815_v58 }
 0x2a4   : > { %v2309_v52 = vpop.permute.xlu1 %2308  ;;  %v2692_v47 = vpop.permute.xlu0 %2691 }
 0x2a5   : > { %5520 = vmatmul.msk.bf16.gmra.mxu0 %vm659_vm0, %v6265_v60  ;;  %v2690_v37 = vpop.permute.xlu2 %2689  ;;  %2345 = vmatpush.bf16.msra.mxu2 %v2309_v52  ;;  %v6293_v52 = vld [vmem:[%s9929_s4 + $0x228] sm:$0xff] }
 0x2a6   : > { %5447 = vmatmul.msk.bf16.vlgmr.msra.gmra.mxu3 %vm659_vm0, %v6248_v54 }
 0x2a7   : > { %2461 = vmatpush.bf16.msrb.mxu3 %v7396_v11 }
 0x2a8   : > { %5379 = vmatmul.msk.bf16.gmra.mxu2 %vm659_vm0, %v6236_v21  ;;  %v6256_v21 = vld [vmem:[%s9929_s4 + $0x100] sm:$0xff] }
 0x2a9   : > { %2346 = vmatpush.bf16.msra.mxu2 %v2307_v1 }
 0x2ab   : > { %2462 = vmatpush.bf16.msrb.mxu3 %v7384_v15  ;;  %v6266_v15 = vld [vmem:[%s9929_s4 + $0x150] sm:$0xff] }
 0x2ac   : > { %v2164_v11 = vpop.permute.xlu1 %2163  ;;  %v2815_v8 = vpop.permute.xlu0 %2814 }
 0x2ad   : > { %v2169_v41 = vsel %vm2165_vm2, %v2162_v10, %v2164_v11  ;;  %v2813_v2 = vpop.permute.xlu2 %2812  ;;  %2347 = vmatpush.bf16.msra.mxu2 %v2305_v28  ;;  %v6286_v28 = vld [vmem:[%s9929_s4 + $0x1f0] sm:$0xff] }
 0x2ae   : > { %2202 = vmatpush.bf16.msra.mxu1 %v2169_v41 }
 0x2af   : > { %2463 = vmatpush.bf16.msrb.mxu3 %v7374_v44 }
 0x2b2   : > { %2203 = vmatpush.bf16.msra.mxu1 %v2168_v6  ;;  %v6226_v6 = vld [vmem:[%s9929_s4 + $0x10] sm:$0xff] }
 0x2b3   : > { %2464 = vmatpush.bf16.msrb.mxu3 %v7370_v19  ;;  %v2167_v19 = vsel %vm2165_vm2, %v7512_v40, %v2156_v59  ;;  %v6225_v59 = vld [vmem:[%s9929_s4 + $0x8] sm:$0xff] }
 0x2b4   : > { %v2694_v44 = vpop.permute.xlu1 %2693 }
 0x2b5   : > { %5521 = vmatmul.msk.bf16.gmra.mxu0 %vm659_vm0, %v6266_v15  ;;  %v2819_v61 = vpop.permute.xlu2 %2818 }
 0x2b6   : > { %5448 = vmatmul.msk.bf16.gmra.mxu3 %vm659_vm0, %v6249_v7  ;;  %2852 = vmatpush.bf16.msrb.mxu2 %v2819_v61 }
 0x2b7   : > { %2204 = vmatpush.bf16.msra.mxu1 %v2167_v19  ;;  %v6257_v19 = vld [vmem:[%s9929_s4 + $0x108] sm:$0xff] }
 0x2b8   : > { %5380 = vmatmul.msk.bf16.gmra.mxu2 %vm659_vm0, %v6237_v5 }
 0x2bb   : > { %2205 = vmatpush.bf16.msra.mxu1 %v2166_v12 }
 0x2bc   : > { %v2817_v31 = vpop.permute.xlu1 %2816 }
 0x2bd   : > { %2853 = vmatpush.bf16.msrb.mxu2 %v2817_v31  ;;  %v6244_v31 = vld [vmem:[%s9929_s4 + $0xa0] sm:$0xff] }
 0x2be   : > { %5591 = vmatmul.msk.bf16.vlgmr.msra.gmra.mxu1 %vm659_vm0, %v6280_v9 }
 0x2bf   : > { %2727 = vmatpush.bf16.msrb.mxu1 %v2694_v44  ;;  %v6294_v44 = vld [vmem:[%s9929_s4 + $0x230] sm:$0xff] }
 0x2c1   : > { %2854 = vmatpush.bf16.msrb.mxu2 %v2815_v8  ;;  %v6227_v8 = vld [vmem:[%s9929_s4 + $0x18] sm:$0xff] }
 0x2c3   : > { %2728 = vmatpush.bf16.msrb.mxu1 %v2692_v47 }
 0x2c5   : > { %5522 = vmatmul.msk.bf16.gmra.mxu0 %vm659_vm0, %v6267_v25  ;;  %2855 = vmatpush.bf16.msrb.mxu2 %v2813_v2  ;;  %v6243_v2 = vld [vmem:[%s9929_s4 + $0x98] sm:$0xff] }
 0x2c6   : > { %5449 = vmatmul.msk.bf16.gmra.mxu3 %vm659_vm0, %v6250_v13 }
 0x2c7   : > { %2729 = vmatpush.bf16.msrb.mxu1 %v2690_v37 }
 0x2c8   : > { %5381 = vmatmul.msk.bf16.gmra.mxu2 %vm659_vm0, %v6238_v45 }
 0x2cb   : > { %2730 = vmatpush.bf16.msrb.mxu1 %v7525_v3  ;;  %v6291_v3 = vld [vmem:[%s9929_s4 + $0x218] sm:$0xff] }
 0x2ce   : > { %5592 = vmatmul.msk.bf16.gmra.mxu1 %vm659_vm0, %v6281_v53  ;;  %v6295_v53 = vld [vmem:[%s9929_s4 + $0x238] sm:$0xff] }
 0x2d5   : > { %5523 = vmatmul.msk.bf16.gmra.mxu0 %vm659_vm0, %v6268_v16  ;;  %v6258_v16 = vld [vmem:[%s9929_s4 + $0x110] sm:$0xff] }
 0x2d6   : > { %5450 = vmatmul.msk.bf16.gmra.mxu3 %vm659_vm0, %v6251_v27 }
 0x2d8   : > { %5382 = vmatmul.msk.bf16.gmra.mxu2 %vm659_vm0, %v6239_v14 }
 0x2de   : > { %5593 = vmatmul.msk.bf16.gmra.mxu1 %vm659_vm0, %v6282_v18 }
 0x2e5   : > { %5524 = vmatmul.msk.bf16.gmra.mxu0 %vm659_vm0, %v6269_v20 }
 0x2e6   : > { %5451 = vmatmul.msk.bf16.gmra.mxu3 %vm659_vm0, %v6252_v23  ;;  %v6245_v23 = vld [vmem:[%s9929_s4 + $0xa8] sm:$0xff] }
 0x2e8   : > { %5647 = vmatmul.msk.bf16.vlgmr.msra.gmra.mxu2 %vm659_vm0, %v6288_v30  ;;  %v6228_v30 = vld [vmem:[%s9929_s4 + $0x20] sm:$0xff] }
 0x2eb   : > { %v7629_v62 = vpop.f32.mrf.mxu2 }
 0x2ee   : > { %5594 = vmatmul.msk.bf16.gmra.mxu1 %vm659_vm0, %v6283_v32 }
 0x2f3   : > { %v7638_v42 = vpop.f32.mrf.mxu2 }
 0x2f5   : > { %5525 = vmatmul.msk.bf16.gmra.mxu0 %vm659_vm0, %v6270_v34 }
 0x2f6   : > { %5452 = vmatmul.msk.bf16.gmra.mxu3 %vm659_vm0, %v6253_v35  ;;  %v6272_v35 = vld [vmem:[%s9929_s4 + $0x180] sm:$0xff] }
 0x2f8   : > { %5648 = vmatmul.msk.bf16.gmra.mxu2 %vm659_vm0, %v6289_v26 }
 0x2fb   : > { %v7649_v40 = vpop.f32.mrf.mxu2 }
 0x2fe   : > { %5595 = vmatmul.msk.bf16.gmra.mxu1 %vm659_vm0, %v6284_v36 }
 0x303   : > { %v7658_v51 = vpop.f32.mrf.mxu2 }
 0x305   : > { %5526 = vmatmul.msk.bf16.gmra.mxu0 %vm659_vm0, %v6271_v38  ;;  %v6259_v38 = vld [vmem:[%s9929_s4 + $0x118] sm:$0xff] }
 0x306   : > { %5453 = vmatmul.msk.bf16.gmra.mxu3 %vm659_vm0, %v6254_v43 }
 0x308   : > { %5649 = vmatmul.msk.bf16.gmra.mxu2 %vm659_vm0, %v6290_v22 }
 0x30b   : > { %v7669_v29 = vpop.f32.mrf.mxu2 }
 0x30e   : > { %5596 = vmatmul.msk.bf16.gmra.mxu1 %vm659_vm0, %v6285_v49 }
 0x312   : > { %v7711_v56 = vpop.f32.mrf.mxu0 }
 0x313   : > { %v7678_v10 = vpop.f32.mrf.mxu2 }
 0x315   : > { %5727 = vmatmul.msk.bf16.vlgmr.msrb.gmra.mxu0 %vm659_vm0, %v6240_v48 }
 0x316   : > { %5454 = vmatmul.msk.bf16.gmra.mxu3 %vm659_vm0, %v6255_v63  ;;  %v6246_v63 = vld [vmem:[%s9929_s4 + $0xb0] sm:$0xff] }
 0x318   : > { %5650 = vmatmul.msk.bf16.gmra.mxu2 %vm659_vm0, %v6291_v3  ;;  %v6229_v3 = vld [vmem:[%s9929_s4 + $0x28] sm:$0xff] }
 0x31a   : > { %v7726_v54 = vpop.f32.mrf.mxu0 }
 0x31b   : > { %v7689_v50 = vpop.f32.mrf.mxu2 }
 0x31e   : > { %5597 = vmatmul.msk.bf16.gmra.mxu1 %vm659_vm0, %v6286_v28 }
 0x322   : > { %v7744_v41 = vpop.f32.mrf.mxu0 }
 0x323   : > { %v7698_v33 = vpop.f32.mrf.mxu2 }
 0x325   : > { %5728 = vmatmul.msk.bf16.gmra.mxu0 %vm659_vm0, %v6241_v39 }
 0x326   : > { %5687 = vmatmul.msk.bf16.vlgmr.msrb.gmra.mxu3 %vm659_vm0, %v6224_v46  ;;  %v6273_v46 = vld [vmem:[%s9929_s4 + $0x188] sm:$0xff] }
 0x328   : > { %5651 = vmatmul.msk.bf16.gmra.mxu2 %vm659_vm0, %v6292_v17 }
 0x329   : > { %v7706_v55 = vpop.f32.mrf.mxu3 }
 0x32a   : > { %v7763_v61 = vpop.f32.mrf.mxu0 }
 0x32b   : > { %v7713_v57 = vpop.f32.mrf.mxu2 }
 0x32c   : > { %9955 = vst [vmem:[#allocation5_spill] sm:$0xff] %v7713_v57 }
 0x32e   : > { %5598 = vmatmul.msk.bf16.gmra.mxu1 %vm659_vm0, %v6287_v24  ;;  %v6260_v24 = vld [vmem:[%s9929_s4 + $0x120] sm:$0xff] }
 0x331   : > { %v7722_v58 = vpop.f32.mrf.mxu3 }
 0x332   : > { %v7782_v25 = vpop.f32.mrf.mxu0 }
 0x333   : > { %v7724_v60 = vpop.f32.mrf.mxu2 }
 0x334   : > { %9956 = vst [vmem:[#allocation6_spill] sm:$0xff] %v7724_v60 }
 0x335   : > { %5729 = vmatmul.msk.bf16.gmra.mxu0 %vm659_vm0, %v6242_v4 }
 0x336   : > { %5688 = vmatmul.msk.bf16.gmra.mxu3 %vm659_vm0, %v6225_v59 }
 0x338   : > { %5652 = vmatmul.msk.bf16.gmra.mxu2 %vm659_vm0, %v6293_v52 }
 0x339   : > { %v7741_v11 = vpop.f32.mrf.mxu3 }
 0x33a   : > { %v7803_v20 = vpop.f32.mrf.mxu0 }
 0x33b   : > { %v7737_v37 = vpop.f32.mrf.mxu1  ;;  %v7739_v1 = vpop.f32.mrf.mxu2 }
 0x33c   : > { %9957 = vst [vmem:[#allocation7_spill] sm:$0xff] %v7739_v1 }
 0x33e   : > { %5767 = vmatmul.msk.bf16.vlgmr.msrb.gmra.mxu1 %vm659_vm0, %v6256_v21  ;;  %v6247_v21 = vld [vmem:[%s9929_s4 + $0xb8] sm:$0xff] }
 0x341   : > { %v7761_v5 = vpop.f32.mrf.mxu3 }
 0x342   : > { %v7823_v36 = vpop.f32.mrf.mxu0 }
 0x343   : > { %v7752_v15 = vpop.f32.mrf.mxu1  ;;  %v7754_v7 = vpop.f32.mrf.mxu2 }
 0x344   : > { %9958 = vst [vmem:[#allocation8_spill] sm:$0xff] %v7754_v7 }
 0x345   : > { %5730 = vmatmul.msk.bf16.gmra.mxu0 %vm659_vm0, %v6243_v2  ;;  %v6230_v2 = vld [vmem:[%s9929_s4 + $0x30] sm:$0xff] }
 0x346   : > { %5689 = vmatmul.msk.bf16.gmra.mxu3 %vm659_vm0, %v6226_v6 }
 0x348   : > { %5653 = vmatmul.msk.bf16.gmra.mxu2 %vm659_vm0, %v6294_v44 }
 0x349   : > { %v7774_v9 = vpop.f32.mrf.mxu3 }
 0x34a   : > { %v7836_v48 = vpop.f32.mrf.mxu0 }
 0x34b   : > { %v7769_v47 = vpop.f32.mrf.mxu1  ;;  %v7771_v12 = vpop.f32.mrf.mxu2  ;;  %9963 = vst [vmem:[#allocation13_spill] sm:$0xff] %v7836_v48 }
 0x34c   : > { %9959 = vst [vmem:[#allocation9_spill] sm:$0xff] %v7771_v12 }
 0x34e   : > { %5768 = vmatmul.msk.bf16.gmra.mxu1 %vm659_vm0, %v6257_v19 }
 0x351   : > { %v7799_v14 = vpop.f32.mrf.mxu3 }
 0x352   : > { %v7859_v4 = vpop.f32.mrf.mxu0 }
 0x353   : > { %v7784_v13 = vpop.f32.mrf.mxu1  ;;  %v7786_v45 = vpop.f32.mrf.mxu2  ;;  %9966 = vst [vmem:[#allocation16_spill] sm:$0xff] %v7859_v4 }
 0x354   : > { %9960 = vst [vmem:[#allocation10_spill] sm:$0xff] %v7786_v45 }
 0x355   : > { %5731 = vmatmul.msk.bf16.gmra.mxu0 %vm659_vm0, %v6244_v31  ;;  %v6274_v31 = vld [vmem:[%s9929_s4 + $0x190] sm:$0xff] }
 0x356   : > { %5690 = vmatmul.msk.bf16.gmra.mxu3 %vm659_vm0, %v6227_v8 }
 0x358   : > { %5654 = vmatmul.msk.bf16.gmra.mxu2 %vm659_vm0, %v6295_v53  ;;  %v6261_v53 = vld [vmem:[%s9929_s4 + $0x128] sm:$0xff] }
 0x359   : > { %v7819_v26 = vpop.f32.mrf.mxu3 }
 0x35a   : > { %v7876_v19 = vpop.f32.mrf.mxu0 }
 0x35b   : > { %v7797_v27 = vpop.f32.mrf.mxu1  ;;  %v7801_v18 = vpop.f32.mrf.mxu2  ;;  %9969 = vst [vmem:[#allocation19_spill] sm:$0xff] %v7876_v19 }
 0x35c   : > { %9961 = vst [vmem:[#allocation11_spill] sm:$0xff] %v7801_v18  ;;  %v6263_v18 = vld [vmem:[%s9929_s4 + $0x138] sm:$0xff] }
 0x35e   : > { %5769 = vmatmul.msk.bf16.gmra.mxu1 %vm659_vm0, %v6258_v16 }
 0x361   : > { %v7834_v49 = vpop.f32.mrf.mxu3 }
 0x363   : > { %v7812_v32 = vpop.f32.mrf.mxu1  ;;  %v7814_v34 = vpop.f32.mrf.mxu2 }
 0x364   : > { %9962 = vst [vmem:[#allocation12_spill] sm:$0xff] %v7814_v34 }
 0x365   : > { %5732 = vmatmul.msk.bf16.gmra.mxu0 %vm659_vm0, %v6245_v23 }
 0x366   : > { %5691 = vmatmul.msk.bf16.gmra.mxu3 %vm659_vm0, %v6228_v30  ;;  %v7894_v30 = vpop.f32.mrf.mxu0 }
 0x367   : > { %9972 = vst [vmem:[#allocation22_spill] sm:$0xff] %v7894_v30 }
 0x368   : > { %5807 = vmatmul.msk.bf16.vlgmr.msrb.gmra.mxu2 %vm659_vm0, %v6272_v35 }
 0x369   : > { %v7854_v17 = vpop.f32.mrf.mxu3 }
 0x36a   : > { %9965 = vst [vmem:[#allocation15_spill] sm:$0xff] %v7854_v17  ;;  %v2964_v17 = vpop.permute.xlu0 %2963 }
 0x36b   : > { %v7829_v43 = vpop.f32.mrf.mxu1  ;;  %v7831_v22 = vpop.f32.mrf.mxu2 }
 0x36e   : > { %5770 = vmatmul.msk.bf16.gmra.mxu1 %vm659_vm0, %v6259_v38  ;;  %v6231_v38 = vld [vmem:[%s9929_s4 + $0x38] sm:$0xff] }
 0x371   : > { %v7872_v6 = vpop.f32.mrf.mxu3 }
 0x372   : > { %9968 = vst [vmem:[#allocation18_spill] sm:$0xff] %v7872_v6 }
 0x373   : > { %v7844_v28 = vpop.f32.mrf.mxu1  ;;  %v7846_v39 = vpop.f32.mrf.mxu2 }
 0x374   : > { %9964 = vst [vmem:[#allocation14_spill] sm:$0xff] %v7844_v28 }
 0x375   : > { %5733 = vmatmul.msk.bf16.gmra.mxu0 %vm659_vm0, %v6246_v63 }
 0x376   : > { %5692 = vmatmul.msk.bf16.gmra.mxu3 %vm659_vm0, %v6229_v3  ;;  %v6275_v3 = vld [vmem:[%s9929_s4 + $0x198] sm:$0xff] }
 0x378   : > { %5808 = vmatmul.msk.bf16.gmra.mxu2 %vm659_vm0, %v6273_v46 }
 0x379   : > { %v7891_v23 = vpop.f32.mrf.mxu3 }
 0x37a   : > { %9971 = vst [vmem:[#allocation21_spill] sm:$0xff] %v7891_v23 }
 0x37b   : > { %v7861_v59 = vpop.f32.mrf.mxu1  ;;  %v7863_v52 = vpop.f32.mrf.mxu2 }
 0x37c   : > { %9967 = vst [vmem:[#allocation17_spill] sm:$0xff] %v7861_v59 }
 0x37e   : > { %5771 = vmatmul.msk.bf16.gmra.mxu1 %vm659_vm0, %v6260_v24  ;;  %v7909_v24 = vpop.f32.mrf.mxu0 }
 0x37f   : > { %9975 = vst [vmem:[#allocation25_spill] sm:$0xff] %v7909_v24 }
 0x381   : > { %v7907_v46 = vpop.f32.mrf.mxu3 }
 0x382   : > { %9974 = vst [vmem:[#allocation24_spill] sm:$0xff] %v7907_v46 }
 0x383   : > { %v7874_v44 = vpop.f32.mrf.mxu2  ;;  %v7881_v8 = vpop.f32.mrf.mxu1 }
 0x384   : > { %9970 = vst [vmem:[#allocation20_spill] sm:$0xff] %v7881_v8 }
 0x385   : > { %5734 = vmatmul.msk.bf16.gmra.mxu0 %vm659_vm0, %v6247_v21 }
 0x386   : > { %5693 = vmatmul.msk.bf16.gmra.mxu3 %vm659_vm0, %v6230_v2  ;;  %v6262_v2 = vld [vmem:[%s9929_s4 + $0x130] sm:$0xff]  ;;  %v7922_v0 = vpop.f32.mrf.mxu0 }
 0x387   : > { %9978 = vst [vmem:[#allocation28_spill] sm:$0xff] %v7922_v0 }
 0x388   : > { %5809 = vmatmul.msk.bf16.gmra.mxu2 %vm659_vm0, %v6274_v31 }
 0x38b   : > { %v7889_v16 = vpop.f32.mrf.mxu2  ;;  %v7896_v35 = vpop.f32.mrf.mxu1 }
 0x38c   : > { %9973 = vst [vmem:[#allocation23_spill] sm:$0xff] %v7896_v35 }
 0x38e   : > { %5772 = vmatmul.msk.bf16.gmra.mxu1 %vm659_vm0, %v6261_v53  ;;  %v7920_v53 = vpop.f32.mrf.mxu3 }
 0x38f   : > { %9977 = vst [vmem:[#allocation27_spill] sm:$0xff] %v7920_v53  ;;  %v7939_v53 = vpop.f32.mrf.mxu0 }
 0x390   : > { %9983 = vst [vmem:[#allocation33_spill] sm:$0xff] %v7939_v53 }
 0x393   : > { %v7901_v63 = vpop.f32.mrf.mxu2  ;;  %v7912_v21 = vpop.f32.mrf.mxu1 }
 0x394   : > { %9976 = vst [vmem:[#allocation26_spill] sm:$0xff] %v7912_v21 }
 0x396   : > { %5694 = vmatmul.msk.bf16.gmra.mxu3 %vm659_vm0, %v6231_v38  ;;  %v7935_v45 = vpop.f32.mrf.mxu3 }
 0x397   : > { %9981 = vst [vmem:[#allocation31_spill] sm:$0xff] %v7935_v45  ;;  %v7951_v21 = vpop.f32.mrf.mxu0 }
 0x398   : > { %5810 = vmatmul.msk.bf16.gmra.mxu2 %vm659_vm0, %v6275_v3  ;;  %v6276_v3 = vld [vmem:[%s9929_s4 + $0x1a0] sm:$0xff]  ;;  %9987 = vst [vmem:[#allocation37_spill] sm:$0xff] %v7951_v21 }
 0x39b   : > { %v7917_v31 = vpop.f32.mrf.mxu2  ;;  %v7924_v38 = vpop.f32.mrf.mxu1 }
 0x39c   : > { %9979 = vst [vmem:[#allocation29_spill] sm:$0xff] %v7924_v38 }
 0x39e   : > { %5773 = vmatmul.msk.bf16.gmra.mxu1 %vm659_vm0, %v6262_v2  ;;  %v7949_v12 = vpop.f32.mrf.mxu3 }
 0x39f   : > { %9986 = vst [vmem:[#allocation36_spill] sm:$0xff] %v7949_v12  ;;  %v6278_v12 = vld [vmem:[%s9929_s4 + $0x1b0] sm:$0xff] }
 0x3a3   : > { %v7926_v34 = vpop.f32.mrf.mxu2  ;;  %v7941_v0 = vpop.f32.mrf.mxu1 }
 0x3a4   : > { %9980 = vst [vmem:[#allocation30_spill] sm:$0xff] %v7926_v34 }
 0x3a5   : > { %9984 = vst [vmem:[#allocation34_spill] sm:$0xff] %v7941_v0  ;;  %v7960_v0 = vpop.f32.mrf.mxu0 }
 0x3a6   : > { %v7958_v53 = vpop.f32.mrf.mxu3  ;;  %9991 = vst [vmem:[#allocation41_spill] sm:$0xff] %v7960_v0 }
 0x3a7   : > { %9990 = vst [vmem:[#allocation40_spill] sm:$0xff] %v7958_v53 }
 0x3a8   : > { %5811 = vmatmul.msk.bf16.gmra.mxu2 %vm659_vm0, %v6276_v3  ;;  %v6277_v3 = vld [vmem:[%s9929_s4 + $0x1a8] sm:$0xff] }
 0x3ab   : > { %v7937_v2 = vpop.f32.mrf.mxu2  ;;  %v7953_v24 = vpop.f32.mrf.mxu1 }
 0x3ac   : > { %9982 = vst [vmem:[#allocation32_spill] sm:$0xff] %v7937_v2 }
 0x3ad   : > { %9988 = vst [vmem:[#allocation38_spill] sm:$0xff] %v7953_v24  ;;  %v2591_v24 = vpop.f32.mrf.mxu0 }
 0x3ae   : > { %5774 = vmatmul.msk.bf16.gmra.mxu1 %vm659_vm0, %v6263_v18  ;;  %v2466_v21 = vpop.f32.mrf.mxu3  ;;  %v2592_v6 = vadd.f32 %v2591_v24, %v7706_v55 }
 0x3b3   : > { %v7944_v38 = vpop.f32.mrf.mxu2  ;;  %v7962_v18 = vpop.f32.mrf.mxu1 }
 0x3b4   : > { %9985 = vst [vmem:[#allocation35_spill] sm:$0xff] %v7944_v38 }
 0x3b5   : > { %9992 = vst [vmem:[#allocation42_spill] sm:$0xff] %v7962_v18  ;;  %v2593_v53 = vpop.f32.mrf.mxu0  ;;  %v6279_v18 = vld [vmem:[%s9929_s4 + $0x1b8] sm:$0xff] }
 0x3b8   : > { %5812 = vmatmul.msk.bf16.gmra.mxu2 %vm659_vm0, %v6277_v3 }
 0x3bb   : > { %v7956_v45 = vpop.f32.mrf.mxu2  ;;  %v2732_v7 = vpop.f32.mrf.mxu1 }
 0x3bc   : > { %9989 = vst [vmem:[#allocation39_spill] sm:$0xff] %v7956_v45  ;;  %v2468_v45 = vpop.f32.mrf.mxu3  ;;  %v2733_v2 = vadd.f32 %v2732_v7, %v7711_v56 }
 0x3bd   : > { %v2469_v34 = vadd.f32 %v2468_v45, %v7638_v42  ;;  %v2969_v42 = vpop.permute.xlu1 %2968 }
 0x3c3   : > { %v7964_v46 = vpop.f32.mrf.mxu2  ;;  %v2734_v0 = vpop.f32.mrf.mxu1 }
 0x3c4   : > { %9993 = vst [vmem:[#allocation43_spill] sm:$0xff] %v7964_v46  ;;  %v2471_v30 = vpop.f32.mrf.mxu3  ;;  %v2735_v55 = vadd.f32 %v2734_v0, %v7726_v54 }
 0x3c5   : > { %v2472_v45 = vadd.f32 %v2471_v30, %v7649_v40 }
 0x3c8   : > { %5813 = vmatmul.msk.bf16.gmra.mxu2 %vm659_vm0, %v6278_v12  ;;  %v2596_v12 = vpop.f32.mrf.mxu0 }
 0x3cb   : > { %v7970_v3 = vpop.f32.mrf.mxu2  ;;  %v2737_v23 = vpop.f32.mrf.mxu1 }
 0x3cc   : > { %9994 = vst [vmem:[#allocation44_spill] sm:$0xff] %v7970_v3  ;;  %v2473_v1 = vpop.f32.mrf.mxu3 }
 0x3cd   : > { %v2474_v40 = vadd.f32 %v2473_v1, %v7658_v51 }
 0x3d0   : > { %v2598_v3 = vpop.f32.mrf.mxu0 }
 0x3d3   : > { %v7972_v35 = vpop.f32.mrf.mxu2  ;;  %v2739_v8 = vpop.f32.mrf.mxu1 }
 0x3d4   : > { %9995 = vst [vmem:[#allocation45_spill] sm:$0xff] %v7972_v35  ;;  %v2467_v35 = vadd.f32 %v2466_v21, %v7629_v62  ;;  %v2476_v4 = vpop.f32.mrf.mxu3  ;;  %v2594_v62 = vadd.f32 %v2593_v53, %v7722_v58 }
 0x3d5   : > { %v2477_v1 = vadd.f32 %v2476_v4, %v7669_v29 }
 0x3d8   : > { %5814 = vmatmul.msk.bf16.gmra.mxu2 %vm659_vm0, %v6279_v18  ;;  %v2631_v18 = vadd.f32 %v2592_v6, %v2467_v35 }
 0x3db   : > { %v7978_v46 = vpop.f32.mrf.mxu2  ;;  %v2742_v28 = vpop.f32.mrf.mxu1 }
 0x3dc   : > { %9996 = vst [vmem:[#allocation46_spill] sm:$0xff] %v7978_v46  ;;  %v2478_v0 = vpop.f32.mrf.mxu3 }
 0x3e3   : > { %v7980_v38 = vpop.f32.mrf.mxu2 }
 0x3e4   : > { %9997 = vst [vmem:[#allocation47_spill] sm:$0xff] %v7980_v38  ;;  %v2601_v38 = vpop.f32.mrf.mxu0  ;;  %v2481_v53 = vpop.f32.mrf.mxu3 }
 0x3eb   : > { %v2857_v19 = vpop.f32.mrf.mxu2 }
 0x3ec   : > { %v2858_v60 = vadd.f32 %v2857_v19, %v7737_v37  ;;  %v2632_v37 = vadd.f32 %v2594_v62, %v2469_v34  ;;  %v2738_v34 = vadd.f32 %v2737_v23, %v7744_v41  ;;  %v2740_v23 = vadd.f32 %v2739_v8, %v7763_v61  ;;  %v2979_v61 = vpop.permute.xlu0 %2978 }
 0x3ed   : > { %v2743_v8 = vadd.f32 %v2742_v28, %v7782_v25  ;;  %v2984_v28 = vpop.permute.xlu1 %2983 }
 0x3ee   : > { %v2897_v59 = vadd.f32 %v2858_v60, %v2733_v2 }
 0x3f0   : > { %v2913_v46 = vadd.f32 %v2897_v59, %v2631_v18 }
 0x3f2   : > { %v2929_v57 = vadd.f32 %v2913_v46, %v7831_v22 }
 0x3f3   : > { %v2859_v48 = vpop.f32.mrf.mxu2 }
 0x3f4   : > { %v2860_v56 = vadd.f32 %v2859_v48, %v7752_v15  ;;  %v7991_v7 = vadd.f32 %v2964_v17, %v2929_v57  ;;  %v2597_v57 = vadd.f32 %v2596_v12, %v7741_v11  ;;  %v2603_v15 = vpop.f32.mrf.mxu0  ;;  %v2744_v17 = vpop.f32.mrf.mxu1 }
 0x3f5   : > { %v2604_v4 = vadd.f32 %v2603_v15, %v7799_v14  ;;  %v2482_v14 = vadd.f32 %v2481_v53, %v7689_v50  ;;  %v2994_v50 = vpop.permute.xlu0 %2993  ;;  %v9998_v53 = vld [vmem:[#allocation13_spill] sm:$0xff] }
 0x3f6   : > { %v2898_v60 = vadd.f32 %v2860_v56, %v2735_v55  ;;  %v3057_v59 = vmax.f32 %v7991_v7, 0.0  ;;  %v2633_v19 = vadd.f32 %v2597_v57, %v2472_v45 }
 0x3f8   : > { %v2914_v6 = vadd.f32 %v2898_v60, %v2632_v37  ;;  %3089 = vrot.lane.b32.xlu1 %v3057_v59, %s6589_s14 }
 0x3fa   : > { %v2930_v58 = vadd.f32 %v2914_v6, %v7846_v39  ;;  %v2974_v39 = vpop.permute.xlu2 %2973 }
 0x3fb   : > { %v2862_v54 = vpop.f32.mrf.mxu2 }
 0x3fc   : > { %v2863_v22 = vadd.f32 %v2862_v54, %v7769_v47  ;;  %v8002_v48 = vadd.f32 %v2969_v42, %v2930_v58  ;;  %v2599_v47 = vadd.f32 %v2598_v3, %v7761_v5  ;;  %v2606_v12 = vpop.f32.mrf.mxu0  ;;  %v2747_v55 = vpop.f32.mrf.mxu1 }
 0x3fd   : > { %v2483_v42 = vpop.f32.mrf.mxu3 }
 0x3fe   : > { %v2899_v35 = vadd.f32 %v2863_v22, %v2738_v34  ;;  %v3058_v46 = vmax.f32 %v8002_v48, 0.0  ;;  %v2634_v2 = vadd.f32 %v2599_v47, %v2474_v40 }
 0x400   : > { %v2915_v24 = vadd.f32 %v2899_v35, %v2633_v19  ;;  %3091 = vrot.lane.b32.xlu2 %v3058_v46, %s6589_s14  ;;  %v2748_v35 = vadd.f32 %v2747_v55, %v7823_v36 }
 0x402   : > { %v2931_v11 = vadd.f32 %v2915_v24, %v7863_v52  ;;  %v2602_v52 = vadd.f32 %v2601_v38, %v7774_v9  ;;  %v2479_v9 = vadd.f32 %v2478_v0, %v7678_v10 }
 0x403   : > { %v2864_v41 = vpop.f32.mrf.mxu2 }
 0x404   : > { %v2865_v30 = vadd.f32 %v2864_v41, %v7784_v13  ;;  %v8013_v21 = vadd.f32 %v2974_v39, %v2931_v11  ;;  %v2635_v37 = vadd.f32 %v2602_v52, %v2477_v1  ;;  %v2608_v45 = vpop.f32.mrf.mxu0  ;;  %v2749_v29 = vpop.f32.mrf.mxu1  ;;  %v2636_v57 = vadd.f32 %v2604_v4, %v2479_v9 }
 0x405   : > { %v2486_v10 = vpop.f32.mrf.mxu3 }
 0x406   : > { %v2900_v18 = vadd.f32 %v2865_v30, %v2740_v23  ;;  %v3059_v62 = vmax.f32 %v8013_v21, 0.0 }
 0x408   : > { %v2916_v51 = vadd.f32 %v2900_v18, %v2634_v2  ;;  %3093 = vrot.lane.b32.xlu0 %v3059_v62, %s6589_s14  ;;  %v2750_v2 = vadd.f32 %v2749_v29, %v9998_v53  ;;  %v10011_v53 = vld [vmem:[#allocation35_spill] sm:$0xff] }
 0x40a   : > { %v2932_v5 = vadd.f32 %v2916_v51, %v7874_v44  ;;  %v2745_v44 = vadd.f32 %v2744_v17, %v7803_v20  ;;  %v2607_v17 = vadd.f32 %v2606_v12, %v7819_v26  ;;  %v9999_v12 = vld [vmem:[#allocation14_spill] sm:$0xff] }
 0x40b   : > { %v2867_v13 = vpop.f32.mrf.mxu2 }
 0x40c   : > { %v2868_v3 = vadd.f32 %v2867_v13, %v7797_v27  ;;  %v8024_v56 = vadd.f32 %v2979_v61, %v2932_v5  ;;  %v2611_v0 = vpop.f32.mrf.mxu0  ;;  %v2752_v15 = vpop.f32.mrf.mxu1  ;;  %v2637_v11 = vadd.f32 %v2607_v17, %v2482_v14 }
 0x40d   : > { %v2488_v23 = vpop.f32.mrf.mxu3 }
 0x40e   : > { %v2901_v60 = vadd.f32 %v2868_v3, %v2743_v8  ;;  %v3060_v6 = vmax.f32 %v8024_v56, 0.0  ;;  %v2999_v8 = vpop.permute.xlu1 %2998 }
 0x410   : > { %v2917_v58 = vadd.f32 %v2901_v60, %v2635_v37  ;;  %3095 = vrot.lane.b32.xlu1 %v3060_v6, %s6589_s14  ;;  %v10002_v37 = vld [vmem:[#allocation15_spill] sm:$0xff] }
 0x411   : > { %v2612_v60 = vadd.f32 %v2611_v0, %v10002_v37 }
 0x412   : > { %v2933_v25 = vadd.f32 %v2917_v58, %v7889_v16  ;;  %v2989_v16 = vpop.permute.xlu2 %2988  ;;  %v10004_v58 = vld [vmem:[#allocation17_spill] sm:$0xff] }
 0x413   : > { %v2869_v27 = vpop.f32.mrf.mxu2 }
 0x414   : > { %v2870_v38 = vadd.f32 %v2869_v27, %v7812_v32  ;;  %v8035_v54 = vadd.f32 %v2984_v28, %v2933_v25  ;;  %v2613_v30 = vpop.f32.mrf.mxu0  ;;  %v2754_v51 = vpop.f32.mrf.mxu1 }
 0x415   : > { %v2491_v25 = vpop.f32.mrf.mxu3 }
 0x416   : > { %v2902_v34 = vadd.f32 %v2870_v38, %v2745_v44  ;;  %v3061_v22 = vmax.f32 %v8035_v54, 0.0 }
 0x418   : > { %v2918_v19 = vadd.f32 %v2902_v34, %v2636_v57  ;;  %3097 = vrot.lane.b32.xlu2 %v3061_v22, %s6589_s14  ;;  %v10005_v34 = vld [vmem:[#allocation6_spill] sm:$0xff] }
 0x41a   : > { %v2934_v20 = vadd.f32 %v2918_v19, %v7901_v63  ;;  %v2484_v63 = vadd.f32 %v2483_v42, %v7698_v33  ;;  %v10000_v33 = vld [vmem:[#allocation5_spill] sm:$0xff]  ;;  %v10003_v42 = vld [vmem:[#allocation16_spill] sm:$0xff]  ;;  %v2489_v19 = vadd.f32 %v2488_v23, %v10005_v34  ;;  %v3004_v0 = vpop.permute.xlu2 %3003 }
 0x41b   : > { %v2872_v32 = vpop.f32.mrf.mxu2  ;;  %v10018_v34 = vld [vmem:[#allocation25_spill] sm:$0xff] }
 0x41c   : > { %v2873_v24 = vadd.f32 %v2872_v32, %v7829_v43  ;;  %v8046_v40 = vadd.f32 %v2989_v16, %v2934_v20  ;;  %v2609_v43 = vadd.f32 %v2608_v45, %v7834_v49  ;;  %v10001_v49 = vld [vmem:[#allocation30_spill] sm:$0xff]  ;;  %v2753_v45 = vadd.f32 %v2752_v15, %v10003_v42  ;;  %v2616_v28 = vpop.f32.mrf.mxu0  ;;  %v2757_v38 = vpop.f32.mrf.mxu1  ;;  %v10008_v32 = vld [vmem:[#allocation19_spill] sm:$0xff] }
 0x41d   : > { %v10007_v20 = vld [vmem:[#allocation18_spill] sm:$0xff]  ;;  %v2755_v17 = vadd.f32 %v2754_v51, %v10008_v32  ;;  %v10012_v51 = vld [vmem:[#allocation21_spill] sm:$0xff]  ;;  %v3014_v42 = vpop.permute.xlu1 %3013 }
 0x41e   : > { %v2903_v39 = vadd.f32 %v2873_v24, %v2748_v35  ;;  %v3062_v41 = vmax.f32 %v8046_v40, 0.0  ;;  %v2638_v1 = vadd.f32 %v2609_v43, %v2484_v63  ;;  %v2614_v15 = vadd.f32 %v2613_v30, %v10007_v20  ;;  %v10009_v35 = vld [vmem:[#allocation20_spill] sm:$0xff]  ;;  %v2493_v63 = vpop.f32.mrf.mxu3  ;;  %v10010_v43 = vld [vmem:[#allocation7_spill] sm:$0xff] }
 0x41f   : > { %v2492_v30 = vadd.f32 %v2491_v25, %v10010_v43  ;;  %v10016_v25 = vld [vmem:[#allocation39_spill] sm:$0xff]  ;;  %v10023_v43 = vld [vmem:[#allocation28_spill] sm:$0xff] }
 0x420   : > { %v2919_v47 = vadd.f32 %v2903_v39, %v2637_v11  ;;  %3099 = vrot.lane.b32.xlu0 %v3062_v41, %s6589_s14  ;;  %v2640_v39 = vadd.f32 %v2614_v15, %v2489_v19 }
 0x422   : > { %v2935_v26 = vadd.f32 %v2919_v47, %v7917_v31  ;;  %v2487_v31 = vadd.f32 %v2486_v10, %v10000_v33  ;;  %v10006_v10 = vld [vmem:[#allocation32_spill] sm:$0xff]  ;;  %v10014_v33 = vld [vmem:[#allocation23_spill] sm:$0xff] }
 0x423   : > { %v2874_v36 = vpop.f32.mrf.mxu2 }
 0x424   : > { %v2875_v18 = vadd.f32 %v2874_v36, %v9999_v12  ;;  %v8057_v55 = vadd.f32 %v2994_v50, %v2935_v26  ;;  %v2639_v27 = vadd.f32 %v2612_v60, %v2487_v31  ;;  %v2618_v26 = vpop.f32.mrf.mxu0  ;;  %v2759_v23 = vpop.f32.mrf.mxu1 }
 0x425   : > { %v3009_v12 = vpop.permute.xlu0 %3008  ;;  %v2760_v19 = vadd.f32 %v2759_v23, %v10018_v34 }
 0x426   : > { %v2904_v5 = vadd.f32 %v2875_v18, %v2750_v2  ;;  %v3063_v61 = vmax.f32 %v8057_v55, 0.0  ;;  %v2496_v60 = vpop.f32.mrf.mxu3 }
 0x428   : > { %v2920_v13 = vadd.f32 %v2904_v5, %v2638_v1  ;;  %3101 = vrot.lane.b32.xlu1 %v3063_v61, %s6589_s14  ;;  %v2617_v1 = vadd.f32 %v2616_v28, %v10012_v51  ;;  %v10013_v5 = vld [vmem:[#allocation22_spill] sm:$0xff] }
 0x42a   : > { %v2936_v52 = vadd.f32 %v2920_v13, %v10001_v49  ;;  %v2758_v13 = vadd.f32 %v2757_v38, %v10013_v5  ;;  %v10017_v38 = vld [vmem:[#allocation24_spill] sm:$0xff] }
 0x42b   : > { %v2877_v3 = vpop.f32.mrf.mxu2 }
 0x42c   : > { %v2878_v29 = vadd.f32 %v2877_v3, %v10004_v58  ;;  %v8068_v9 = vadd.f32 %v2999_v8, %v2936_v52  ;;  %v2641_v52 = vadd.f32 %v2617_v1, %v2492_v30  ;;  %v10015_v58 = vld [vmem:[#allocation8_spill] sm:$0xff] }
 0x42e   : > { %v2905_v4 = vadd.f32 %v2878_v29, %v2753_v45  ;;  %v3064_v44 = vmax.f32 %v8068_v9, 0.0  ;;  %v2621_v45 = vpop.f32.mrf.mxu0  ;;  %v2494_v29 = vadd.f32 %v2493_v63, %v10015_v58  ;;  %v2498_v63 = vpop.f32.mrf.mxu3 }
 0x430   : > { %v2921_v57 = vadd.f32 %v2905_v4, %v2639_v27  ;;  %3103 = vrot.lane.b32.xlu2 %v3064_v44, %s6589_s14  ;;  %v2762_v27 = vpop.f32.mrf.mxu1 }
 0x431   : > { %v2763_v30 = vadd.f32 %v2762_v27, %v10023_v43 }
 0x432   : > { %v2937_v16 = vadd.f32 %v2921_v57, %v10006_v10  ;;  %v2619_v57 = vadd.f32 %v2618_v26, %v10017_v38  ;;  %v10019_v10 = vld [vmem:[#allocation26_spill] sm:$0xff] }
 0x433   : > { %v2879_v14 = vpop.f32.mrf.mxu2 }
 0x434   : > { %v2880_v24 = vadd.f32 %v2879_v14, %v10009_v35  ;;  %v8079_v11 = vadd.f32 %v3004_v0, %v2937_v16  ;;  %v2642_v14 = vadd.f32 %v2619_v57, %v2494_v29  ;;  %v10020_v35 = vld [vmem:[#allocation9_spill] sm:$0xff] }
 0x435   : > { %v10028_v29 = vld [vmem:[#allocation33_spill] sm:$0xff] }
 0x436   : > { %v2906_v47 = vadd.f32 %v2880_v24, %v2755_v17  ;;  %v3065_v50 = vmax.f32 %v8079_v11, 0.0  ;;  %v3019_v17 = vpop.permute.xlu2 %3018  ;;  %v2497_v24 = vadd.f32 %v2496_v60, %v10020_v35  ;;  %v3024_v60 = vpop.permute.xlu0 %3023 }
 0x437   : > { %v2501_v38 = vpop.f32.mrf.mxu3 }
 0x438   : > { %v2922_v36 = vadd.f32 %v2906_v47, %v2640_v39  ;;  %3105 = vrot.lane.b32.xlu0 %v3065_v50, %s6589_s14  ;;  %v10021_v39 = vld [vmem:[#allocation43_spill] sm:$0xff]  ;;  %v2764_v51 = vpop.f32.mrf.mxu1 }
 0x43a   : > { %v2938_v2 = vadd.f32 %v2922_v36, %v10011_v53  ;;  %v10022_v36 = vld [vmem:[#allocation27_spill] sm:$0xff]  ;;  %v10024_v53 = vld [vmem:[#allocation29_spill] sm:$0xff] }
 0x43b   : > { %v2882_v18 = vpop.f32.mrf.mxu2  ;;  %v2622_v23 = vadd.f32 %v2621_v45, %v10022_v36  ;;  %v10027_v45 = vld [vmem:[#allocation31_spill] sm:$0xff] }
 0x43c   : > { %v2883_v31 = vadd.f32 %v2882_v18, %v10014_v33  ;;  %v8090_v49 = vadd.f32 %v3009_v12, %v2938_v2  ;;  %v2623_v18 = vpop.f32.mrf.mxu0 }
 0x43d   : > { %v2643_v1 = vadd.f32 %v2622_v23, %v2497_v24  ;;  %v2624_v58 = vadd.f32 %v2623_v18, %v10027_v45  ;;  %v3029_v24 = vpop.permute.xlu1 %3028  ;;  %v10034_v23 = vld [vmem:[#allocation38_spill] sm:$0xff]  ;;  %v10037_v45 = vld [vmem:[#allocation40_spill] sm:$0xff] }
 0x43e   : > { %v2907_v8 = vadd.f32 %v2883_v31, %v2758_v13  ;;  %v3066_v3 = vmax.f32 %v8090_v49, 0.0  ;;  %v10025_v31 = vld [vmem:[#allocation10_spill] sm:$0xff]  ;;  %v9947_v49 = vmov 1  }
 0x43f   : > { %6377 = vset.pattern.permute.xlu1 %v9947_v49 }
 0x440   : > { %v2923_v37 = vadd.f32 %v2907_v8, %v2641_v52  ;;  %3107 = vrot.lane.b32.xlu1 %v3066_v3, %s6589_s14  ;;  %v2499_v52 = vadd.f32 %v2498_v63, %v10025_v31  ;;  %v10026_v8 = vld [vmem:[#allocation44_spill] sm:$0xff] }
 0x441   : > { %v10035_v31 = vld [vmem:[#allocation12_spill] sm:$0xff] }
 0x442   : > { %v2939_v28 = vadd.f32 %v2923_v37, %v10016_v25  ;;  %v2765_v25 = vadd.f32 %v2764_v51, %v10028_v29  ;;  %v2644_v57 = vadd.f32 %v2624_v58, %v2499_v52  ;;  %v2503_v51 = vpop.f32.mrf.mxu3  ;;  %v10038_v29 = vld [vmem:[#allocation41_spill] sm:$0xff] }
 0x443   : > { %v2884_v4 = vpop.f32.mrf.mxu2  ;;  %v2504_v52 = vadd.f32 %v2503_v51, %v10035_v31 }
 0x444   : > { %v2885_v16 = vadd.f32 %v2884_v4, %v10019_v10  ;;  %v8101_v0 = vadd.f32 %v3014_v42, %v2939_v28  ;;  %v10029_v28 = vld [vmem:[#allocation34_spill] sm:$0xff]  ;;  %v2626_v10 = vpop.f32.mrf.mxu0 }
 0x446   : > { %v2908_v20 = vadd.f32 %v2885_v16, %v2760_v19  ;;  %v3067_v15 = vmax.f32 %v8101_v0, 0.0  ;;  %v2767_v16 = vpop.f32.mrf.mxu1 }
 0x448   : > { %v2924_v32 = vadd.f32 %v2908_v20, %v2642_v14  ;;  %3109 = vrot.lane.b32.xlu2 %v3067_v15, %s6589_s14  ;;  %v10030_v20 = vld [vmem:[#allocation11_spill] sm:$0xff] }
 0x44a   : > { %v2940_v47 = vadd.f32 %v2924_v32, %v10021_v39  ;;  %v2502_v32 = vadd.f32 %v2501_v38, %v10030_v20  ;;  %v10040_v20 = vld [vmem:[#allocation47_spill] sm:$0xff] }
 0x44b   : > { %v2887_v26 = vpop.f32.mrf.mxu2 }
 0x44c   : > { %v2888_v2 = vadd.f32 %v2887_v26, %v10024_v53  ;;  %v8112_v12 = vadd.f32 %v3019_v17, %v2940_v47  ;;  %v10031_v17 = vld [vmem:[#allocation45_spill] sm:$0xff]  ;;  %v10032_v47 = vld [vmem:[#allocation36_spill] sm:$0xff] }
 0x44d   : > { %v2627_v63 = vadd.f32 %v2626_v10, %v10032_v47  ;;  %v10033_v26 = vld [vmem:[#allocation37_spill] sm:$0xff] }
 0x44e   : > { %v2909_v5 = vadd.f32 %v2888_v2, %v2763_v30  ;;  %v3068_v13 = vmax.f32 %v8112_v12, 0.0  ;;  %v2768_v36 = vadd.f32 %v2767_v16, %v10033_v26  ;;  %v9939_v12 = vmov 2  }
 0x44f   : > { %v2645_v53 = vadd.f32 %v2627_v63, %v2502_v32 }
 0x450   : > { %v2925_v33 = vadd.f32 %v2909_v5, %v2643_v1  ;;  %3111 = vrot.lane.b32.xlu0 %v3068_v13, %s6589_s14  ;;  %v2628_v5 = vpop.f32.mrf.mxu0 }
 0x451   : > { %v2629_v58 = vadd.f32 %v2628_v5, %v10037_v45  ;;  %v9945_v5 = vmov 4  }
 0x452   : > { %v2941_v37 = vadd.f32 %v2925_v33, %v10026_v8  ;;  %v2769_v33 = vpop.f32.mrf.mxu1  ;;  %v10036_v8 = vld [vmem:[#allocation46_spill] sm:$0xff] }
 0x453   : > { %v2889_v42 = vpop.f32.mrf.mxu2 }
 0x454   : > { %v2890_v27 = vadd.f32 %v2889_v42, %v10029_v28  ;;  %v8123_v4 = vadd.f32 %v3024_v60, %v2941_v37  ;;  %v3034_v60 = vpop.permute.xlu2 %3033  ;;  %v10039_v28 = vld [vmem:[#allocation42_spill] sm:$0xff] }
 0x456   : > { %v2910_v34 = vadd.f32 %v2890_v27, %v2765_v25  ;;  %v3069_v19 = vmax.f32 %v8123_v4, 0.0  ;;  %v2770_v25 = vadd.f32 %v2769_v33, %v10038_v29 }
 0x458   : > { %v2926_v14 = vadd.f32 %v2910_v34, %v2644_v57  ;;  %3113 = vrot.lane.b32.xlu1 %v3069_v19, %s6589_s14  ;;  %v2646_v57 = vadd.f32 %v2629_v58, %v2504_v52  ;;  %v10041_v52 = vmov 0  }
 0x45a   : > { %v2942_v35 = vadd.f32 %v2926_v14, %v10031_v17  ;;  %v3039_v17 = vpop.permute.xlu0 %3038 }
 0x45b   : > { %v2892_v39 = vpop.f32.mrf.mxu2 }
 0x45c   : > { %v2893_v43 = vadd.f32 %v2892_v39, %v10034_v23  ;;  %v8134_v30 = vadd.f32 %v3029_v24, %v2942_v35  ;;  %v3092_v35 = vpop.permute.xlu2 %3091  ;;  %v6591_v23 = vmov 3  }
 0x45d   : > { %v3138_v47 = vmax.f32 %v3058_v46, %v3092_v35  ;;  %6379 = vset.pattern.permute.xlu2 %v6591_v23 }
 0x45e   : > { %v2911_v2 = vadd.f32 %v2893_v43, %v2768_v36  ;;  %v3070_v18 = vmax.f32 %v8134_v30, 0.0 }
 0x460   : > { %v2927_v1 = vadd.f32 %v2911_v2, %v2645_v53  ;;  %3115 = vrot.lane.b32.xlu2 %v3070_v18, %s6589_s14 }
 0x462   : > { %v2943_v37 = vadd.f32 %v2927_v1, %v10036_v8 }
 0x463   : > { %v2894_v42 = vpop.f32.mrf.mxu2 }
 0x464   : > { %v2895_v27 = vadd.f32 %v2894_v42, %v10039_v28  ;;  %v8143_v38 = vadd.f32 %v3034_v60, %v2943_v37  ;;  %v9940_v60 = vmov 6  }
 0x466   : > { %v2912_v34 = vadd.f32 %v2895_v27, %v2770_v25  ;;  %v3071_v10 = vmax.f32 %v8143_v38, 0.0 }
 0x468   : > { %v2928_v16 = vadd.f32 %v2912_v34, %v2646_v57  ;;  %3117 = vrot.lane.b32.xlu0 %v3071_v10, %s6589_s14 }
 0x46a   : > { %v3090_v14 = vpop.permute.xlu1 %3089  ;;  %v2944_v32 = vadd.f32 %v2928_v16, %v10040_v20 }
 0x46b   : > { %v3137_v24 = vmax.f32 %v3057_v59, %v3090_v14  ;;  %v9942_v14 = vmov 7  }
 0x46c   : > { %v8152_v39 = vadd.f32 %v3039_v17, %v2944_v32 }
 0x46d   : > { %3169 = vrot.lane.b32.xlu2 %v3137_v24, %s6590_s25 }
 0x46e   : > { %v3072_v63 = vmax.f32 %v8152_v39, 0.0 }
 0x470   : > { %3119 = vrot.lane.b32.xlu1 %v3072_v63, %s6589_s14  ;;  %3171 = vrot.lane.b32.xlu0 %v3138_v47, %s6590_s25  ;;  %s4891_s14 = sshll.u32 %s4887_s15, 4  ;;  %s4892_s14 = int_to_ptr.hbm [resolvable:$true] %s4891_s14 }
 0x472   : > { %v3098_v26 = vpop.permute.xlu2 %3097 }
 0x473   : > { %v8162_v36 = vmax.f32 %v3061_v22, %v3098_v26 }
 0x478   : > { %3177 = vrot.lane.b32.xlu0 %v8162_v36, %s6590_s25 }
 0x47a   : > { %v3094_v7 = vpop.permute.xlu0 %3093 }
 0x47b   : > { %v8168_v59 = vmax.f32 %v3059_v62, %v3094_v7 }
 0x47d   : > { %3173 = vrot.lane.b32.xlu1 %v8168_v59, %s6590_s25 }
 0x482   : > { %v3096_v48 = vpop.permute.xlu1 %3095 }
 0x483   : > { %v8174_v46 = vmax.f32 %v3060_v6, %v3096_v48  ;;  %v3234_v48 = vld [vmem:[%s9931_s6 + $0x8] sm:$0xff] }
 0x485   : > { %3175 = vrot.lane.b32.xlu2 %v8174_v46, %s6590_s25 }
 0x48a   : > { %v3104_v54 = vpop.permute.xlu2 %3103 }
 0x48b   : > { %v8180_v22 = vmax.f32 %v3064_v44, %v3104_v54  ;;  %v5816_v54 = vld [vmem:[%s9931_s6 + $0x108] sm:$0xff] }
 0x48d   : > { %3183 = vrot.lane.b32.xlu0 %v8180_v22, %s6590_s25 }
 0x492   : > { %v3100_v21 = vpop.permute.xlu0 %3099 }
 0x493   : > { %v8186_v62 = vmax.f32 %v3062_v41, %v3100_v21  ;;  %v5848_v21 = vld [vmem:[%s9931_s6 + $0x208] sm:$0xff] }
 0x495   : > { %3179 = vrot.lane.b32.xlu1 %v8186_v62, %s6590_s25 }
 0x49a   : > { %v3102_v56 = vpop.permute.xlu1 %3101 }
 0x49b   : > { %v8192_v6 = vmax.f32 %v3063_v61, %v3102_v56 }
 0x49d   : > { %3181 = vrot.lane.b32.xlu2 %v8192_v6, %s6590_s25 }
 0x4a2   : > { %v3110_v9 = vpop.permute.xlu2 %3109 }
 0x4a3   : > { %v8198_v44 = vmax.f32 %v3067_v15, %v3110_v9 }
 0x4a5   : > { %3189 = vrot.lane.b32.xlu0 %v8198_v44, %s6590_s25 }
 0x4aa   : > { %v3106_v40 = vpop.permute.xlu0 %3105 }
 0x4ab   : > { %v8204_v41 = vmax.f32 %v3065_v50, %v3106_v40 }
 0x4ad   : > { %3185 = vrot.lane.b32.xlu1 %v8204_v41, %s6590_s25 }
 0x4b2   : > { %v3108_v55 = vpop.permute.xlu1 %3107 }
 0x4b3   : > { %v8210_v61 = vmax.f32 %v3066_v3, %v3108_v55 }
 0x4b5   : > { %3187 = vrot.lane.b32.xlu2 %v8210_v61, %s6590_s25 }
 0x4ba   : > { %v3116_v0 = vpop.permute.xlu2 %3115 }
 0x4bb   : > { %v8215_v15 = vmax.f32 %v3070_v18, %v3116_v0  ;;  %v9944_v18 = vmov 5  }
 0x4bd   : > { %3195 = vrot.lane.b32.xlu0 %v8215_v15, %s6590_s25 }
 0x4c2   : > { %v3112_v11 = vpop.permute.xlu0 %3111 }
 0x4c3   : > { %v8221_v50 = vmax.f32 %v3068_v13, %v3112_v11 }
 0x4c5   : > { %3191 = vrot.lane.b32.xlu1 %v8221_v50, %s6590_s25 }
 0x4c7   : > { %v3170_v3 = vpop.permute.xlu2 %3169 }
 0x4c8   : > { %v8226_v43 = vmax.f32 %v3137_v24, %v3170_v3 }
 0x4ca   : > { %v3114_v30 = vpop.permute.xlu1 %3113  ;;  %3267 = vperm.xlu0 %6374, %v8226_v43  }
 0x4cb   : > { %v8231_v53 = vmax.f32 %v3069_v19, %v3114_v30 }
 0x4cd   : > { %3193 = vrot.lane.b32.xlu2 %v8231_v53, %s6590_s25 }
 0x4d2   : > { %6378 = vset.pattern.permute.xlu0 %v9939_v12 }
 0x4d3   : > { %3572 = vperm.xlu0 %6378, %v8226_v43  }
 0x4d5   : > { %3733 = vperm.xlu2 %6379, %v8226_v43  }
 0x4da   : > { %v3118_v13 = vpop.permute.xlu0 %3117 }
 0x4db   : > { %v8240_v2 = vmax.f32 %v3071_v10, %v3118_v13  ;;  %6381 = vset.pattern.permute.xlu0 %v9944_v18  ;;  %v5879_v13 = vld [vmem:[%s9931_s6 + $0x300] sm:$0xff] }
 0x4dc   : > { %4055 = vperm.xlu0 %6381, %v8226_v43  }
 0x4dd   : > { %3197 = vrot.lane.b32.xlu1 %v8240_v2, %s6590_s25  ;;  %6383 = vset.pattern.permute.xlu2 %v9947_v49 }
 0x4df   : > { %v3176_v8 = vpop.permute.xlu2 %3175 }
 0x4e0   : > { %v8275_v37 = vmax.f32 %v8174_v46, %v3176_v8  ;;  %v5815_v46 = vld [vmem:[%s9931_s6 + $0x100] sm:$0xff] }
 0x4e2   : > { %v3120_v4 = vpop.permute.xlu1 %3119  ;;  %v3172_v19 = vpop.permute.xlu0 %3171 }
 0x4e3   : > { %v8247_v51 = vmax.f32 %v3072_v63, %v3120_v4  ;;  %v8249_v1 = vmax.f32 %v3138_v47, %v3172_v19  ;;  %v5880_v4 = vld [vmem:[%s9931_s6 + $0x308] sm:$0xff] }
 0x4e4   : > { %6385 = vset.pattern.permute.xlu0 %v6591_v23 }
 0x4e5   : > { %3199 = vrot.lane.b32.xlu2 %v8247_v51, %s6590_s25  ;;  %3411 = vperm.xlu1 %6377, %v8226_v43   ;;  %s6530_s25 = sshra.s32 %s4892_s14, 4  ;;  %s6531_s25 = int_to_ptr.hbm [resolvable:$true] %s6530_s25 }
 0x4e6   : > { %3737 = vperm.xlu0 %6385, %v8249_v1   ;;  %s6532_s30 = scalar_lea.hbm %s6531_s25, 4  ;;  %p6537_p0 = scmp.lt.s32.totalorder %s6531_s25, %s9936_s11 }
 0x4e7   : > { %p6533_p11 = scmp.ne.s32.totalorder %s6531_s25, %s6532_s30  ;;  %p6538_p1 = scmp.lt.s32.totalorder %s6536_s24, %s6532_s30 }
 0x4e9   : > { %p6534_p12 = pnand %p6533_p11, %p6697_p5  ;;  %p6539_p2 = por %p6538_p1, %p6537_p0 }
 0x4ea   : > { %v3178_v29 = vpop.permute.xlu0 %3177 }
 0x4eb   : > { %v8301_v25 = vmax.f32 %v8162_v36, %v3178_v29  ;;  %p6535_p13 = pneg %p6534_p12 }
 0x4ed   : > { %3415 = vperm.xlu2 %6383, %v8249_v1   ;;  %6380 = vset.pattern.permute.xlu1 %v9945_v5  ;;  %p6540_p3 = pnand %p6539_p2, %p6535_p13 }
 0x4ee   : > { %3894 = vperm.xlu1 %6380, %v8226_v43   ;;  %6389 = vset.pattern.permute.xlu0 %v9947_v49 }
 0x4ef   : > { %v3174_v33 = vpop.permute.xlu1 %3173 }
 0x4f0   : > { %v8261_v31 = vmax.f32 %v8168_v59, %v3174_v33  ;;  %v3233_v59 = vld [vmem:[%s9931_s6] sm:$0xff] }
 0x4f2   : > { %3419 = vperm.xlu0 %6389, %v8261_v31  }
 0x4f5   : > { %6386 = vset.pattern.permute.xlu2 %v9945_v5 }
 0x4f6   : > { %3898 = vperm.xlu2 %6386, %v8249_v1   ;;  %6382 = vset.pattern.permute.xlu1 %v10041_v52 }
 0x4f7   : > { %3272 = vperm.xlu1 %6382, %v8249_v1   ;;  %v3182_v58 = vpop.permute.xlu2 %3181 }
 0x4f8   : > { %v8310_v27 = vmax.f32 %v8192_v6, %v3182_v58 }
 0x4fa   : > { %6392 = vset.pattern.permute.xlu0 %v9945_v5 }
 0x4fb   : > { %3902 = vperm.xlu0 %6392, %v8261_v31  }
 0x4fe   : > { %6388 = vset.pattern.permute.xlu2 %v10041_v52 }
 0x4ff   : > { %3277 = vperm.xlu2 %6388, %v8261_v31   ;;  %6384 = vset.pattern.permute.xlu1 %v9939_v12  ;;  %v3184_v38 = vpop.permute.xlu0 %3183 }
 0x500   : > { %3576 = vperm.xlu1 %6384, %v8249_v1   ;;  %v8341_v35 = vmax.f32 %v8180_v22, %v3184_v38  ;;  %v5847_v22 = vld [vmem:[%s9931_s6 + $0x200] sm:$0xff]  ;;  %v5944_v38 = vld [vmem:[%s9931_s6 + $0x508] sm:$0xff] }
 0x503   : > { %6394 = vset.pattern.permute.xlu0 %v10041_v52 }
 0x504   : > { %3282 = vperm.xlu0 %6394, %v8275_v37  }
 0x507   : > { %6390 = vset.pattern.permute.xlu2 %v9939_v12  ;;  %v3180_v42 = vpop.permute.xlu1 %3179 }
 0x508   : > { %3580 = vperm.xlu2 %6390, %v8261_v31   ;;  %6387 = vset.pattern.permute.xlu1 %v9944_v18  ;;  %v8290_v45 = vmax.f32 %v8186_v62, %v3180_v42  ;;  %v5912_v42 = vld [vmem:[%s9931_s6 + $0x408] sm:$0xff] }
 0x509   : > { %4059 = vperm.xlu1 %6387, %v8249_v1  }
 0x50c   : > { %6400 = vset.pattern.permute.xlu0 %v9940_v60 }
 0x50d   : > { %4228 = vperm.xlu0 %6400, %v8275_v37  }
 0x50f   : > { %v8307_v28 = vpop.permute.xlu2 %3187 }
 0x510   : > { %6393 = vset.pattern.permute.xlu2 %v9944_v18  ;;  %v8392_v30 = vmax.f32 %v8210_v61, %v8307_v28  ;;  %v5911_v61 = vld [vmem:[%s9931_s6 + $0x400] sm:$0xff] }
 0x511   : > { %4063 = vperm.xlu2 %6393, %v8261_v31   ;;  %6391 = vset.pattern.permute.xlu1 %v6591_v23  ;;  %v5943_v28 = vld [vmem:[%s9931_s6 + $0x500] sm:$0xff] }
 0x512   : > { %3741 = vperm.xlu1 %6391, %v8261_v31  }
 0x515   : > { %6410 = vset.pattern.permute.xlu0 %v9939_v12 }
 0x516   : > { %3592 = vperm.xlu0 %6410, %v8290_v45  }
 0x517   : > { %v8320_v34 = vpop.permute.xlu0 %3189 }
 0x519   : > { %6397 = vset.pattern.permute.xlu2 %v6591_v23 }
 0x51a   : > { %6395 = vset.pattern.permute.xlu1 %v9947_v49  ;;  %3745 = vperm.xlu2 %6397, %v8275_v37  }
 0x51b   : > { %3423 = vperm.xlu1 %6395, %v8275_v37  }
 0x51e   : > { %6413 = vset.pattern.permute.xlu0 %v9944_v18 }
 0x51f   : > { %4075 = vperm.xlu0 %6413, %v8290_v45   ;;  %v3186_v32 = vpop.permute.xlu1 %3185 }
 0x520   : > { %v8364_v7 = vmax.f32 %v8204_v41, %v3186_v32  ;;  %v3237_v32 = vld [vmem:[%s9931_s6 + $0x20] sm:$0xff] }
 0x522   : > { %6402 = vset.pattern.permute.xlu2 %v9947_v49 }
 0x523   : > { %3427 = vperm.xlu2 %6402, %v8301_v25   ;;  %6396 = vset.pattern.permute.xlu1 %v9939_v12 }
 0x524   : > { %3584 = vperm.xlu1 %6396, %v8275_v37  }
 0x527   : > { %6416 = vset.pattern.permute.xlu0 %v10041_v52  ;;  %v8317_v57 = vpop.permute.xlu2 %3193 }
 0x528   : > { %3297 = vperm.xlu0 %6416, %v8310_v27  }
 0x52b   : > { %6403 = vset.pattern.permute.xlu2 %v9939_v12 }
 0x52c   : > { %3588 = vperm.xlu2 %6403, %v8301_v25   ;;  %6398 = vset.pattern.permute.xlu1 %v9945_v5 }
 0x52d   : > { %3906 = vperm.xlu1 %6398, %v8275_v37  }
 0x52f   : > { %v8327_v10 = vpop.permute.xlu0 %3195  ;;  %v8330_v16 = vpop.permute.xlu2 %3733 }
 0x530   : > { %6419 = vset.pattern.permute.xlu0 %v6591_v23  ;;  %v3796_v58 = vmul.f32 %v5879_v13, %v8330_v16  ;;  %v3797_v29 = vmul.f32 %v5880_v4, %v8330_v16 }
 0x531   : > { %3757 = vperm.xlu0 %6419, %v8310_v27  }
 0x534   : > { %6405 = vset.pattern.permute.xlu2 %v9945_v5 }
 0x535   : > { %3910 = vperm.xlu2 %6405, %v8301_v25   ;;  %6399 = vset.pattern.permute.xlu1 %v9944_v18 }
 0x536   : > { %4067 = vperm.xlu1 %6399, %v8275_v37  }
 0x537   : > { %v8346_v24 = vpop.permute.xlu1 %3191 }
 0x539   : > { %6423 = vset.pattern.permute.xlu0 %v9942_v14 }
 0x53a   : > { %4401 = vperm.xlu0 %6423, %v8310_v27  }
 0x53c   : > { %v3268_v20 = vpop.permute.xlu0 %3267 }
 0x53d   : > { %6406 = vset.pattern.permute.xlu2 %v9944_v18  ;;  %v3345_v56 = vmul.f32 %v3268_v20, %v3233_v59  ;;  %v3346_v6 = vmul.f32 %v3268_v20, %v3234_v48 }
 0x53e   : > { %4071 = vperm.xlu2 %6406, %v8301_v25   ;;  %6401 = vset.pattern.permute.xlu1 %v10041_v52 }
 0x53f   : > { %3287 = vperm.xlu1 %6401, %v8301_v25   ;;  %v8338_v17 = vpop.permute.xlu2 %3199 }
 0x542   : > { %6426 = vset.pattern.permute.xlu0 %v9947_v49 }
 0x543   : > { %3439 = vperm.xlu0 %6426, %v8341_v35  }
 0x545   : > { %v3573_v47 = vpop.permute.xlu0 %3572 }
 0x546   : > { %6407 = vset.pattern.permute.xlu2 %v9940_v60  ;;  %v3635_v55 = vmul.f32 %v5847_v22, %v3573_v47  ;;  %v3636_v0 = vmul.f32 %v5848_v21, %v3573_v47  ;;  %v3238_v47 = vld [vmem:[%s9931_s6 + $0x28] sm:$0xff]  ;;  %v5819_v22 = vld [vmem:[%s9931_s6 + $0x120] sm:$0xff] }
 0x547   : > { %4232 = vperm.xlu2 %6407, %v8301_v25   ;;  %6404 = vset.pattern.permute.xlu1 %v6591_v23  ;;  %v8350_v39 = vpop.permute.xlu2 %3415  ;;  %v5820_v21 = vld [vmem:[%s9931_s6 + $0x128] sm:$0xff] }
 0x548   : > { %3749 = vperm.xlu1 %6404, %v8301_v25  }
 0x54b   : > { %6429 = vset.pattern.permute.xlu0 %v9945_v5 }
 0x54c   : > { %3922 = vperm.xlu0 %6429, %v8341_v35  }
 0x54e   : > { %v4056_v36 = vpop.permute.xlu0 %4055 }
 0x54f   : > { %v8355_v63 = vpop.permute.xlu1 %3197  ;;  %6408 = vset.pattern.permute.xlu2 %v10041_v52 }
 0x550   : > { %3292 = vperm.xlu2 %6408, %v8290_v45   ;;  %6409 = vset.pattern.permute.xlu1 %v9947_v49  ;;  %v8360_v26 = vpop.permute.xlu2 %3898 }
 0x551   : > { %3431 = vperm.xlu1 %6409, %v8290_v45  }
 0x554   : > { %6436 = vset.pattern.permute.xlu0 %v9939_v12 }
 0x555   : > { %3604 = vperm.xlu0 %6436, %v8364_v7  }
 0x557   : > { %v3412_v62 = vpop.permute.xlu1 %3411 }
 0x558   : > { %v3474_v9 = vmul.f32 %v5815_v46, %v3412_v62  ;;  %v3475_v40 = vmul.f32 %v5816_v54, %v3412_v62  ;;  %6411 = vset.pattern.permute.xlu2 %v6591_v23  ;;  %v8400_v8 = vpop.permute.xlu0 %3737  ;;  %v4118_v62 = vmul.f32 %v5943_v28, %v4056_v36 }
 0x559   : > { %3753 = vperm.xlu2 %6411, %v8290_v45   ;;  %6412 = vset.pattern.permute.xlu1 %v9945_v5  ;;  %v3278_v41 = vpop.permute.xlu2 %3277 }
 0x55a   : > { %v3506_v11 = vadd.f32 %v3474_v9, %v3345_v56  ;;  %v3507_v3 = vadd.f32 %v3475_v40, %v3346_v6  ;;  %3914 = vperm.xlu1 %6412, %v8290_v45   ;;  %v4119_v56 = vmul.f32 %v5944_v38, %v4056_v36  ;;  %v3349_v40 = vmul.f32 %v3278_v41, %v3237_v32  ;;  %v3236_v32 = vld [vmem:[%s9931_s6 + $0x18] sm:$0xff] }
 0x55c   : > { %v3667_v19 = vadd.f32 %v3635_v55, %v3506_v11  ;;  %v3668_v33 = vadd.f32 %v3636_v0, %v3507_v3  ;;  %v3350_v55 = vmul.f32 %v3278_v41, %v3238_v47  ;;  %v5851_v0 = vld [vmem:[%s9931_s6 + $0x220] sm:$0xff]  ;;  %v5852_v11 = vld [vmem:[%s9931_s6 + $0x228] sm:$0xff]  ;;  %v8464_v47 = vmax.f32 %v8198_v44, %v8320_v34  ;;  %v5850_v44 = vld [vmem:[%s9931_s6 + $0x218] sm:$0xff] }
 0x55d   : > { %6443 = vset.pattern.permute.xlu0 %v10041_v52 }
 0x55e   : > { %3312 = vperm.xlu0 %6443, %v8392_v30   ;;  %v3828_v59 = vadd.f32 %v3796_v58, %v3667_v19  ;;  %v3829_v48 = vadd.f32 %v3797_v29, %v3668_v33 }
 0x560   : > { %v3895_v20 = vpop.permute.xlu1 %3894 }
 0x561   : > { %v3957_v16 = vmul.f32 %v5911_v61, %v3895_v20  ;;  %v3958_v46 = vmul.f32 %v5912_v42, %v3895_v20  ;;  %6414 = vset.pattern.permute.xlu2 %v9940_v60  ;;  %v3235_v20 = vld [vmem:[%s9931_s6 + $0x10] sm:$0xff] }
 0x562   : > { %4236 = vperm.xlu2 %6414, %v8290_v45   ;;  %6415 = vset.pattern.permute.xlu1 %v9942_v14  ;;  %v3581_v54 = vpop.permute.xlu2 %3580 }
 0x563   : > { %v3989_v6 = vadd.f32 %v3957_v16, %v3828_v59  ;;  %v3990_v9 = vadd.f32 %v3958_v46, %v3829_v48  ;;  %4397 = vperm.xlu1 %6415, %v8290_v45   ;;  %v3639_v33 = vmul.f32 %v5851_v0, %v3581_v54  ;;  %v3640_v61 = vmul.f32 %v5852_v11, %v3581_v54  ;;  %v5817_v59 = vld [vmem:[%s9931_s6 + $0x110] sm:$0xff]  ;;  %v5818_v48 = vld [vmem:[%s9931_s6 + $0x118] sm:$0xff] }
 0x564   : > { %v3420_v3 = vpop.permute.xlu0 %3419  ;;  %v5849_v54 = vld [vmem:[%s9931_s6 + $0x210] sm:$0xff]  ;;  %v3476_v34 = vmul.f32 %v5817_v59, %v8350_v39 }
 0x565   : > { %v3478_v13 = vmul.f32 %v5819_v22, %v3420_v3  ;;  %v3479_v4 = vmul.f32 %v5820_v21, %v3420_v3  ;;  %v8440_v19 = vadd.f32 %v4118_v62, %v3989_v6  ;;  %v8442_v36 = vadd.f32 %v4119_v56, %v3990_v9  ;;  %v5881_v62 = vld [vmem:[%s9931_s6 + $0x310] sm:$0xff]  ;;  %v5882_v56 = vld [vmem:[%s9931_s6 + $0x318] sm:$0xff] }
 0x566   : > { %6446 = vset.pattern.permute.xlu0 %v6591_v23  ;;  %v3477_v22 = vmul.f32 %v5818_v48, %v8350_v39  ;;  %v3798_v3 = vmul.f32 %v5881_v62, %v8400_v8  ;;  %v5884_v62 = vld [vmem:[%s9931_s6 + $0x328] sm:$0xff] }
 0x567   : > { %10042 = vst [vmem:[#allocation13_spill] sm:$0xff] %v8442_v36  ;;  %v3510_v41 = vadd.f32 %v3478_v13, %v3349_v40  ;;  %v3511_v42 = vadd.f32 %v3479_v4, %v3350_v55  ;;  %3769 = vperm.xlu0 %6446, %v8392_v30   ;;  %v3799_v13 = vmul.f32 %v5882_v56, %v8400_v8  ;;  %v5913_v4 = vld [vmem:[%s9931_s6 + $0x410] sm:$0xff]  ;;  %v5946_v8 = vld [vmem:[%s9931_s6 + $0x518] sm:$0xff]  ;;  %v5915_v56 = vld [vmem:[%s9931_s6 + $0x420] sm:$0xff] }
 0x569   : > { %v3273_v58 = vpop.permute.xlu1 %3272  ;;  %v8446_v29 = vadd.f32 %v3639_v33, %v3510_v41  ;;  %v8448_v28 = vadd.f32 %v3640_v61, %v3511_v42  ;;  %v5914_v33 = vld [vmem:[%s9931_s6 + $0x418] sm:$0xff]  ;;  %v5945_v42 = vld [vmem:[%s9931_s6 + $0x510] sm:$0xff] }
 0x56a   : > { %6417 = vset.pattern.permute.xlu2 %v9947_v49  ;;  %v3347_v16 = vmul.f32 %v3273_v58, %v3235_v20  ;;  %v3348_v46 = vmul.f32 %v3273_v58, %v3236_v32  ;;  %v3959_v58 = vmul.f32 %v5913_v4, %v8360_v26  ;;  %v3960_v20 = vmul.f32 %v5914_v33, %v8360_v26 }
 0x56b   : > { %6418 = vset.pattern.permute.xlu1 %v9939_v12  ;;  %3435 = vperm.xlu2 %6417, %v8310_v27   ;;  %v8453_v38 = vpop.permute.xlu2 %4063 }
 0x56c   : > { %3596 = vperm.xlu1 %6418, %v8310_v27   ;;  %v3508_v6 = vadd.f32 %v3476_v34, %v3347_v16  ;;  %v3509_v9 = vadd.f32 %v3477_v22, %v3348_v46 }
 0x56d   : > { %v3903_v26 = vpop.permute.xlu0 %3902 }
 0x56f   : > { %6453 = vset.pattern.permute.xlu0 %v9947_v49 }
 0x570   : > { %3451 = vperm.xlu0 %6453, %v8464_v47  }
 0x572   : > { %v3577_v21 = vpop.permute.xlu1 %3576 }
 0x573   : > { %v3637_v40 = vmul.f32 %v5849_v54, %v3577_v21  ;;  %v3638_v55 = vmul.f32 %v5850_v44, %v3577_v21  ;;  %6420 = vset.pattern.permute.xlu2 %v9945_v5  ;;  %v6598_v54 = vmov 8   ;;  %v5883_v21 = vld [vmem:[%s9931_s6 + $0x320] sm:$0xff] }
 0x574   : > { %6421 = vset.pattern.permute.xlu1 %v9944_v18  ;;  %3918 = vperm.xlu2 %6420, %v8310_v27   ;;  %v8491_v39 = vpop.permute.xlu2 %3745 }
 0x575   : > { %v3669_v0 = vadd.f32 %v3637_v40, %v3508_v6  ;;  %v3670_v11 = vadd.f32 %v3638_v55, %v3509_v9  ;;  %4079 = vperm.xlu1 %6421, %v8310_v27   ;;  %v5947_v55 = vld [vmem:[%s9931_s6 + $0x520] sm:$0xff] }
 0x577   : > { %v3830_v61 = vadd.f32 %v3798_v3, %v3669_v0  ;;  %v3831_v41 = vadd.f32 %v3799_v13, %v3670_v11  ;;  %v5948_v0 = vld [vmem:[%s9931_s6 + $0x528] sm:$0xff]  ;;  %v3961_v3 = vmul.f32 %v5915_v56, %v3903_v26 }
 0x578   : > { %6456 = vset.pattern.permute.xlu0 %v9945_v5 }
 0x579   : > { %3934 = vperm.xlu0 %6456, %v8464_v47   ;;  %v3991_v59 = vadd.f32 %v3959_v58, %v3830_v61  ;;  %v3992_v48 = vadd.f32 %v3960_v20, %v3831_v41  ;;  %v4122_v61 = vmul.f32 %v5947_v55, %v8453_v38  ;;  %v4123_v41 = vmul.f32 %v5948_v0, %v8453_v38  ;;  %v3239_v58 = vld [vmem:[%s9931_s6 + $0x30] sm:$0xff]  ;;  %v3283_v20 = vpop.permute.xlu0 %3282  ;;  %v5822_v38 = vld [vmem:[%s9931_s6 + $0x138] sm:$0xff] }
 0x57a   : > { %v5886_v55 = vld [vmem:[%s9931_s6 + $0x338] sm:$0xff] }
 0x57b   : > { %v4060_v32 = vpop.permute.xlu1 %4059 }
 0x57c   : > { %v4120_v16 = vmul.f32 %v5945_v42, %v4060_v32  ;;  %v4121_v46 = vmul.f32 %v5946_v8, %v4060_v32  ;;  %6424 = vset.pattern.permute.xlu2 %v6598_v54 }
 0x57d   : > { %6422 = vset.pattern.permute.xlu1 %v9940_v60  ;;  %4562 = vperm.xlu2 %6424, %v8310_v27   ;;  %v8515_v44 = vpop.permute.xlu2 %3427 }
 0x57e   : > { %v8517_v34 = vadd.f32 %v4120_v16, %v3991_v59  ;;  %v8519_v22 = vadd.f32 %v4121_v46, %v3992_v48  ;;  %4240 = vperm.xlu1 %6422, %v8310_v27   ;;  %v5916_v27 = vld [vmem:[%s9931_s6 + $0x428] sm:$0xff]  ;;  %v3351_v16 = vmul.f32 %v3283_v20, %v3239_v58 }
 0x57f   : > { %v3962_v13 = vmul.f32 %v5916_v27, %v3903_v26 }
 0x581   : > { %6457 = vset.pattern.permute.xlu0 %v9944_v18 }
 0x582   : > { %4095 = vperm.xlu0 %6457, %v8464_v47  }
 0x584   : > { %v3742_v6 = vpop.permute.xlu1 %3741 }
 0x585   : > { %v3800_v9 = vmul.f32 %v5883_v21, %v3742_v6  ;;  %v3801_v40 = vmul.f32 %v5884_v62, %v3742_v6  ;;  %6427 = vset.pattern.permute.xlu2 %v9939_v12  ;;  %v5853_v6 = vld [vmem:[%s9931_s6 + $0x230] sm:$0xff] }
 0x586   : > { %6425 = vset.pattern.permute.xlu1 %v10041_v52  ;;  %3600 = vperm.xlu2 %6427, %v8341_v35   ;;  %v8545_v11 = vpop.permute.xlu2 %3588 }
 0x587   : > { %v3832_v4 = vadd.f32 %v3800_v9, %v8446_v29  ;;  %v3833_v33 = vadd.f32 %v3801_v40, %v8448_v28  ;;  %3302 = vperm.xlu1 %6425, %v8341_v35   ;;  %v3240_v29 = vld [vmem:[%s9931_s6 + $0x38] sm:$0xff]  ;;  %v5821_v28 = vld [vmem:[%s9931_s6 + $0x130] sm:$0xff] }
 0x588   : > { %v3352_v46 = vmul.f32 %v3283_v20, %v3240_v29  ;;  %v5854_v9 = vld [vmem:[%s9931_s6 + $0x238] sm:$0xff]  ;;  %v5885_v40 = vld [vmem:[%s9931_s6 + $0x330] sm:$0xff] }
 0x589   : > { %v3993_v42 = vadd.f32 %v3961_v3, %v3832_v4  ;;  %v3994_v8 = vadd.f32 %v3962_v13, %v3833_v33  ;;  %v3802_v33 = vmul.f32 %v5885_v40, %v8491_v39  ;;  %v5917_v20 = vld [vmem:[%s9931_s6 + $0x430] sm:$0xff] }
 0x58a   : > { %6458 = vset.pattern.permute.xlu0 %v9940_v60 }
 0x58b   : > { %4256 = vperm.xlu0 %6458, %v8464_v47   ;;  %v8566_v32 = vadd.f32 %v4122_v61, %v3993_v42  ;;  %v8568_v59 = vadd.f32 %v4123_v41, %v3994_v8  ;;  %v3803_v61 = vmul.f32 %v5886_v55, %v8491_v39  ;;  %v8600_v8 = vmax.f32 %v8221_v50, %v8346_v24  ;;  %v5918_v39 = vld [vmem:[%s9931_s6 + $0x438] sm:$0xff] }
 0x58d   : > { %v3424_v48 = vpop.permute.xlu1 %3423 }
 0x58e   : > { %v3480_v26 = vmul.f32 %v5821_v28, %v3424_v48  ;;  %v3481_v21 = vmul.f32 %v5822_v38, %v3424_v48  ;;  %6430 = vset.pattern.permute.xlu2 %v9944_v18 }
 0x58f   : > { %6428 = vset.pattern.permute.xlu1 %v6591_v23  ;;  %4083 = vperm.xlu2 %6430, %v8341_v35   ;;  %v8573_v62 = vpop.permute.xlu2 %3910 }
 0x590   : > { %v3512_v56 = vadd.f32 %v3480_v26, %v3351_v16  ;;  %v3513_v27 = vadd.f32 %v3481_v21, %v3352_v46  ;;  %3761 = vperm.xlu1 %6428, %v8341_v35   ;;  %v8618_v46 = vmax.f32 %v8231_v53, %v8317_v57  ;;  %v4229_v26 = vpop.permute.xlu0 %4228  ;;  %v5949_v21 = vld [vmem:[%s9931_s6 + $0x530] sm:$0xff]  ;;  %v5982_v53 = vld [vmem:[%s9931_s6 + $0x638] sm:$0xff] }
 0x591   : > { %v4286_v55 = vmul.f32 %v5982_v53, %v4229_v26 }
 0x593   : > { %6459 = vset.pattern.permute.xlu0 %v9942_v14 }
 0x594   : > { %4417 = vperm.xlu0 %6459, %v8464_v47  }
 0x596   : > { %v3585_v0 = vpop.permute.xlu1 %3584 }
 0x597   : > { %v3641_v3 = vmul.f32 %v5853_v6, %v3585_v0  ;;  %v3642_v13 = vmul.f32 %v5854_v9, %v3585_v0  ;;  %6431 = vset.pattern.permute.xlu2 %v9940_v60 }
 0x598   : > { %6433 = vset.pattern.permute.xlu1 %v6598_v54  ;;  %4244 = vperm.xlu2 %6431, %v8341_v35   ;;  %v8593_v4 = vpop.permute.xlu2 %4071 }
 0x599   : > { %v3673_v41 = vadd.f32 %v3641_v3, %v3512_v56  ;;  %v3674_v42 = vadd.f32 %v3642_v13, %v3513_v27  ;;  %4566 = vperm.xlu1 %6433, %v8341_v35   ;;  %v5981_v56 = vld [vmem:[%s9931_s6 + $0x630] sm:$0xff] }
 0x59a   : > { %v4285_v40 = vmul.f32 %v5981_v56, %v4229_v26 }
 0x59b   : > { %v3834_v58 = vadd.f32 %v3802_v33, %v3673_v41  ;;  %v3835_v29 = vadd.f32 %v3803_v61, %v3674_v42  ;;  %v5823_v61 = vld [vmem:[%s9931_s6 + $0x140] sm:$0xff]  ;;  %v8647_v41 = vpop.permute.xlu0 %3592  ;;  %v5824_v42 = vld [vmem:[%s9931_s6 + $0x148] sm:$0xff] }
 0x59c   : > { %6462 = vset.pattern.permute.xlu0 %v9939_v12 }
 0x59d   : > { %3616 = vperm.xlu0 %6462, %v8600_v8  }
 0x59f   : > { %v3907_v28 = vpop.permute.xlu1 %3906 }
 0x5a0   : > { %v3963_v38 = vmul.f32 %v5917_v20, %v3907_v28  ;;  %v3964_v48 = vmul.f32 %v5918_v39, %v3907_v28  ;;  %6432 = vset.pattern.permute.xlu2 %v9942_v14  ;;  %v5855_v20 = vld [vmem:[%s9931_s6 + $0x240] sm:$0xff]  ;;  %v5856_v39 = vld [vmem:[%s9931_s6 + $0x248] sm:$0xff] }
 0x5a1   : > { %6435 = vset.pattern.permute.xlu1 %v9947_v49  ;;  %4405 = vperm.xlu2 %6432, %v8341_v35   ;;  %v8613_v50 = vpop.permute.xlu2 %4232  ;;  %v5950_v35 = vld [vmem:[%s9931_s6 + $0x538] sm:$0xff] }
 0x5a2   : > { %v3995_v24 = vadd.f32 %v3963_v38, %v3834_v58  ;;  %v3996_v16 = vadd.f32 %v3964_v48, %v3835_v29  ;;  %3443 = vperm.xlu1 %6435, %v8364_v7   ;;  %v3241_v58 = vld [vmem:[%s9931_s6 + $0x40] sm:$0xff]  ;;  %v3242_v29 = vld [vmem:[%s9931_s6 + $0x48] sm:$0xff]  ;;  %v3482_v38 = vmul.f32 %v5823_v61, %v8515_v44  ;;  %v3483_v48 = vmul.f32 %v5824_v42, %v8515_v44 }
 0x5a3   : > { %v5951_v42 = vld [vmem:[%s9931_s6 + $0x540] sm:$0xff] }
 0x5a5   : > { %6469 = vset.pattern.permute.xlu0 %v10041_v52 }
 0x5a6   : > { %3327 = vperm.xlu0 %6469, %v8618_v46  }
 0x5a8   : > { %v4068_v57 = vpop.permute.xlu1 %4067 }
 0x5a9   : > { %v4124_v27 = vmul.f32 %v5949_v21, %v4068_v57  ;;  %v4125_v6 = vmul.f32 %v5950_v35, %v4068_v57  ;;  %6434 = vset.pattern.permute.xlu2 %v10041_v52  ;;  %v3643_v21 = vmul.f32 %v5855_v20, %v8545_v11  ;;  %v3644_v35 = vmul.f32 %v5856_v39, %v8545_v11  ;;  %v5888_v11 = vld [vmem:[%s9931_s6 + $0x348] sm:$0xff] }
 0x5aa   : > { %6438 = vset.pattern.permute.xlu1 %v9945_v5  ;;  %3307 = vperm.xlu2 %6434, %v8364_v7   ;;  %v8637_v9 = vpop.permute.xlu2 %3292 }
 0x5ab   : > { %v4156_v0 = vadd.f32 %v4124_v27, %v3995_v24  ;;  %v4157_v3 = vadd.f32 %v4125_v6, %v3996_v16  ;;  %3926 = vperm.xlu1 %6438, %v8364_v7   ;;  %v8677_v27 = vpop.permute.xlu0 %4075  ;;  %v5887_v6 = vld [vmem:[%s9931_s6 + $0x340] sm:$0xff] }
 0x5ad   : > { %v8640_v13 = vadd.f32 %v4285_v40, %v4156_v0  ;;  %v8642_v33 = vadd.f32 %v4286_v55, %v4157_v3  ;;  %v5919_v40 = vld [vmem:[%s9931_s6 + $0x440] sm:$0xff]  ;;  %v5920_v55 = vld [vmem:[%s9931_s6 + $0x448] sm:$0xff] }
 0x5ae   : > { %6472 = vset.pattern.permute.xlu0 %v6591_v23  ;;  %v3965_v20 = vmul.f32 %v5919_v40, %v8573_v62  ;;  %v3966_v39 = vmul.f32 %v5920_v55, %v8573_v62  ;;  %v3245_v55 = vld [vmem:[%s9931_s6 + $0x60] sm:$0xff] }
 0x5af   : > { %3781 = vperm.xlu0 %6472, %v8618_v46  }
 0x5b1   : > { %v3288_v28 = vpop.permute.xlu1 %3287 }
 0x5b2   : > { %v3353_v24 = vmul.f32 %v3288_v28, %v3241_v58  ;;  %v3354_v16 = vmul.f32 %v3288_v28, %v3242_v29  ;;  %6437 = vset.pattern.permute.xlu2 %v6591_v23  ;;  %v5952_v58 = vld [vmem:[%s9931_s6 + $0x548] sm:$0xff] }
 0x5b3   : > { %6439 = vset.pattern.permute.xlu1 %v9944_v18  ;;  %3765 = vperm.xlu2 %6437, %v8364_v7   ;;  %v8671_v26 = vpop.permute.xlu2 %3753  ;;  %v4127_v62 = vmul.f32 %v5952_v58, %v8593_v4  ;;  %v5827_v58 = vld [vmem:[%s9931_s6 + $0x160] sm:$0xff] }
 0x5b4   : > { %v3514_v56 = vadd.f32 %v3482_v38, %v3353_v24  ;;  %v3515_v53 = vadd.f32 %v3483_v48, %v3354_v16  ;;  %4087 = vperm.xlu1 %6439, %v8364_v7   ;;  %v8708_v48 = vmax.f32 %v8215_v15, %v8327_v10  ;;  %v5983_v24 = vld [vmem:[%s9931_s6 + $0x640] sm:$0xff]  ;;  %v5984_v16 = vld [vmem:[%s9931_s6 + $0x648] sm:$0xff]  ;;  %v3243_v15 = vld [vmem:[%s9931_s6 + $0x50] sm:$0xff] }
 0x5b5   : > { %v4287_v10 = vmul.f32 %v5983_v24, %v8613_v50 }
 0x5b6   : > { %v3675_v57 = vadd.f32 %v3643_v21, %v3514_v56  ;;  %v3676_v44 = vadd.f32 %v3644_v35, %v3515_v53  ;;  %v4126_v21 = vmul.f32 %v5951_v42, %v8593_v4  ;;  %v5857_v53 = vld [vmem:[%s9931_s6 + $0x250] sm:$0xff]  ;;  %v3244_v4 = vld [vmem:[%s9931_s6 + $0x58] sm:$0xff] }
 0x5b7   : > { %6474 = vset.pattern.permute.xlu0 %v9944_v18  ;;  %v3356_v24 = vmul.f32 %v8637_v9, %v3244_v4 }
 0x5b8   : > { %4103 = vperm.xlu0 %6474, %v8618_v46  }
 0x5ba   : > { %v3750_v0 = vpop.permute.xlu1 %3749 }
 0x5bb   : > { %v3804_v3 = vmul.f32 %v5887_v6, %v3750_v0  ;;  %v3805_v61 = vmul.f32 %v5888_v11, %v3750_v0  ;;  %6444 = vset.pattern.permute.xlu2 %v9947_v49  ;;  %v5826_v6 = vld [vmem:[%s9931_s6 + $0x158] sm:$0xff]  ;;  %v3246_v0 = vld [vmem:[%s9931_s6 + $0x68] sm:$0xff] }
 0x5bc   : > { %6440 = vset.pattern.permute.xlu1 %v9940_v60  ;;  %3447 = vperm.xlu2 %6444, %v8392_v30   ;;  %v8701_v29 = vpop.permute.xlu2 %4236 }
 0x5bd   : > { %v3836_v28 = vadd.f32 %v3804_v3, %v3675_v57  ;;  %v3837_v38 = vadd.f32 %v3805_v61, %v3676_v44  ;;  %4248 = vperm.xlu1 %6440, %v8364_v7   ;;  %v4288_v57 = vmul.f32 %v5984_v16, %v8613_v50  ;;  %v5825_v44 = vld [vmem:[%s9931_s6 + $0x150] sm:$0xff]  ;;  %v5858_v50 = vld [vmem:[%s9931_s6 + $0x258] sm:$0xff]  ;;  %v3298_v3 = vpop.permute.xlu0 %3297  ;;  %v3645_v61 = vmul.f32 %v5857_v53, %v8647_v41 }
 0x5be   : > { %v5889_v16 = vld [vmem:[%s9931_s6 + $0x350] sm:$0xff]  ;;  %v3357_v53 = vmul.f32 %v3298_v3, %v3245_v55 }
 0x5bf   : > { %v3997_v35 = vadd.f32 %v3965_v20, %v3836_v28  ;;  %v3998_v56 = vadd.f32 %v3966_v39, %v3837_v38  ;;  %v5828_v20 = vld [vmem:[%s9931_s6 + $0x168] sm:$0xff]  ;;  %v3355_v38 = vmul.f32 %v8637_v9, %v3243_v15  ;;  %v5921_v55 = vld [vmem:[%s9931_s6 + $0x450] sm:$0xff] }
 0x5c0   : > { %6479 = vset.pattern.permute.xlu0 %v9947_v49 }
 0x5c1   : > { %3463 = vperm.xlu0 %6479, %v8708_v48   ;;  %v4158_v11 = vadd.f32 %v4126_v21, %v3997_v35  ;;  %v4159_v40 = vadd.f32 %v4127_v62, %v3998_v56  ;;  %v5890_v21 = vld [vmem:[%s9931_s6 + $0x358] sm:$0xff]  ;;  %v3646_v56 = vmul.f32 %v5858_v50, %v8647_v41 }
 0x5c3   : > { %v3432_v42 = vpop.permute.xlu1 %3431  ;;  %v8753_v39 = vadd.f32 %v4287_v10, %v4158_v11  ;;  %v8755_v28 = vadd.f32 %v4288_v57, %v4159_v40  ;;  %v3358_v10 = vmul.f32 %v3298_v3, %v3246_v0  ;;  %v5922_v0 = vld [vmem:[%s9931_s6 + $0x458] sm:$0xff] }
 0x5c4   : > { %v3484_v62 = vmul.f32 %v5825_v44, %v3432_v42  ;;  %v3485_v35 = vmul.f32 %v5826_v6, %v3432_v42  ;;  %6447 = vset.pattern.permute.xlu2 %v9945_v5  ;;  %v3806_v44 = vmul.f32 %v5889_v16, %v8671_v26  ;;  %v3807_v6 = vmul.f32 %v5890_v21, %v8671_v26  ;;  %v5985_v16 = vld [vmem:[%s9931_s6 + $0x650] sm:$0xff]  ;;  %v5986_v21 = vld [vmem:[%s9931_s6 + $0x658] sm:$0xff] }
 0x5c5   : > { %6441 = vset.pattern.permute.xlu1 %v9942_v14  ;;  %3930 = vperm.xlu2 %6447, %v8392_v30   ;;  %v3436_v9 = vpop.permute.xlu2 %3435 }
 0x5c6   : > { %v3516_v15 = vadd.f32 %v3484_v62, %v3355_v38  ;;  %v3517_v57 = vadd.f32 %v3485_v35, %v3356_v24  ;;  %v3486_v4 = vmul.f32 %v5827_v58, %v3436_v9  ;;  %v3487_v11 = vmul.f32 %v5828_v20, %v3436_v9  ;;  %4409 = vperm.xlu1 %6441, %v8364_v7   ;;  %v5954_v58 = vld [vmem:[%s9931_s6 + $0x558] sm:$0xff] }
 0x5c7   : > { %v4289_v9 = vmul.f32 %v5985_v16, %v8701_v29  ;;  %v5923_v16 = vld [vmem:[%s9931_s6 + $0x460] sm:$0xff] }
 0x5c8   : > { %v3677_v40 = vadd.f32 %v3645_v61, %v3516_v15  ;;  %v3678_v42 = vadd.f32 %v3646_v56, %v3517_v57  ;;  %v8772_v41 = vadd.f32 %v3486_v4, %v3357_v53  ;;  %v8774_v50 = vadd.f32 %v3487_v11, %v3358_v10  ;;  %v5953_v61 = vld [vmem:[%s9931_s6 + $0x550] sm:$0xff] }
 0x5c9   : > { %6482 = vset.pattern.permute.xlu0 %v9945_v5  ;;  %v4128_v35 = vmul.f32 %v5953_v61, %v8677_v27  ;;  %v4129_v56 = vmul.f32 %v5954_v58, %v8677_v27  ;;  %v4290_v15 = vmul.f32 %v5986_v21, %v8701_v29  ;;  %v6017_v11 = vld [vmem:[%s9931_s6 + $0x750] sm:$0xff]  ;;  %v6018_v27 = vld [vmem:[%s9931_s6 + $0x758] sm:$0xff]  ;;  %v5860_v61 = vld [vmem:[%s9931_s6 + $0x268] sm:$0xff] }
 0x5ca   : > { %3946 = vperm.xlu0 %6482, %v8708_v48   ;;  %v3838_v3 = vadd.f32 %v3806_v44, %v3677_v40  ;;  %v3839_v26 = vadd.f32 %v3807_v6, %v3678_v42  ;;  %v5891_v58 = vld [vmem:[%s9931_s6 + $0x360] sm:$0xff]  ;;  %v5924_v21 = vld [vmem:[%s9931_s6 + $0x468] sm:$0xff] }
 0x5cc   : > { %v3915_v20 = vpop.permute.xlu1 %3914 }
 0x5cd   : > { %v3967_v38 = vmul.f32 %v5921_v55, %v3915_v20  ;;  %v3968_v24 = vmul.f32 %v5922_v0, %v3915_v20  ;;  %6448 = vset.pattern.permute.xlu2 %v9944_v18 }
 0x5ce   : > { %6442 = vset.pattern.permute.xlu1 %v6598_v54  ;;  %4091 = vperm.xlu2 %6448, %v8392_v30   ;;  %v3919_v62 = vpop.permute.xlu2 %3918 }
 0x5cf   : > { %v3999_v53 = vadd.f32 %v3967_v38, %v3838_v3  ;;  %v4000_v10 = vadd.f32 %v3968_v24, %v3839_v26  ;;  %4570 = vperm.xlu1 %6442, %v8364_v7   ;;  %v8824_v3 = vmax.f32 %v8240_v2, %v8355_v63  ;;  %v5859_v26 = vld [vmem:[%s9931_s6 + $0x260] sm:$0xff]  ;;  %v5892_v2 = vld [vmem:[%s9931_s6 + $0x368] sm:$0xff]  ;;  %v3758_v63 = vpop.permute.xlu0 %3757 }
 0x5d1   : > { %v4160_v57 = vadd.f32 %v4128_v35, %v3999_v53  ;;  %v4161_v4 = vadd.f32 %v4129_v56, %v4000_v10  ;;  %v3808_v56 = vmul.f32 %v5891_v58, %v3758_v63  ;;  %v3809_v53 = vmul.f32 %v5892_v2, %v3758_v63  ;;  %v5988_v58 = vld [vmem:[%s9931_s6 + $0x668] sm:$0xff] }
 0x5d2   : > { %6483 = vset.pattern.permute.xlu0 %v9944_v18  ;;  %v6020_v2 = vld [vmem:[%s9931_s6 + $0x768] sm:$0xff] }
 0x5d3   : > { %4107 = vperm.xlu0 %6483, %v8708_v48   ;;  %v4321_v44 = vadd.f32 %v4289_v9, %v4160_v57  ;;  %v4322_v7 = vadd.f32 %v4290_v15, %v4161_v4  ;;  %v8856_v15 = vmax.f32 %v8247_v51, %v8338_v17  ;;  %v3969_v57 = vmul.f32 %v5923_v16, %v3919_v62  ;;  %v6052_v16 = vld [vmem:[%s9931_s6 + $0x868] sm:$0xff] }
 0x5d4   : > { %v3970_v4 = vmul.f32 %v5924_v21, %v3919_v62 }
 0x5d5   : > { %v4398_v6 = vpop.permute.xlu1 %4397 }
 0x5d6   : > { %v4450_v40 = vmul.f32 %v6017_v11, %v4398_v6  ;;  %v4451_v42 = vmul.f32 %v6018_v27, %v4398_v6  ;;  %6449 = vset.pattern.permute.xlu2 %v9940_v60 }
 0x5d7   : > { %6445 = vset.pattern.permute.xlu1 %v9939_v12  ;;  %4252 = vperm.xlu2 %6449, %v8392_v30   ;;  %v8815_v29 = vpop.permute.xlu2 %4562 }
 0x5d8   : > { %v8817_v55 = vadd.f32 %v4450_v40, %v4321_v44  ;;  %v8819_v0 = vadd.f32 %v4451_v42, %v4322_v7  ;;  %3608 = vperm.xlu1 %6445, %v8392_v30   ;;  %v4402_v40 = vpop.permute.xlu0 %4401 }
 0x5db   : > { %6489 = vset.pattern.permute.xlu0 %v9939_v12 }
 0x5dc   : > { %3628 = vperm.xlu0 %6489, %v8824_v3  }
 0x5de   : > { %v3597_v20 = vpop.permute.xlu1 %3596 }
 0x5df   : > { %v3647_v38 = vmul.f32 %v5859_v26, %v3597_v20  ;;  %v3648_v24 = vmul.f32 %v5860_v61, %v3597_v20  ;;  %6450 = vset.pattern.permute.xlu2 %v9942_v14  ;;  %v5987_v61 = vld [vmem:[%s9931_s6 + $0x660] sm:$0xff] }
 0x5e0   : > { %6452 = vset.pattern.permute.xlu1 %v10041_v52  ;;  %4413 = vperm.xlu2 %6450, %v8392_v30   ;;  %v8849_v35 = vpop.permute.xlu2 %3600 }
 0x5e1   : > { %v3679_v10 = vadd.f32 %v3647_v38, %v8772_v41  ;;  %v3680_v9 = vadd.f32 %v3648_v24, %v8774_v50  ;;  %3317 = vperm.xlu1 %6452, %v8464_v47   ;;  %v5955_v41 = vld [vmem:[%s9931_s6 + $0x560] sm:$0xff]  ;;  %v5956_v50 = vld [vmem:[%s9931_s6 + $0x568] sm:$0xff] }
 0x5e2   : > { %v6051_v24 = vld [vmem:[%s9931_s6 + $0x860] sm:$0xff] }
 0x5e3   : > { %v3840_v11 = vadd.f32 %v3808_v56, %v3679_v10  ;;  %v3841_v27 = vadd.f32 %v3809_v53, %v3680_v9  ;;  %v4453_v53 = vmul.f32 %v6020_v2, %v4402_v40 }
 0x5e4   : > { %6496 = vset.pattern.permute.xlu0 %v10041_v52 }
 0x5e5   : > { %3342 = vperm.xlu0 %6496, %v8856_v15   ;;  %v4001_v44 = vadd.f32 %v3969_v57, %v3840_v11  ;;  %v4002_v7 = vadd.f32 %v3970_v4, %v3841_v27  ;;  %v3440_v57 = vpop.permute.xlu0 %3439  ;;  %v4613_v4 = vmul.f32 %v6051_v24, %v8815_v29  ;;  %v4614_v11 = vmul.f32 %v6052_v16, %v8815_v29  ;;  %v3248_v29 = vld [vmem:[%s9931_s6 + $0x78] sm:$0xff] }
 0x5e7   : > { %v4080_v51 = vpop.permute.xlu1 %4079 }
 0x5e8   : > { %v4130_v17 = vmul.f32 %v5955_v41, %v4080_v51  ;;  %v4131_v6 = vmul.f32 %v5956_v50, %v4080_v51  ;;  %6451 = vset.pattern.permute.xlu2 %v6598_v54  ;;  %v5829_v50 = vld [vmem:[%s9931_s6 + $0x170] sm:$0xff] }
 0x5e9   : > { %6455 = vset.pattern.permute.xlu1 %v6591_v23  ;;  %4574 = vperm.xlu2 %6451, %v8392_v30   ;;  %v8869_v62 = vpop.permute.xlu2 %4083  ;;  %v6019_v30 = vld [vmem:[%s9931_s6 + $0x760] sm:$0xff] }
 0x5ea   : > { %v4162_v42 = vadd.f32 %v4130_v17, %v4001_v44  ;;  %v4163_v26 = vadd.f32 %v4131_v6, %v4002_v7  ;;  %3773 = vperm.xlu1 %6455, %v8464_v47   ;;  %v4452_v56 = vmul.f32 %v6019_v30, %v4402_v40  ;;  %v5830_v44 = vld [vmem:[%s9931_s6 + $0x178] sm:$0xff]  ;;  %v3247_v7 = vld [vmem:[%s9931_s6 + $0x70] sm:$0xff] }
 0x5eb   : > { %v5861_v6 = vld [vmem:[%s9931_s6 + $0x270] sm:$0xff]  ;;  %v5862_v40 = vld [vmem:[%s9931_s6 + $0x278] sm:$0xff] }
 0x5ed   : > { %6499 = vset.pattern.permute.xlu0 %v6591_v23  ;;  %v3923_v16 = vpop.permute.xlu0 %3922 }
 0x5ee   : > { %3793 = vperm.xlu0 %6499, %v8856_v15  }
 0x5f0   : > { %v4241_v63 = vpop.permute.xlu1 %4240 }
 0x5f1   : > { %v4291_v20 = vmul.f32 %v5987_v61, %v4241_v63  ;;  %v4292_v38 = vmul.f32 %v5988_v58, %v4241_v63  ;;  %6454 = vset.pattern.permute.xlu2 %v9939_v12  ;;  %v3489_v61 = vmul.f32 %v5830_v44, %v3440_v57  ;;  %v3649_v63 = vmul.f32 %v5861_v6, %v8849_v35 }
 0x5f2   : > { %6461 = vset.pattern.permute.xlu1 %v9947_v49  ;;  %3612 = vperm.xlu2 %6454, %v8464_v47   ;;  %v8895_v21 = vpop.permute.xlu2 %4244 }
 0x5f3   : > { %v4323_v10 = vadd.f32 %v4291_v20, %v4162_v42  ;;  %v4324_v9 = vadd.f32 %v4292_v38, %v4163_v26  ;;  %3455 = vperm.xlu1 %6461, %v8600_v8   ;;  %v3488_v26 = vmul.f32 %v5829_v50, %v3440_v57  ;;  %v3650_v20 = vmul.f32 %v5862_v40, %v8849_v35  ;;  %v5925_v35 = vld [vmem:[%s9931_s6 + $0x470] sm:$0xff]  ;;  %v5926_v57 = vld [vmem:[%s9931_s6 + $0x478] sm:$0xff] }
 0x5f4   : > { %v5958_v50 = vld [vmem:[%s9931_s6 + $0x578] sm:$0xff] }
 0x5f5   : > { %v4484_v27 = vadd.f32 %v4452_v56, %v4323_v10  ;;  %v4485_v41 = vadd.f32 %v4453_v53, %v4324_v9  ;;  %v5893_v10 = vld [vmem:[%s9931_s6 + $0x370] sm:$0xff]  ;;  %v5894_v9 = vld [vmem:[%s9931_s6 + $0x378] sm:$0xff] }
 0x5f6   : > { %6501 = vset.pattern.permute.xlu0 %v9944_v18 }
 0x5f7   : > { %4115 = vperm.xlu0 %6501, %v8856_v15   ;;  %v8914_v51 = vadd.f32 %v4613_v4, %v4484_v27  ;;  %v8916_v17 = vadd.f32 %v4614_v11, %v4485_v41  ;;  %v5957_v41 = vld [vmem:[%s9931_s6 + $0x570] sm:$0xff] }
 0x5f9   : > { %v3303_v42 = vpop.permute.xlu1 %3302 }
 0x5fa   : > { %v3359_v58 = vmul.f32 %v3303_v42, %v3247_v7  ;;  %v3360_v30 = vmul.f32 %v3303_v42, %v3248_v29  ;;  %6460 = vset.pattern.permute.xlu2 %v10041_v52  ;;  %v3971_v7 = vmul.f32 %v5925_v35, %v3923_v16  ;;  %v3972_v29 = vmul.f32 %v5926_v57, %v3923_v16  ;;  %v5989_v42 = vld [vmem:[%s9931_s6 + $0x670] sm:$0xff] }
 0x5fb   : > { %6464 = vset.pattern.permute.xlu1 %v9945_v5  ;;  %3322 = vperm.xlu2 %6460, %v8600_v8   ;;  %v4406_v2 = vpop.permute.xlu2 %4405  ;;  %v4293_v16 = vmul.f32 %v5989_v42, %v8895_v21 }
 0x5fc   : > { %v3520_v38 = vadd.f32 %v3488_v26, %v3359_v58  ;;  %v3521_v24 = vadd.f32 %v3489_v61, %v3360_v30  ;;  %3938 = vperm.xlu1 %6464, %v8600_v8   ;;  %v5990_v26 = vld [vmem:[%s9931_s6 + $0x678] sm:$0xff]  ;;  %v4132_v61 = vmul.f32 %v5957_v41, %v8869_v62  ;;  %v4133_v58 = vmul.f32 %v5958_v50, %v8869_v62  ;;  %v6053_v62 = vld [vmem:[%s9931_s6 + $0x870] sm:$0xff] }
 0x5fe   : > { %v3681_v56 = vadd.f32 %v3649_v63, %v3520_v38  ;;  %v3682_v53 = vadd.f32 %v3650_v20, %v3521_v24  ;;  %v3605_v20 = vpop.permute.xlu0 %3604  ;;  %v6021_v38 = vld [vmem:[%s9931_s6 + $0x770] sm:$0xff]  ;;  %v6022_v24 = vld [vmem:[%s9931_s6 + $0x778] sm:$0xff] }
 0x5ff   : > { %6504 = vset.pattern.permute.xlu0 %v6598_v54  ;;  %v4454_v35 = vmul.f32 %v6021_v38, %v4406_v2  ;;  %v4455_v57 = vmul.f32 %v6022_v24, %v4406_v2  ;;  %v5863_v2 = vld [vmem:[%s9931_s6 + $0x280] sm:$0xff]  ;;  %v3252_v38 = vld [vmem:[%s9931_s6 + $0x98] sm:$0xff] }
 0x600   : > { %4598 = vperm.xlu0 %6504, %v8856_v15   ;;  %v3651_v24 = vmul.f32 %v5863_v2, %v3605_v20 }
 0x602   : > { %v3762_v4 = vpop.permute.xlu1 %3761 }
 0x603   : > { %v3810_v11 = vmul.f32 %v5893_v10, %v3762_v4  ;;  %v3811_v27 = vmul.f32 %v5894_v9, %v3762_v4  ;;  %6463 = vset.pattern.permute.xlu2 %v6591_v23  ;;  %v6054_v9 = vld [vmem:[%s9931_s6 + $0x878] sm:$0xff] }
 0x604   : > { %6465 = vset.pattern.permute.xlu1 %v9944_v18  ;;  %3777 = vperm.xlu2 %6463, %v8600_v8   ;;  %v3308_v44 = vpop.permute.xlu2 %3307 }
 0x605   : > { %v3842_v6 = vadd.f32 %v3810_v11, %v3681_v56  ;;  %v3843_v40 = vadd.f32 %v3811_v27, %v3682_v53  ;;  %4099 = vperm.xlu1 %6465, %v8600_v8   ;;  %v4294_v56 = vmul.f32 %v5990_v26, %v8895_v21  ;;  %v3250_v26 = vld [vmem:[%s9931_s6 + $0x88] sm:$0xff] }
 0x606   : > { %v3313_v42 = vpop.permute.xlu0 %3312 }
 0x607   : > { %v4003_v30 = vadd.f32 %v3971_v7, %v3842_v6  ;;  %v4004_v63 = vadd.f32 %v3972_v29, %v3843_v40  ;;  %v3249_v40 = vld [vmem:[%s9931_s6 + $0x80] sm:$0xff] }
 0x608   : > { %4578 = vperm.xlu0 %6504, %v8464_v47  }
 0x609   : > { %v4164_v53 = vadd.f32 %v4132_v61, %v4003_v30  ;;  %v4165_v10 = vadd.f32 %v4133_v58, %v4004_v63  ;;  %v5831_v61 = vld [vmem:[%s9931_s6 + $0x180] sm:$0xff]  ;;  %v5832_v58 = vld [vmem:[%s9931_s6 + $0x188] sm:$0xff]  ;;  %v3251_v63 = vld [vmem:[%s9931_s6 + $0x90] sm:$0xff] }
 0x60a   : > { %v5864_v30 = vld [vmem:[%s9931_s6 + $0x288] sm:$0xff] }
 0x60b   : > { %v4567_v4 = vpop.permute.xlu1 %4566  ;;  %v4325_v11 = vadd.f32 %v4293_v16, %v4164_v53  ;;  %v4326_v27 = vadd.f32 %v4294_v56, %v4165_v10  ;;  %v5833_v56 = vld [vmem:[%s9931_s6 + $0x190] sm:$0xff]  ;;  %v5834_v53 = vld [vmem:[%s9931_s6 + $0x198] sm:$0xff]  ;;  %v3361_v10 = vmul.f32 %v3308_v44, %v3249_v40 }
 0x60c   : > { %v4615_v47 = vmul.f32 %v6053_v62, %v4567_v4  ;;  %v4616_v41 = vmul.f32 %v6054_v9, %v4567_v4  ;;  %6470 = vset.pattern.permute.xlu2 %v9947_v49  ;;  %v3362_v62 = vmul.f32 %v3308_v44, %v3250_v26  ;;  %v5895_v9 = vld [vmem:[%s9931_s6 + $0x380] sm:$0xff] }
 0x60d   : > { %v4486_v21 = vadd.f32 %v4454_v35, %v4325_v11  ;;  %v4487_v50 = vadd.f32 %v4455_v57, %v4326_v27  ;;  %6466 = vset.pattern.permute.xlu1 %v9940_v60  ;;  %3459 = vperm.xlu2 %6470, %v8618_v46   ;;  %v3766_v7 = vpop.permute.xlu2 %3765  ;;  %v5896_v35 = vld [vmem:[%s9931_s6 + $0x388] sm:$0xff]  ;;  %v3652_v11 = vmul.f32 %v5864_v30, %v3605_v20  ;;  %v5927_v30 = vld [vmem:[%s9931_s6 + $0x480] sm:$0xff] }
 0x60e   : > { %4260 = vperm.xlu1 %6466, %v8600_v8   ;;  %v3363_v27 = vmul.f32 %v3313_v42, %v3251_v63  ;;  %v3812_v40 = vmul.f32 %v5895_v9, %v3766_v7  ;;  %v3813_v26 = vmul.f32 %v5896_v35, %v3766_v7  ;;  %v5928_v63 = vld [vmem:[%s9931_s6 + $0x488] sm:$0xff]  ;;  %v5959_v35 = vld [vmem:[%s9931_s6 + $0x580] sm:$0xff] }
 0x60f   : > { %v8981_v29 = vadd.f32 %v4615_v47, %v4486_v21  ;;  %v8983_v6 = vadd.f32 %v4616_v41, %v4487_v50  ;;  %v3364_v47 = vmul.f32 %v3313_v42, %v3252_v38 }
 0x610   : > { %4554 = vperm.xlu0 %6504, %v8301_v25  }
 0x614   : > { %v3444_v16 = vpop.permute.xlu1 %3443 }
 0x615   : > { %v3490_v57 = vmul.f32 %v5831_v61, %v3444_v16  ;;  %v3491_v4 = vmul.f32 %v5832_v58, %v3444_v16  ;;  %6473 = vset.pattern.permute.xlu2 %v9945_v5  ;;  %v9038_v16 = vpop.permute.xlu0 %3769 }
 0x616   : > { %6467 = vset.pattern.permute.xlu1 %v9942_v14  ;;  %3942 = vperm.xlu2 %6473, %v8618_v46   ;;  %v3448_v44 = vpop.permute.xlu2 %3447 }
 0x617   : > { %v3522_v41 = vadd.f32 %v3490_v57, %v3361_v10  ;;  %v3523_v21 = vadd.f32 %v3491_v4, %v3362_v62  ;;  %v3492_v50 = vmul.f32 %v5833_v56, %v3448_v44  ;;  %v3493_v2 = vmul.f32 %v5834_v53, %v3448_v44  ;;  %4421 = vperm.xlu1 %6467, %v8600_v8   ;;  %v5960_v57 = vld [vmem:[%s9931_s6 + $0x588] sm:$0xff] }
 0x618   : > { %6511 = vset.pattern.permute.xlu0 %v9942_v14 }
 0x619   : > { %v3683_v61 = vadd.f32 %v3651_v24, %v3522_v41  ;;  %v3684_v58 = vadd.f32 %v3652_v11, %v3523_v21  ;;  %v9027_v20 = vadd.f32 %v3492_v50, %v3363_v27  ;;  %v9029_v42 = vadd.f32 %v3493_v2, %v3364_v47  ;;  %4381 = vperm.xlu0 %6511, %v8249_v1   ;;  %v5991_v21 = vld [vmem:[%s9931_s6 + $0x680] sm:$0xff]  ;;  %v5992_v50 = vld [vmem:[%s9931_s6 + $0x688] sm:$0xff] }
 0x61b   : > { %v3844_v38 = vadd.f32 %v3812_v40, %v3683_v61  ;;  %v3845_v7 = vadd.f32 %v3813_v26, %v3684_v58 }
 0x61d   : > { %v3927_v24 = vpop.permute.xlu1 %3926  ;;  %v9053_v4 = vpop.permute.xlu0 %3451 }
 0x61e   : > { %v3973_v56 = vmul.f32 %v5927_v30, %v3927_v24  ;;  %v3974_v53 = vmul.f32 %v5928_v63, %v3927_v24  ;;  %6475 = vset.pattern.permute.xlu2 %v9940_v60 }
 0x61f   : > { %6468 = vset.pattern.permute.xlu1 %v6598_v54  ;;  %4264 = vperm.xlu2 %6475, %v8618_v46   ;;  %v9043_v10 = vpop.permute.xlu2 %3930 }
 0x620   : > { %v4005_v62 = vadd.f32 %v3973_v56, %v3844_v38  ;;  %v4006_v9 = vadd.f32 %v3974_v53, %v3845_v7  ;;  %4582 = vperm.xlu1 %6468, %v8600_v8   ;;  %v6023_v38 = vld [vmem:[%s9931_s6 + $0x780] sm:$0xff]  ;;  %v6024_v7 = vld [vmem:[%s9931_s6 + $0x788] sm:$0xff] }
 0x621   : > { %6514 = vset.pattern.permute.xlu0 %v6598_v54 }
 0x625   : > { %v9067_v40 = vpop.permute.xlu0 %3934 }
 0x626   : > { %v4088_v11 = vpop.permute.xlu1 %4087 }
 0x627   : > { %v4134_v27 = vmul.f32 %v5959_v35, %v4088_v11  ;;  %v4135_v47 = vmul.f32 %v5960_v57, %v4088_v11  ;;  %6476 = vset.pattern.permute.xlu2 %v9942_v14  ;;  %v6055_v57 = vld [vmem:[%s9931_s6 + $0x880] sm:$0xff]  ;;  %v6056_v11 = vld [vmem:[%s9931_s6 + $0x888] sm:$0xff] }
 0x628   : > { %6471 = vset.pattern.permute.xlu1 %v9939_v12  ;;  %4425 = vperm.xlu2 %6476, %v8618_v46   ;;  %v9058_v8 = vpop.permute.xlu2 %4091 }
 0x629   : > { %v4166_v44 = vadd.f32 %v4134_v27, %v4005_v62  ;;  %v4167_v41 = vadd.f32 %v4135_v47, %v4006_v9  ;;  %3620 = vperm.xlu1 %6471, %v8618_v46  }
 0x62f   : > { %v4249_v2 = vpop.permute.xlu1 %4248 }
 0x630   : > { %v4295_v26 = vmul.f32 %v5991_v21, %v4249_v2  ;;  %v4296_v61 = vmul.f32 %v5992_v50, %v4249_v2  ;;  %6477 = vset.pattern.permute.xlu2 %v6598_v54 }
 0x631   : > { %6478 = vset.pattern.permute.xlu1 %v10041_v52  ;;  %4586 = vperm.xlu2 %6477, %v8618_v46   ;;  %v9072_v58 = vpop.permute.xlu2 %4252  ;;  %v9082_v46 = vpop.permute.xlu0 %4095 }
 0x632   : > { %v4327_v30 = vadd.f32 %v4295_v26, %v4166_v44  ;;  %v4328_v63 = vadd.f32 %v4296_v61, %v4167_v41  ;;  %3332 = vperm.xlu1 %6478, %v8708_v48   ;;  %v5865_v26 = vld [vmem:[%s9931_s6 + $0x290] sm:$0xff] }
 0x633   : > { %v5897_v61 = vld [vmem:[%s9931_s6 + $0x390] sm:$0xff] }
 0x638   : > { %v4410_v24 = vpop.permute.xlu1 %4409 }
 0x639   : > { %v4456_v56 = vmul.f32 %v6023_v38, %v4410_v24  ;;  %v4457_v53 = vmul.f32 %v6024_v7, %v4410_v24  ;;  %6480 = vset.pattern.permute.xlu2 %v9939_v12  ;;  %v9100_v21 = vpop.permute.xlu0 %4256  ;;  %v5929_v24 = vld [vmem:[%s9931_s6 + $0x490] sm:$0xff] }
 0x63a   : > { %6481 = vset.pattern.permute.xlu1 %v6591_v23  ;;  %3624 = vperm.xlu2 %6480, %v8708_v48   ;;  %v9086_v62 = vpop.permute.xlu2 %4413 }
 0x63b   : > { %v4488_v9 = vadd.f32 %v4456_v56, %v4327_v30  ;;  %v4489_v35 = vadd.f32 %v4457_v53, %v4328_v63  ;;  %3785 = vperm.xlu1 %6481, %v8708_v48   ;;  %v5898_v30 = vld [vmem:[%s9931_s6 + $0x398] sm:$0xff] }
 0x63c   : > { %v5930_v56 = vld [vmem:[%s9931_s6 + $0x498] sm:$0xff] }
 0x641   : > { %v4571_v27 = vpop.permute.xlu1 %4570 }
 0x642   : > { %v4617_v47 = vmul.f32 %v6055_v57, %v4571_v27  ;;  %v4618_v44 = vmul.f32 %v6056_v11, %v4571_v27  ;;  %6487 = vset.pattern.permute.xlu2 %v10041_v52  ;;  %v5866_v52 = vld [vmem:[%s9931_s6 + $0x298] sm:$0xff]  ;;  %v9133_v11 = vpop.permute.xlu0 %4417  ;;  %v5961_v27 = vld [vmem:[%s9931_s6 + $0x590] sm:$0xff] }
 0x643   : > { %6484 = vset.pattern.permute.xlu1 %v9940_v60  ;;  %3337 = vperm.xlu2 %6487, %v8824_v3   ;;  %v9098_v41 = vpop.permute.xlu2 %4574 }
 0x644   : > { %v9102_v50 = vadd.f32 %v4617_v47, %v4488_v9  ;;  %v9104_v2 = vadd.f32 %v4618_v44, %v4489_v35  ;;  %4268 = vperm.xlu1 %6484, %v8708_v48   ;;  %v3814_v9 = vmul.f32 %v5897_v61, %v9038_v16  ;;  %v3815_v35 = vmul.f32 %v5898_v30, %v9038_v16  ;;  %v5962_v47 = vld [vmem:[%s9931_s6 + $0x598] sm:$0xff]  ;;  %v5835_v16 = vld [vmem:[%s9931_s6 + $0x1a0] sm:$0xff]  ;;  %v5993_v61 = vld [vmem:[%s9931_s6 + $0x690] sm:$0xff] }
 0x645   : > { %v5994_v30 = vld [vmem:[%s9931_s6 + $0x698] sm:$0xff] }
 0x64a   : > { %v3609_v63 = vpop.permute.xlu1 %3608 }
 0x64b   : > { %v3653_v38 = vmul.f32 %v5865_v26, %v3609_v63  ;;  %v3654_v7 = vmul.f32 %v5866_v52, %v3609_v63  ;;  %6490 = vset.pattern.permute.xlu2 %v6591_v23  ;;  %v5836_v52 = vld [vmem:[%s9931_s6 + $0x1a8] sm:$0xff]  ;;  %v4136_v63 = vmul.f32 %v5961_v27, %v9058_v8 }
 0x64c   : > { %6485 = vset.pattern.permute.xlu1 %v9942_v14  ;;  %3789 = vperm.xlu2 %6490, %v8824_v3   ;;  %v3613_v53 = vpop.permute.xlu2 %3612 }
 0x64d   : > { %v3685_v57 = vadd.f32 %v3653_v38, %v9027_v20  ;;  %v3686_v23 = vadd.f32 %v3654_v7, %v9029_v42  ;;  %4429 = vperm.xlu1 %6485, %v8708_v48   ;;  %v3975_v20 = vmul.f32 %v5929_v24, %v9043_v10  ;;  %v3976_v42 = vmul.f32 %v5930_v56, %v9043_v10  ;;  %v6025_v10 = vld [vmem:[%s9931_s6 + $0x790] sm:$0xff]  ;;  %v3253_v56 = vld [vmem:[%s9931_s6 + $0xa0] sm:$0xff] }
 0x64e   : > { %v4137_v38 = vmul.f32 %v5962_v47, %v9058_v8  ;;  %v6026_v8 = vld [vmem:[%s9931_s6 + $0x798] sm:$0xff] }
 0x64f   : > { %v3846_v44 = vadd.f32 %v3814_v9, %v3685_v57  ;;  %v3847_v26 = vadd.f32 %v3815_v35, %v3686_v23  ;;  %v3254_v9 = vld [vmem:[%s9931_s6 + $0xa8] sm:$0xff]  ;;  %v3494_v35 = vmul.f32 %v5835_v16, %v9053_v4  ;;  %v4297_v57 = vmul.f32 %v5993_v61, %v9072_v58  ;;  %v6057_v61 = vld [vmem:[%s9931_s6 + $0x890] sm:$0xff] }
 0x650   : > { %v4298_v23 = vmul.f32 %v5994_v30, %v9072_v58  ;;  %v3495_v16 = vmul.f32 %v5836_v52, %v9053_v4  ;;  %v6058_v58 = vld [vmem:[%s9931_s6 + $0x898] sm:$0xff] }
 0x651   : > { %v4007_v7 = vadd.f32 %v3975_v20, %v3846_v44  ;;  %v4008_v24 = vadd.f32 %v3976_v42, %v3847_v26  ;;  %v5867_v20 = vld [vmem:[%s9931_s6 + $0x2a0] sm:$0xff]  ;;  %v5868_v42 = vld [vmem:[%s9931_s6 + $0x2a8] sm:$0xff]  ;;  %v4458_v26 = vmul.f32 %v6025_v10, %v9086_v62 }
 0x653   : > { %v4168_v27 = vadd.f32 %v4136_v63, %v4007_v7  ;;  %v4169_v47 = vadd.f32 %v4137_v38, %v4008_v24  ;;  %v3318_v44 = vpop.permute.xlu1 %3317  ;;  %v4459_v38 = vmul.f32 %v6026_v8, %v9086_v62  ;;  %v3655_v7 = vmul.f32 %v5867_v20, %v3613_v53  ;;  %v3617_v8 = vpop.permute.xlu0 %3616 }
 0x654   : > { %v3365_v30 = vmul.f32 %v3318_v44, %v3253_v56  ;;  %v3366_v63 = vmul.f32 %v3318_v44, %v3254_v9  ;;  %6494 = vset.pattern.permute.xlu2 %v9942_v14  ;;  %v3656_v24 = vmul.f32 %v5868_v42, %v3613_v53  ;;  %v4619_v56 = vmul.f32 %v6057_v61, %v9098_v41  ;;  %v5899_v53 = vld [vmem:[%s9931_s6 + $0x3a0] sm:$0xff] }
 0x655   : > { %6486 = vset.pattern.permute.xlu1 %v6598_v54  ;;  %4433 = vperm.xlu2 %6494, %v8824_v3   ;;  %v9190_v4 = vpop.permute.xlu2 %3322  ;;  %v4329_v52 = vadd.f32 %v4297_v57, %v4168_v27  ;;  %v4330_v10 = vadd.f32 %v4298_v23, %v4169_v47  ;;  %v4620_v9 = vmul.f32 %v6058_v58, %v9098_v41  ;;  %v5931_v41 = vld [vmem:[%s9931_s6 + $0x4a0] sm:$0xff]  ;;  %v5964_v27 = vld [vmem:[%s9931_s6 + $0x5a8] sm:$0xff]  ;;  %v10043_v47 = vmov 1  }
 0x656   : > { %v3526_v12 = vadd.f32 %v3494_v35, %v3365_v30  ;;  %v3527_v60 = vadd.f32 %v3495_v16, %v3366_v63  ;;  %4590 = vperm.xlu1 %6486, %v8708_v48   ;;  %v5900_v48 = vld [vmem:[%s9931_s6 + $0x3a8] sm:$0xff]  ;;  %v5963_v23 = vld [vmem:[%s9931_s6 + $0x5a0] sm:$0xff]  ;;  %v3977_v42 = vmul.f32 %v5931_v41, %v9067_v40  ;;  %v5837_v41 = vld [vmem:[%s9931_s6 + $0x1b0] sm:$0xff] }
 0x657   : > { %v4490_v44 = vadd.f32 %v4458_v26, %v4329_v52  ;;  %v4491_v62 = vadd.f32 %v4459_v38, %v4330_v10  ;;  %v5995_v58 = vld [vmem:[%s9931_s6 + $0x6a0] sm:$0xff]  ;;  %v5996_v30 = vld [vmem:[%s9931_s6 + $0x6a8] sm:$0xff]  ;;  %v4138_v63 = vmul.f32 %v5963_v23, %v9082_v46  ;;  %v4139_v38 = vmul.f32 %v5964_v27, %v9082_v46 }
 0x658   : > { %v3687_v14 = vadd.f32 %v3655_v7, %v3526_v12  ;;  %v3688_v18 = vadd.f32 %v3656_v24, %v3527_v60  ;;  %v5932_v12 = vld [vmem:[%s9931_s6 + $0x4a8] sm:$0xff]  ;;  %v5870_v7 = vld [vmem:[%s9931_s6 + $0x2b8] sm:$0xff]  ;;  %v3257_v46 = vld [vmem:[%s9931_s6 + $0xc0] sm:$0xff] }
 0x659   : > { %v9195_v5 = vadd.f32 %v4619_v56, %v4490_v44  ;;  %v9197_v49 = vadd.f32 %v4620_v9, %v4491_v62  ;;  %v3978_v16 = vmul.f32 %v5932_v12, %v9067_v40  ;;  %v6027_v40 = vld [vmem:[%s9931_s6 + $0x7a0] sm:$0xff]  ;;  %v3255_v56 = vld [vmem:[%s9931_s6 + $0xb0] sm:$0xff]  ;;  %v4299_v9 = vmul.f32 %v5995_v58, %v9100_v21  ;;  %v3256_v62 = vld [vmem:[%s9931_s6 + $0xb8] sm:$0xff] }
 0x65a   : > { %v4300_v44 = vmul.f32 %v5996_v30, %v9100_v21  ;;  %v5838_v12 = vld [vmem:[%s9931_s6 + $0x1b8] sm:$0xff]  ;;  %v3258_v21 = vld [vmem:[%s9931_s6 + $0xc8] sm:$0xff]  ;;  %v3658_v23 = vmul.f32 %v5870_v7, %v3617_v8  ;;  %v3368_v30 = vmul.f32 %v9190_v4, %v3256_v62 }
 0x65b   : > { %v3328_v24 = vpop.permute.xlu0 %3327 }
 0x65c   : > { %v3774_v60 = vpop.permute.xlu1 %3773  ;;  %v3369_v27 = vmul.f32 %v3328_v24, %v3257_v46 }
 0x65d   : > { %v3816_v35 = vmul.f32 %v5899_v53, %v3774_v60  ;;  %v3817_v57 = vmul.f32 %v5900_v48, %v3774_v60  ;;  %6495 = vset.pattern.permute.xlu2 %v6598_v54  ;;  %v4460_v60 = vmul.f32 %v6027_v40, %v9133_v11 }
 0x65e   : > { %6488 = vset.pattern.permute.xlu1 %v10043_v47  ;;  %4594 = vperm.xlu2 %6495, %v8824_v3   ;;  %v3778_v20 = vpop.permute.xlu2 %3777 }
 0x65f   : > { %v3848_v26 = vadd.f32 %v3816_v35, %v3687_v14  ;;  %v3849_v61 = vadd.f32 %v3817_v57, %v3688_v18  ;;  %3467 = vperm.xlu1 %6488, %v8824_v3   ;;  %v6028_v18 = vld [vmem:[%s9931_s6 + $0x7a8] sm:$0xff]  ;;  %v5869_v14 = vld [vmem:[%s9931_s6 + $0x2b0] sm:$0xff] }
 0x660   : > { %v4461_v35 = vmul.f32 %v6028_v18, %v9133_v11  ;;  %v3657_v57 = vmul.f32 %v5869_v14, %v3617_v8  ;;  %v3367_v11 = vmul.f32 %v9190_v4, %v3255_v56  ;;  %v5901_v8 = vld [vmem:[%s9931_s6 + $0x3b0] sm:$0xff]  ;;  %v3370_v18 = vmul.f32 %v3328_v24, %v3258_v21 }
 0x661   : > { %v4009_v52 = vadd.f32 %v3977_v42, %v3848_v26  ;;  %v4010_v10 = vadd.f32 %v3978_v16, %v3849_v61  ;;  %v5839_v16 = vld [vmem:[%s9931_s6 + $0x1c0] sm:$0xff]  ;;  %v5840_v26 = vld [vmem:[%s9931_s6 + $0x1c8] sm:$0xff]  ;;  %v10044_v14 = vmov 4  }
 0x663   : > { %v4170_v53 = vadd.f32 %v4138_v63, %v4009_v52  ;;  %v4171_v48 = vadd.f32 %v4139_v38, %v4010_v10  ;;  %v5902_v63 = vld [vmem:[%s9931_s6 + $0x3b8] sm:$0xff] }
 0x664   : > { %v3819_v62 = vmul.f32 %v5902_v63, %v3778_v20 }
 0x665   : > { %v3456_v42 = vpop.permute.xlu1 %3455  ;;  %v4331_v61 = vadd.f32 %v4299_v9, %v4170_v53  ;;  %v4332_v58 = vadd.f32 %v4300_v44, %v4171_v48  ;;  %v3818_v44 = vmul.f32 %v5901_v8, %v3778_v20  ;;  %v10045_v20 = vmov 5  }
 0x666   : > { %v3496_v38 = vmul.f32 %v5837_v41, %v3456_v42  ;;  %v3497_v40 = vmul.f32 %v5838_v12, %v3456_v42  ;;  %6497 = vset.pattern.permute.xlu2 %v10043_v47  ;;  %v5933_v41 = vld [vmem:[%s9931_s6 + $0x4b0] sm:$0xff]  ;;  %v5934_v12 = vld [vmem:[%s9931_s6 + $0x4b8] sm:$0xff]  ;;  %v10046_v8 = vmov 6  }
 0x667   : > { %6491 = vset.pattern.permute.xlu1 %v10044_v14  ;;  %3471 = vperm.xlu2 %6497, %v8856_v15   ;;  %v3460_v52 = vpop.permute.xlu2 %3459  ;;  %v9282_v10 = vadd.f32 %v4460_v60, %v4331_v61  ;;  %v9284_v4 = vadd.f32 %v4461_v35, %v4332_v58  ;;  %v5966_v61 = vld [vmem:[%s9931_s6 + $0x5b8] sm:$0xff] }
 0x668   : > { %v3528_v7 = vadd.f32 %v3496_v38, %v3367_v11  ;;  %v3529_v46 = vadd.f32 %v3497_v40, %v3368_v30  ;;  %v3498_v56 = vmul.f32 %v5839_v16, %v3460_v52  ;;  %v3499_v9 = vmul.f32 %v5840_v26, %v3460_v52  ;;  %3950 = vperm.xlu1 %6491, %v8824_v3   ;;  %v5965_v26 = vld [vmem:[%s9931_s6 + $0x5b0] sm:$0xff] }
 0x66a   : > { %v3689_v53 = vadd.f32 %v3657_v57, %v3528_v7  ;;  %v3690_v47 = vadd.f32 %v3658_v23, %v3529_v46  ;;  %v9287_v24 = vadd.f32 %v3498_v56, %v3369_v27  ;;  %v9289_v48 = vadd.f32 %v3499_v9, %v3370_v18  ;;  %v5997_v18 = vld [vmem:[%s9931_s6 + $0x6b0] sm:$0xff] }
 0x66b   : > { %v10047_v56 = vmov 7   ;;  %v10048_v9 = vmov 2  }
 0x66c   : > { %v3850_v60 = vadd.f32 %v3818_v44, %v3689_v53  ;;  %v3851_v35 = vadd.f32 %v3819_v62, %v3690_v47  ;;  %v3782_v53 = vpop.permute.xlu0 %3781  ;;  %v6029_v47 = vld [vmem:[%s9931_s6 + $0x7b0] sm:$0xff] }
 0x66e   : > { %v3939_v21 = vpop.permute.xlu1 %3938 }
 0x66f   : > { %v3979_v42 = vmul.f32 %v5933_v41, %v3939_v21  ;;  %v3980_v16 = vmul.f32 %v5934_v12, %v3939_v21  ;;  %6500 = vset.pattern.permute.xlu2 %v10044_v14  ;;  %v5998_v14 = vld [vmem:[%s9931_s6 + $0x6b8] sm:$0xff] }
 0x670   : > { %6492 = vset.pattern.permute.xlu1 %v10045_v20  ;;  %3954 = vperm.xlu2 %6500, %v8856_v15   ;;  %v9301_v27 = vpop.permute.xlu2 %3942  ;;  %v6030_v41 = vld [vmem:[%s9931_s6 + $0x7b8] sm:$0xff] }
 0x671   : > { %v4011_v57 = vadd.f32 %v3979_v42, %v3850_v60  ;;  %v4012_v23 = vadd.f32 %v3980_v16, %v3851_v35  ;;  %4111 = vperm.xlu1 %6492, %v8824_v3   ;;  %v6061_v16 = vld [vmem:[%s9931_s6 + $0x8b0] sm:$0xff]  ;;  %v6062_v20 = vld [vmem:[%s9931_s6 + $0x8b8] sm:$0xff] }
 0x677   : > { %v4100_v58 = vpop.permute.xlu1 %4099 }
 0x678   : > { %v4140_v11 = vmul.f32 %v5965_v26, %v4100_v58  ;;  %v4141_v30 = vmul.f32 %v5966_v61, %v4100_v58  ;;  %6502 = vset.pattern.permute.xlu2 %v10046_v8  ;;  %v5871_v58 = vld [vmem:[%s9931_s6 + $0x2c0] sm:$0xff] }
 0x679   : > { %6493 = vset.pattern.permute.xlu1 %v10046_v8  ;;  %4276 = vperm.xlu2 %6502, %v8856_v15   ;;  %v9313_v40 = vpop.permute.xlu2 %4264 }
 0x67a   : > { %v4172_v63 = vadd.f32 %v4140_v11, %v4011_v57  ;;  %v4173_v38 = vadd.f32 %v4141_v30, %v4012_v23  ;;  %4272 = vperm.xlu1 %6493, %v8824_v3   ;;  %v4104_v57 = vpop.permute.xlu0 %4103  ;;  %v5872_v11 = vld [vmem:[%s9931_s6 + $0x2c8] sm:$0xff] }
 0x680   : > { %v4261_v52 = vpop.permute.xlu1 %4260 }
 0x681   : > { %v4301_v7 = vmul.f32 %v5997_v18, %v4261_v52  ;;  %v4302_v46 = vmul.f32 %v5998_v14, %v4261_v52  ;;  %6503 = vset.pattern.permute.xlu2 %v10047_v56 }
 0x682   : > { %6498 = vset.pattern.permute.xlu1 %v10048_v9  ;;  %4437 = vperm.xlu2 %6503, %v8856_v15   ;;  %v9325_v62 = vpop.permute.xlu2 %4425  ;;  %v3464_v18 = vpop.permute.xlu0 %3463  ;;  %v5936_v9 = vld [vmem:[%s9931_s6 + $0x4c8] sm:$0xff] }
 0x683   : > { %v4333_v3 = vadd.f32 %v4301_v7, %v4172_v63  ;;  %v4334_v44 = vadd.f32 %v4302_v46, %v4173_v38  ;;  %3632 = vperm.xlu1 %6498, %v8856_v15   ;;  %v5903_v63 = vld [vmem:[%s9931_s6 + $0x3c0] sm:$0xff]  ;;  %v5904_v38 = vld [vmem:[%s9931_s6 + $0x3c8] sm:$0xff] }
 0x684   : > { %v5935_v46 = vld [vmem:[%s9931_s6 + $0x4c0] sm:$0xff] }
 0x689   : > { %v4422_v12 = vpop.permute.xlu1 %4421 }
 0x68a   : > { %v4462_v60 = vmul.f32 %v6029_v47, %v4422_v12  ;;  %v4463_v35 = vmul.f32 %v6030_v41, %v4422_v12  ;;  %6506 = vset.pattern.permute.xlu2 %v6598_v54  ;;  %v5967_v12 = vld [vmem:[%s9931_s6 + $0x5c0] sm:$0xff] }
 0x68b   : > { %6505 = vset.pattern.permute.xlu1 %v10047_v56  ;;  %4558 = vperm.xlu2 %6506, %v8290_v45   ;;  %v9337_v42 = vpop.permute.xlu2 %4586 }
 0x68c   : > { %v4494_v15 = vadd.f32 %v4462_v60, %v4333_v3  ;;  %v4495_v21 = vadd.f32 %v4463_v35, %v4334_v44  ;;  %4393 = vperm.xlu1 %6505, %v8301_v25   ;;  %v3820_v3 = vmul.f32 %v5903_v63, %v3782_v53  ;;  %v3821_v44 = vmul.f32 %v5904_v38, %v3782_v53  ;;  %v5968_v60 = vld [vmem:[%s9931_s6 + $0x5c8] sm:$0xff]  ;;  %v5841_v63 = vld [vmem:[%s9931_s6 + $0x1d0] sm:$0xff] }
 0x68d   : > { %v3981_v35 = vmul.f32 %v5935_v46, %v9301_v27  ;;  %v4142_v53 = vmul.f32 %v5967_v12, %v4104_v57  ;;  %v6063_v12 = vld [vmem:[%s9931_s6 + $0x8c0] sm:$0xff] }
 0x692   : > { %v4583_v23 = vpop.permute.xlu1 %4582 }
 0x693   : > { %v4623_v26 = vmul.f32 %v6061_v16, %v4583_v23  ;;  %v4624_v61 = vmul.f32 %v6062_v20, %v4583_v23  ;;  %6508 = vset.pattern.permute.xlu2 %v10047_v56  ;;  %v4143_v20 = vmul.f32 %v5968_v60, %v4104_v57  ;;  %v5842_v23 = vld [vmem:[%s9931_s6 + $0x1d8] sm:$0xff]  ;;  %v3259_v57 = vld [vmem:[%s9931_s6 + $0xd0] sm:$0xff] }
 0x694   : > { %6507 = vset.pattern.permute.xlu1 %v10046_v8  ;;  %4389 = vperm.xlu2 %6508, %v8275_v37   ;;  %v9359_v30 = vpop.permute.xlu2 %3624 }
 0x695   : > { %v9348_v45 = vadd.f32 %v4623_v26, %v4494_v15  ;;  %v9350_v25 = vadd.f32 %v4624_v61, %v4495_v21  ;;  %4224 = vperm.xlu1 %6507, %v8261_v31   ;;  %v3982_v15 = vmul.f32 %v5936_v9, %v9301_v27  ;;  %v6031_v27 = vld [vmem:[%s9931_s6 + $0x7c0] sm:$0xff] }
 0x69b   : > { %v3621_v14 = vpop.permute.xlu1 %3620 }
 0x69c   : > { %v3659_v52 = vmul.f32 %v5871_v58, %v3621_v14  ;;  %v3660_v7 = vmul.f32 %v5872_v11, %v3621_v14  ;;  %4385 = vperm.xlu2 %6508, %v8261_v31   ;;  %v3260_v58 = vld [vmem:[%s9931_s6 + $0xd8] sm:$0xff]  ;;  %v6032_v11 = vld [vmem:[%s9931_s6 + $0x7c8] sm:$0xff] }
 0x69d   : > { %4220 = vperm.xlu1 %6507, %v8249_v1   ;;  %v9414_v9 = vpop.permute.xlu2 %3337 }
 0x69e   : > { %v3691_v47 = vadd.f32 %v3659_v52, %v9287_v24  ;;  %v3692_v41 = vadd.f32 %v3660_v7, %v9289_v48  ;;  %v5999_v24 = vld [vmem:[%s9931_s6 + $0x6c0] sm:$0xff]  ;;  %v6000_v48 = vld [vmem:[%s9931_s6 + $0x6c8] sm:$0xff]  ;;  %v5874_v52 = vld [vmem:[%s9931_s6 + $0x2d8] sm:$0xff] }
 0x69f   : > { %v4303_v38 = vmul.f32 %v5999_v24, %v9313_v40  ;;  %v4304_v14 = vmul.f32 %v6000_v48, %v9313_v40  ;;  %v6064_v40 = vld [vmem:[%s9931_s6 + $0x8c8] sm:$0xff]  ;;  %v3662_v24 = vmul.f32 %v5874_v52, %v9359_v30 }
 0x6a0   : > { %v3852_v21 = vadd.f32 %v3820_v3, %v3691_v47  ;;  %v3853_v16 = vadd.f32 %v3821_v44, %v3692_v41  ;;  %v3501_v44 = vmul.f32 %v5842_v23, %v3464_v18  ;;  %v3947_v47 = vpop.permute.xlu0 %3946  ;;  %v4464_v41 = vmul.f32 %v6031_v27, %v9325_v62 }
 0x6a2   : > { %v4013_v26 = vadd.f32 %v3981_v35, %v3852_v21  ;;  %v4014_v61 = vadd.f32 %v3982_v15, %v3853_v16  ;;  %v4465_v35 = vmul.f32 %v6032_v11, %v9325_v62  ;;  %v3500_v16 = vmul.f32 %v5841_v63, %v3464_v18  ;;  %v5905_v18 = vld [vmem:[%s9931_s6 + $0x3d0] sm:$0xff] }
 0x6a4   : > { %v4174_v7 = vadd.f32 %v4142_v53, %v4013_v26  ;;  %v4175_v46 = vadd.f32 %v4143_v20, %v4014_v61  ;;  %v3333_v3 = vpop.permute.xlu1 %3332  ;;  %6510 = vset.pattern.permute.xlu2 %v10046_v8  ;;  %v4625_v53 = vmul.f32 %v6063_v12, %v9337_v42  ;;  %v4626_v20 = vmul.f32 %v6064_v40, %v9337_v42  ;;  %v5873_v26 = vld [vmem:[%s9931_s6 + $0x2d0] sm:$0xff]  ;;  %v5906_v42 = vld [vmem:[%s9931_s6 + $0x3d8] sm:$0xff] }
 0x6a5   : > { %v3372_v60 = vmul.f32 %v3333_v3, %v3260_v58  ;;  %6509 = vset.pattern.permute.xlu1 %v6598_v54  ;;  %4216 = vperm.xlu2 %6510, %v8226_v43   ;;  %v3371_v8 = vmul.f32 %v3333_v3, %v3259_v57  ;;  %v3661_v11 = vmul.f32 %v5873_v26, %v9359_v30  ;;  %v5938_v57 = vld [vmem:[%s9931_s6 + $0x4d8] sm:$0xff]  ;;  %v5969_v40 = vld [vmem:[%s9931_s6 + $0x5d0] sm:$0xff] }
 0x6a6   : > { %4550 = vperm.xlu1 %6509, %v8275_v37   ;;  %v4335_v15 = vadd.f32 %v4303_v38, %v4174_v7  ;;  %v4336_v21 = vadd.f32 %v4304_v14, %v4175_v46  ;;  %v5937_v38 = vld [vmem:[%s9931_s6 + $0x4d0] sm:$0xff]  ;;  %v9452_v14 = vpop.permute.xlu2 %3789  ;;  %v5970_v30 = vld [vmem:[%s9931_s6 + $0x5d8] sm:$0xff] }
 0x6a7   : > { %v3533_v48 = vadd.f32 %v3501_v44, %v3372_v60  ;;  %v3532_v61 = vadd.f32 %v3500_v16, %v3371_v8  ;;  %v3984_v44 = vmul.f32 %v5938_v57, %v3947_v47  ;;  %v3983_v12 = vmul.f32 %v5937_v38, %v3947_v47  ;;  %v6034_v26 = vld [vmem:[%s9931_s6 + $0x7d8] sm:$0xff]  ;;  %v5844_v38 = vld [vmem:[%s9931_s6 + $0x1e8] sm:$0xff] }
 0x6a8   : > { %v4496_v23 = vadd.f32 %v4464_v41, %v4335_v15  ;;  %v4497_v27 = vadd.f32 %v4465_v35, %v4336_v21  ;;  %v4108_v3 = vpop.permute.xlu0 %4107  ;;  %v6002_v15 = vld [vmem:[%s9931_s6 + $0x6d8] sm:$0xff] }
 0x6a9   : > { %v3694_v62 = vadd.f32 %v3662_v24, %v3533_v48  ;;  %v3693_v52 = vadd.f32 %v3661_v11, %v3532_v61  ;;  %v4145_v60 = vmul.f32 %v5970_v30, %v4108_v3  ;;  %v4144_v16 = vmul.f32 %v5969_v40, %v4108_v3 }
 0x6aa   : > { %v9434_v58 = vadd.f32 %v4625_v53, %v4496_v23  ;;  %v9436_v37 = vadd.f32 %v4626_v20, %v4497_v27 }
 0x6ad   : > { %v3786_v63 = vpop.permute.xlu1 %3785  ;;  %6512 = vset.pattern.permute.xlu2 %v10047_v56 }
 0x6ae   : > { %v3822_v7 = vmul.f32 %v5905_v18, %v3786_v63  ;;  %v3823_v46 = vmul.f32 %v5906_v42, %v3786_v63  ;;  %4546 = vperm.xlu1 %6509, %v8261_v31   ;;  %4377 = vperm.xlu2 %6512, %v8226_v43   ;;  %v6001_v31 = vld [vmem:[%s9931_s6 + $0x6d0] sm:$0xff]  ;;  %v3262_v63 = vld [vmem:[%s9931_s6 + $0xe8] sm:$0xff] }
 0x6af   : > { %v9471_v20 = vpop.permute.xlu2 %4433  ;;  %v3374_v30 = vmul.f32 %v9414_v9, %v3262_v63  ;;  %v6036_v63 = vld [vmem:[%s9931_s6 + $0x7e8] sm:$0xff] }
 0x6b0   : > { %v3854_v56 = vadd.f32 %v3822_v7, %v3693_v52  ;;  %v3855_v41 = vadd.f32 %v3823_v46, %v3694_v62  ;;  %v5876_v52 = vld [vmem:[%s9931_s6 + $0x2e8] sm:$0xff]  ;;  %v3629_v7 = vpop.permute.xlu0 %3628 }
 0x6b2   : > { %v4016_v35 = vadd.f32 %v3984_v44, %v3855_v41  ;;  %v4015_v8 = vadd.f32 %v3983_v12, %v3854_v56  ;;  %v5908_v44 = vld [vmem:[%s9931_s6 + $0x3e8] sm:$0xff]  ;;  %v3664_v56 = vmul.f32 %v5876_v52, %v3629_v7 }
 0x6b3   : > { %v3825_v12 = vmul.f32 %v5908_v44, %v9452_v14  ;;  %v6068_v44 = vld [vmem:[%s9931_s6 + $0x8e8] sm:$0xff] }
 0x6b4   : > { %v4177_v21 = vadd.f32 %v4145_v60, %v4016_v35  ;;  %v4176_v47 = vadd.f32 %v4144_v16, %v4015_v8  ;;  %v5940_v35 = vld [vmem:[%s9931_s6 + $0x4e8] sm:$0xff] }
 0x6b6   : > { %v4269_v24 = vpop.permute.xlu1 %4268  ;;  %4542 = vperm.xlu1 %6509, %v8249_v1   ;;  %6513 = vset.pattern.permute.xlu2 %v6598_v54 }
 0x6b7   : > { %v4305_v48 = vmul.f32 %v6001_v31, %v4269_v24  ;;  %v4306_v53 = vmul.f32 %v6002_v15, %v4269_v24  ;;  %4538 = vperm.xlu2 %6513, %v8226_v43   ;;  %v6066_v43 = vld [vmem:[%s9931_s6 + $0x8d8] sm:$0xff] }
 0x6b8   : > { %v9481_v61 = vpop.permute.xlu2 %4594  ;;  %v9512_v16 = vpop.permute.xlu0 %3342 }
 0x6b9   : > { %v9473_v23 = vadd.f32 %v4305_v48, %v4176_v47  ;;  %v4338_v27 = vadd.f32 %v4306_v53, %v4177_v21  ;;  %v5972_v47 = vld [vmem:[%s9931_s6 + $0x5e8] sm:$0xff] }
 0x6bf   : > { %v9478_v62 = vpop.permute.xlu1 %4429 }
 0x6c0   : > { %v4467_v1 = vmul.f32 %v6034_v26, %v9478_v62  ;;  %v9519_v26 = vpop.permute.xlu0 %3793 }
 0x6c1   : > { %v9491_v57 = vpop.permute.xlu2 %3471 }
 0x6c2   : > { %v4499_v54 = vadd.f32 %v4467_v1, %v4338_v27  ;;  %v5843_v1 = vld [vmem:[%s9931_s6 + $0x1e0] sm:$0xff] }
 0x6c8   : > { %v9486_v18 = vpop.permute.xlu1 %4590 }
 0x6c9   : > { %v4628_v42 = vmul.f32 %v6066_v43, %v9486_v18  ;;  %v6004_v43 = vld [vmem:[%s9931_s6 + $0x6e8] sm:$0xff] }
 0x6ca   : > { %v9507_v40 = vpop.permute.xlu2 %3954 }
 0x6cb   : > { %v9489_v11 = vadd.f32 %v4628_v42, %v4499_v54  ;;  %v3261_v42 = vld [vmem:[%s9931_s6 + $0xe0] sm:$0xff] }
 0x6d1   : > { %v3468_v46 = vpop.permute.xlu1 %3467 }
 0x6d2   : > { %v3503_v3 = vmul.f32 %v5844_v38, %v3468_v46  ;;  %v3502_v38 = vmul.f32 %v5843_v1, %v3468_v46  ;;  %v5877_v1 = vld [vmem:[%s9931_s6 + $0x2f0] sm:$0xff] }
 0x6d3   : > { %v9514_v24 = vpop.permute.xlu2 %4276 }
 0x6d4   : > { %v3535_v41 = vadd.f32 %v3503_v3, %v3374_v30  ;;  %v3373_v3 = vmul.f32 %v9414_v9, %v3261_v42  ;;  %v3263_v9 = vld [vmem:[%s9931_s6 + $0xf0] sm:$0xff] }
 0x6d6   : > { %v3696_v60 = vadd.f32 %v3664_v56, %v3535_v41  ;;  %v5875_v56 = vld [vmem:[%s9931_s6 + $0x2e0] sm:$0xff]  ;;  %v4469_v41 = vmul.f32 %v6036_v63, %v9471_v20  ;;  %v3534_v46 = vadd.f32 %v3502_v38, %v3373_v3  ;;  %v5909_v38 = vld [vmem:[%s9931_s6 + $0x3f0] sm:$0xff] }
 0x6d8   : > { %v3857_v8 = vadd.f32 %v3825_v12, %v3696_v60  ;;  %v5845_v12 = vld [vmem:[%s9931_s6 + $0x1f0] sm:$0xff] }
 0x6da   : > { %v3951_v31 = vpop.permute.xlu1 %3950 }
 0x6db   : > { %v3986_v15 = vmul.f32 %v5940_v35, %v3951_v31  ;;  %v4630_v35 = vmul.f32 %v6068_v44, %v9481_v61 }
 0x6dc   : > { %v9524_v54 = vpop.permute.xlu2 %4437 }
 0x6dd   : > { %v4018_v21 = vadd.f32 %v3986_v15, %v3857_v8  ;;  %v3663_v15 = vmul.f32 %v5875_v56, %v3629_v7  ;;  %v3375_v7 = vmul.f32 %v9512_v16, %v3263_v9  ;;  %v3826_v9 = vmul.f32 %v5909_v38, %v9519_v26 }
 0x6df   : > { %v3695_v42 = vadd.f32 %v3663_v15, %v3534_v46  ;;  %v6003_v46 = vld [vmem:[%s9931_s6 + $0x6e0] sm:$0xff] }
 0x6e3   : > { %v4112_v48 = vpop.permute.xlu1 %4111 }
 0x6e4   : > { %v4147_v53 = vmul.f32 %v5972_v47, %v4112_v48  ;;  %v9551_v47 = vpop.permute.xlu0 %4115 }
 0x6e5   : > { %v9565_v63 = vpop.permute.xlu2 %4558 }
 0x6e6   : > { %v4179_v27 = vadd.f32 %v4147_v53, %v4018_v21  ;;  %v3504_v21 = vmul.f32 %v5845_v12, %v9491_v57  ;;  %v5907_v53 = vld [vmem:[%s9931_s6 + $0x3e0] sm:$0xff] }
 0x6e7   : > { %v3824_v44 = vmul.f32 %v5907_v53, %v9452_v14  ;;  %v5973_v14 = vld [vmem:[%s9931_s6 + $0x5f0] sm:$0xff] }
 0x6e8   : > { %v3536_v56 = vadd.f32 %v3504_v21, %v3375_v7  ;;  %v4148_v7 = vmul.f32 %v5973_v14, %v9551_v47 }
 0x6ec   : > { %v4273_v52 = vpop.permute.xlu1 %4272 }
 0x6ed   : > { %v4308_v30 = vmul.f32 %v6004_v43, %v4273_v52  ;;  %v4307_v53 = vmul.f32 %v6003_v46, %v4273_v52  ;;  %v6033_v46 = vld [vmem:[%s9931_s6 + $0x7d0] sm:$0xff] }
 0x6ef   : > { %v4340_v60 = vadd.f32 %v4308_v30, %v4179_v27  ;;  %v5939_v27 = vld [vmem:[%s9931_s6 + $0x4e0] sm:$0xff] }
 0x6f0   : > { %v5971_v30 = vld [vmem:[%s9931_s6 + $0x5e0] sm:$0xff] }
 0x6f1   : > { %v4501_v8 = vadd.f32 %v4469_v41, %v4340_v60  ;;  %v3985_v41 = vmul.f32 %v5939_v27, %v3951_v31  ;;  %v5941_v60 = vld [vmem:[%s9931_s6 + $0x4f0] sm:$0xff] }
 0x6f2   : > { %v3987_v31 = vmul.f32 %v5941_v60, %v9507_v40  ;;  %v6069_v60 = vld [vmem:[%s9931_s6 + $0x8f0] sm:$0xff] }
 0x6f3   : > { %v9562_v43 = vadd.f32 %v4630_v35, %v4501_v8  ;;  %v3856_v35 = vadd.f32 %v3824_v44, %v3695_v42  ;;  %v4146_v8 = vmul.f32 %v5971_v30, %v4112_v48  ;;  %v9592_v42 = vpop.permute.xlu0 %4598  ;;  %v6035_v48 = vld [vmem:[%s9931_s6 + $0x7e0] sm:$0xff]  ;;  %v6037_v30 = vld [vmem:[%s9931_s6 + $0x7f0] sm:$0xff] }
 0x6f4   : > { %v4631_v14 = vmul.f32 %v6069_v60, %v9592_v42  ;;  %v5878_v60 = vld [vmem:[%s9931_s6 + $0x2f8] sm:$0xff] }
 0x6f5   : > { %v9573_v3 = vpop.permute.xlu1 %3632  ;;  %v4017_v21 = vadd.f32 %v3985_v41, %v3856_v35  ;;  %v4470_v35 = vmul.f32 %v6037_v30, %v9524_v54 }
 0x6f6   : > { %v3665_v12 = vmul.f32 %v5877_v1, %v9573_v3  ;;  %v6005_v1 = vld [vmem:[%s9931_s6 + $0x6f0] sm:$0xff] }
 0x6f7   : > { %v4178_v36 = vadd.f32 %v4146_v8, %v4017_v21  ;;  %v4309_v52 = vmul.f32 %v6005_v1, %v9514_v24 }
 0x6f8   : > { %v3697_v15 = vadd.f32 %v3665_v12, %v3536_v56  ;;  %v9601_v56 = vpop.permute.xlu2 %4389 }
 0x6f9   : > { %v4339_v44 = vadd.f32 %v4307_v53, %v4178_v36  ;;  %v6067_v36 = vld [vmem:[%s9931_s6 + $0x8e0] sm:$0xff] }
 0x6fa   : > { %v3858_v27 = vadd.f32 %v3826_v9, %v3697_v15  ;;  %v4468_v9 = vmul.f32 %v6035_v48, %v9471_v20  ;;  %v6065_v15 = vld [vmem:[%s9931_s6 + $0x8d0] sm:$0xff]  ;;  %v6059_v48 = vld [vmem:[%s9931_s6 + $0x8a0] sm:$0xff] }
 0x6fb   : > { %v4627_v20 = vmul.f32 %v6065_v15, %v9486_v18  ;;  %v9627_v30 = vpop.permute.xlu0 %4578 }
 0x6fc   : > { %v4019_v38 = vadd.f32 %v3987_v31, %v3858_v27  ;;  %v4466_v31 = vmul.f32 %v6033_v46, %v9478_v62  ;;  %v4500_v21 = vadd.f32 %v4468_v9, %v4339_v44  ;;  %v4629_v27 = vmul.f32 %v6067_v36, %v9481_v61 }
 0x6fd   : > { %v4621_v61 = vmul.f32 %v6059_v48, %v9627_v30 }
 0x6fe   : > { %v4180_v41 = vadd.f32 %v4148_v7, %v4019_v38  ;;  %v9603_v12 = vpop.permute.xlu1 %4393  ;;  %v4498_v7 = vadd.f32 %v4466_v31, %v9473_v23  ;;  %v4661_v38 = vadd.f32 %v4629_v27, %v4500_v21  ;;  %v5846_v23 = vld [vmem:[%s9931_s6 + $0x1f8] sm:$0xff]  ;;  %v6047_v31 = vld [vmem:[%s9931_s6 + $0x840] sm:$0xff] }
 0x6ff   : > { %v4653_v18 = vadd.f32 %v4621_v61, %v9282_v10  ;;  %v3505_v9 = vmul.f32 %v5846_v23, %v9491_v57  ;;  %v6049_v10 = vld [vmem:[%s9931_s6 + $0x850] sm:$0xff]  ;;  %v5979_v27 = vld [vmem:[%s9931_s6 + $0x620] sm:$0xff] }
 0x700   : > { %v4341_v8 = vadd.f32 %v4309_v52, %v4180_v41  ;;  %v4659_v62 = vadd.f32 %v4627_v20, %v4498_v7  ;;  %v9631_v44 = vpop.permute.xlu2 %4385  ;;  %v3264_v41 = vld [vmem:[%s9931_s6 + $0xf8] sm:$0xff] }
 0x702   : > { %v4502_v53 = vadd.f32 %v4470_v35, %v4341_v8  ;;  %v6013_v35 = vld [vmem:[%s9931_s6 + $0x730] sm:$0xff]  ;;  %v3666_v8 = vmul.f32 %v5878_v60, %v9573_v3 }
 0x703   : > { %v9672_v3 = vpop.permute.xlu0 %4554  ;;  %v4446_v21 = vmul.f32 %v6013_v35, %v9601_v56 }
 0x704   : > { %v4663_v1 = vadd.f32 %v4631_v14, %v4502_v53  ;;  %v4611_v14 = vmul.f32 %v6049_v10, %v9565_v63 }
 0x706   : > { %4672 = vmatpush.msra.mxu3 %v4663_v1  ;;  %v4609_v1 = vmul.f32 %v6047_v31, %v9672_v3  ;;  %v4643_v7 = vadd.f32 %v4611_v14, %v8817_v55  ;;  %v5975_v14 = vld [vmem:[%s9931_s6 + $0x600] sm:$0xff] }
 0x707   : > { %v9629_v52 = vpop.permute.xlu1 %4224 }
 0x708   : > { %4673 = vmatpush.msra.mxu3 %v4661_v38  ;;  %v9661_v15 = vpop.permute.xlu2 %4216  ;;  %v4283_v48 = vmul.f32 %v5979_v27, %v9629_v52 }
 0x709   : > { %v4279_v27 = vmul.f32 %v5975_v14, %v9661_v15 }
 0x70a   : > { %4674 = vmatpush.msra.mxu3 %v4659_v62 }
 0x70b   : > { %v9726_v31 = vpop.permute.xlu0 %4381 }
 0x70c   : > { %4675 = vmatpush.msra.mxu3 %v9434_v58  ;;  %v6015_v58 = vld [vmem:[%s9931_s6 + $0x740] sm:$0xff] }
 0x70d   : > { %v4448_v36 = vmul.f32 %v6015_v58, %v9603_v12  ;;  %v5977_v58 = vld [vmem:[%s9931_s6 + $0x610] sm:$0xff] }
 0x70e   : > { %4676 = vmatpush.msra.mxu3 %v9348_v45  ;;  %v3376_v45 = vmul.f32 %v9512_v16, %v3264_v41  ;;  %v5910_v16 = vld [vmem:[%s9931_s6 + $0x3f8] sm:$0xff]  ;;  %v4315_v41 = vadd.f32 %v4283_v48, %v8566_v32 }
 0x70f   : > { %v9649_v46 = vpop.permute.xlu1 %4220  ;;  %v3827_v20 = vmul.f32 %v5910_v16, %v9519_v26  ;;  %v6006_v32 = vld [vmem:[%s9931_s6 + $0x6f8] sm:$0xff] }
 0x710   : > { %4677 = vmatpush.msra.mxu3 %v4653_v18  ;;  %v3537_v57 = vadd.f32 %v3505_v9, %v3376_v45  ;;  %v9699_v18 = vpop.permute.xlu2 %4377  ;;  %v4281_v35 = vmul.f32 %v5977_v58, %v9649_v46 }
 0x712   : > { %4678 = vmatpush.msra.mxu3 %v9195_v5  ;;  %v3698_v53 = vadd.f32 %v3666_v8, %v3537_v57  ;;  %v4480_v5 = vadd.f32 %v4448_v36, %v8753_v39  ;;  %v5942_v39 = vld [vmem:[%s9931_s6 + $0x4f8] sm:$0xff] }
 0x713   : > { %v3988_v55 = vmul.f32 %v5942_v39, %v9507_v40  ;;  %v6043_v40 = vld [vmem:[%s9931_s6 + $0x820] sm:$0xff] }
 0x714   : > { %4679 = vmatpush.msra.mxu3 %v9102_v50  ;;  %v6045_v50 = vld [vmem:[%s9931_s6 + $0x830] sm:$0xff]  ;;  %v3859_v61 = vadd.f32 %v3827_v20, %v3698_v53  ;;  %v4641_v26 = vadd.f32 %v4609_v1, %v4480_v5  ;;  %v6007_v53 = vld [vmem:[%s9931_s6 + $0x700] sm:$0xff]  ;;  %v6038_v5 = vld [vmem:[%s9931_s6 + $0x7f8] sm:$0xff] }
 0x715   : > { %v6039_v20 = vld [vmem:[%s9931_s6 + $0x800] sm:$0xff]  ;;  %v4471_v48 = vmul.f32 %v6038_v5, %v9524_v54 }
 0x716   : > { %4680 = vmatpush.msra.mxu3 %v8981_v29  ;;  %v4478_v29 = vadd.f32 %v4446_v21, %v8640_v13  ;;  %v5974_v13 = vld [vmem:[%s9931_s6 + $0x5f8] sm:$0xff]  ;;  %v4020_v60 = vadd.f32 %v3988_v55, %v3859_v61  ;;  %v4310_v21 = vmul.f32 %v6006_v32, %v9514_v24  ;;  %v6041_v24 = vld [vmem:[%s9931_s6 + $0x810] sm:$0xff]  ;;  %v4311_v61 = vadd.f32 %v4279_v27, %v8440_v19 }
 0x717   : > { %v4149_v10 = vmul.f32 %v5974_v13, %v9551_v47  ;;  %v6009_v47 = vld [vmem:[%s9931_s6 + $0x710] sm:$0xff]  ;;  %v6303_v19 = vld [vmem:[%s9934_s9 + $0x38] sm:$0xff] }
 0x718   : > { %v9686_v38 = vpop.permute.xlu1 %4550  ;;  %4681 = vmatpush.msra.mxu3 %v8914_v51  ;;  %v6011_v51 = vld [vmem:[%s9931_s6 + $0x720] sm:$0xff]  ;;  %v9740_v1 = vpop.permute.xlu2 %4538  ;;  %v4442_v39 = vmul.f32 %v6009_v47, %v9726_v31  ;;  %4848 = vmatpush.bf16.msra.mxu0 %v6303_v19  ;;  %v6310_v32 = vld [vmem:[%s9934_s9 + $0x70] sm:$0xff]  ;;  %v6299_v47 = vld [vmem:[%s9934_s9 + $0x18] sm:$0xff] }
 0x719   : > { %v4607_v62 = vmul.f32 %v6045_v50, %v9686_v38  ;;  %v4444_v9 = vmul.f32 %v6011_v51, %v9631_v44  ;;  %v4181_v57 = vadd.f32 %v4149_v10, %v4020_v60  ;;  %v4313_v50 = vadd.f32 %v4281_v35, %v8517_v34  ;;  %v6070_v34 = vld [vmem:[%s9931_s6 + $0x8f8] sm:$0xff]  ;;  %v6302_v10 = vld [vmem:[%s9934_s9 + $0x30] sm:$0xff] }
 0x71a   : > { %4682 = vmatpush.msra.mxu3 %v4643_v7  ;;  %v4632_v60 = vmul.f32 %v6070_v34, %v9592_v42  ;;  %v6060_v42 = vld [vmem:[%s9931_s6 + $0x8a8] sm:$0xff]  ;;  %v6046_v27 = vld [vmem:[%s9931_s6 + $0x838] sm:$0xff] }
 0x71b   : > { %v4639_v23 = vadd.f32 %v4607_v62, %v4478_v29  ;;  %v4476_v8 = vadd.f32 %v4444_v9, %v4315_v41  ;;  %v4342_v7 = vadd.f32 %v4310_v21, %v4181_v57  ;;  %v4440_v29 = vmul.f32 %v6007_v53, %v9699_v18  ;;  %v6311_v9 = vld [vmem:[%s9934_s9 + $0x78] sm:$0xff]  ;;  %v6048_v21 = vld [vmem:[%s9931_s6 + $0x848] sm:$0xff] }
 0x71c   : > { %4683 = vmatpush.msra.mxu3 %v4641_v26  ;;  %v4601_v26 = vmul.f32 %v6039_v20, %v9740_v1  ;;  %4861 = vmatpush.bf16.msra.mxu1 %v6311_v9  ;;  %v4622_v35 = vmul.f32 %v6060_v42, %v9627_v30  ;;  %v6300_v30 = vld [vmem:[%s9934_s9 + $0x20] sm:$0xff]  ;;  %v6014_v57 = vld [vmem:[%s9931_s6 + $0x738] sm:$0xff]  ;;  %v6044_v20 = vld [vmem:[%s9931_s6 + $0x828] sm:$0xff] }
 0x71d   : > { %v4503_v51 = vadd.f32 %v4471_v48, %v4342_v7  ;;  %v4472_v13 = vadd.f32 %v4440_v29, %v4311_v61  ;;  %4849 = vmatpush.bf16.msra.mxu0 %v6302_v10  ;;  %v4608_v7 = vmul.f32 %v6046_v27, %v9686_v38 }
 0x71e   : > { %4684 = vmatpush.msra.mxu3 %v4639_v23  ;;  %v4474_v23 = vadd.f32 %v4442_v39, %v4313_v50  ;;  %v6012_v50 = vld [vmem:[%s9931_s6 + $0x728] sm:$0xff]  ;;  %v6306_v39 = vld [vmem:[%s9934_s9 + $0x50] sm:$0xff] }
 0x71f   : > { %v4633_v58 = vadd.f32 %v4601_v26, %v4472_v13  ;;  %v4664_v54 = vadd.f32 %v4632_v60, %v4503_v51  ;;  %v4445_v48 = vmul.f32 %v6012_v50, %v9631_v44  ;;  %v6297_v44 = vld [vmem:[%s9934_s9 + $0x8] sm:$0xff] }
 0x720   : > { %v9713_v45 = vpop.permute.xlu1 %4546  ;;  %4862 = vmatpush.bf16.msra.mxu1 %v6310_v32 }
 0x721   : > { %v4605_v36 = vmul.f32 %v6043_v40, %v9713_v45  ;;  %v9760_v40 = vld [vmem:[%s9933_s8] sm:$0xf]  ;;  %v4606_v38 = vmul.f32 %v6044_v20, %v9713_v45  ;;  %v6305_v45 = vld [vmem:[%s9934_s9 + $0x48] sm:$0xff] }
 0x723   : > { %v4637_v16 = vadd.f32 %v4605_v36, %v4476_v8  ;;  %v6301_v8 = vld [vmem:[%s9934_s9 + $0x28] sm:$0xff]  ;;  %v4654_v36 = vadd.f32 %v4622_v35, %v9284_v4  ;;  %v6050_v4 = vld [vmem:[%s9931_s6 + $0x858] sm:$0xff] }
 0x724   : > { %4850 = vmatpush.bf16.msra.mxu0 %v6301_v8  ;;  %v4612_v53 = vmul.f32 %v6050_v4, %v9565_v63 }
 0x725   : > { %4685 = vmatpush.msra.mxu3 %v4637_v16  ;;  %v5978_v16 = vld [vmem:[%s9931_s6 + $0x618] sm:$0xff] }
 0x728   : > { %v9748_v62 = vpop.permute.xlu1 %4542  ;;  %4851 = vmatpush.bf16.msra.mxu0 %v6300_v30 }
 0x729   : > { %v4603_v55 = vmul.f32 %v6041_v24, %v9748_v62  ;;  %v6298_v24 = vld [vmem:[%s9934_s9 + $0x10] sm:$0xff] }
 0x72b   : > { %v4635_v41 = vadd.f32 %v4603_v55, %v4474_v23 }
 0x72c   : > { %4852 = vmatpush.bf16.msra.mxu0 %v6299_v47 }
 0x72d   : > { %4686 = vmatpush.msra.mxu3 %v4635_v41 }
 0x72f   : > { %4687 = vmatpush.msra.mxu3 %v4633_v58 }
 0x730   : > { %4688 = vmatmul.f32.vlgmr.msra.gmra.mxu3 %v9760_v40  ;;  %4853 = vmatpush.bf16.msra.mxu0 %v6298_v24 }
 0x731   : > { %4692 = vmatpush.msrb.mxu3 %v4664_v54  ;;  %v4666_v54 = vld [vmem:[%s9932_s7] sm:$0x3] }
 0x732   : > { %v4668_v19 = vperm.slane %v4666_v54, 0  ;;  %v4669_v32 = vperm.slane %v4666_v54, 1 }
 0x733   : > { %4693 = vmatpush.msrb.mxu3 %v9562_v43  ;;  %v6309_v43 = vld [vmem:[%s9934_s9 + $0x68] sm:$0xff] }
 0x734   : > { %4863 = vmatpush.bf16.msra.mxu1 %v6309_v43  ;;  %4854 = vmatpush.bf16.msra.mxu0 %v6297_v44 }
 0x735   : > { %4694 = vmatpush.msrb.mxu3 %v9489_v11  ;;  %v6016_v11 = vld [vmem:[%s9931_s6 + $0x748] sm:$0xff] }
 0x736   : > { %v4449_v14 = vmul.f32 %v6016_v11, %v9603_v12  ;;  %v4447_v12 = vmul.f32 %v6014_v57, %v9601_v56  ;;  %v5976_v56 = vld [vmem:[%s9931_s6 + $0x608] sm:$0xff] }
 0x737   : > { %4695 = vmatpush.msrb.mxu3 %v9436_v37  ;;  %v6308_v37 = vld [vmem:[%s9934_s9 + $0x60] sm:$0xff] }
 0x738   : > { %4864 = vmatpush.bf16.msra.mxu1 %v6308_v37  ;;  %v4481_v63 = vadd.f32 %v4449_v14, %v8755_v28  ;;  %v6010_v28 = vld [vmem:[%s9931_s6 + $0x718] sm:$0xff]  ;;  %v4479_v29 = vadd.f32 %v4447_v12, %v8642_v33  ;;  %v6040_v33 = vld [vmem:[%s9931_s6 + $0x808] sm:$0xff]  ;;  %v6515_v37 = vld [vmem:[%s9935_s10] ss:$0 sm:$0xff] }
 0x739   : > { %4696 = vmatpush.msrb.mxu3 %v9350_v25  ;;  %v5980_v25 = vld [vmem:[%s9931_s6 + $0x628] sm:$0xff]  ;;  %v4443_v61 = vmul.f32 %v6010_v28, %v9726_v31  ;;  %v4602_v55 = vmul.f32 %v6040_v33, %v9740_v1  ;;  %v6304_v1 = vld [vmem:[%s9934_s9 + $0x40] sm:$0xff] }
 0x73a   : > { %v4284_v5 = vmul.f32 %v5980_v25, %v9629_v52  ;;  %v4282_v52 = vmul.f32 %v5978_v16, %v9649_v46 }
 0x73b   : > { %4697 = vmatpush.msrb.mxu3 %v4654_v36 }
 0x73c   : > { %v4316_v46 = vadd.f32 %v4284_v5, %v8568_v59  ;;  %v6042_v59 = vld [vmem:[%s9931_s6 + $0x818] sm:$0xff]  ;;  %v4314_v34 = vadd.f32 %v4282_v52, %v8519_v22 }
 0x73d   : > { %4698 = vmatpush.msrb.mxu3 %v9197_v49  ;;  %v6307_v49 = vld [vmem:[%s9934_s9 + $0x58] sm:$0xff]  ;;  %v4604_v22 = vmul.f32 %v6042_v59, %v9748_v62  ;;  %v6296_v62 = vld [vmem:[%s9934_s9] sm:$0xff] }
 0x73e   : > { %4865 = vmatpush.bf16.msra.mxu1 %v6307_v49  ;;  %v4477_v23 = vadd.f32 %v4445_v48, %v4316_v46  ;;  %v4475_v13 = vadd.f32 %v4443_v61, %v4314_v34  ;;  %4855 = vmatpush.bf16.msra.mxu0 %v6296_v62 }
 0x73f   : > { %4699 = vmatpush.msrb.mxu3 %v9104_v2  ;;  %v4610_v2 = vmul.f32 %v6048_v21, %v9672_v3  ;;  %v6008_v3 = vld [vmem:[%s9931_s6 + $0x708] sm:$0xff] }
 0x740   : > { %v4441_v26 = vmul.f32 %v6008_v3, %v9699_v18  ;;  %v10049_v18 = vld [vmem:[#allocation13_spill] sm:$0xff]  ;;  %v4638_v51 = vadd.f32 %v4606_v38, %v4477_v23  ;;  %v4636_v60 = vadd.f32 %v4604_v22, %v4475_v13 }
 0x741   : > { %4700 = vmatpush.msrb.mxu3 %v8983_v6  ;;  %v4644_v6 = vadd.f32 %v4612_v53, %v8819_v0  ;;  %v4280_v0 = vmul.f32 %v5976_v56, %v9661_v15  ;;  %v4640_v15 = vadd.f32 %v4608_v7, %v4479_v29 }
 0x742   : > { %4866 = vmatpush.bf16.msra.mxu1 %v6306_v39 }
 0x743   : > { %4701 = vmatpush.msrb.mxu3 %v8916_v17  ;;  %v4642_v17 = vadd.f32 %v4610_v2, %v4481_v63  ;;  %v4312_v31 = vadd.f32 %v4280_v0, %v10049_v18 }
 0x745   : > { %4702 = vmatpush.msrb.mxu3 %v4644_v6  ;;  %v4473_v41 = vadd.f32 %v4441_v26, %v4312_v31 }
 0x746   : > { %4867 = vmatpush.bf16.msra.mxu1 %v6305_v45 }
 0x747   : > { %4703 = vmatpush.msrb.mxu3 %v4642_v17  ;;  %v4634_v58 = vadd.f32 %v4602_v55, %v4473_v41 }
 0x749   : > { %4704 = vmatpush.msrb.mxu3 %v4640_v15 }
 0x74a   : > { %4868 = vmatpush.bf16.msra.mxu1 %v6304_v1 }
 0x74b   : > { %4705 = vmatpush.msrb.mxu3 %v4638_v51 }
 0x74d   : > { %4706 = vmatpush.msrb.mxu3 %v4636_v60 }
 0x74f   : > { %4707 = vmatpush.msrb.mxu3 %v4634_v58 }
 0x750   : > { %4708 = vmatmul.f32.vlgmr.msrb.gmra.mxu3 %v9760_v40 }
 0x7b3   : > { %v4689_v9 = vpop.f32.mrf.mxu3 }
 0x7b4   : > { %v4690_v42 = vadd.f32 %v4689_v9, %v4668_v19 }
 0x7b6   : > { %v4712_v40 = vmax.f32 %v4690_v42, 0.0 }
 0x7b8   : > { %v4714_v10 = vpack.c.bf16 %v4712_v40, %v4712_v40 }
 0x7ba   : > { %4856 = vmatmul.bf16.vlgmr.msra.gmra.mxu0 %v4714_v10 }
 0x7d3   : > { %v4709_v35 = vpop.f32.mrf.mxu3 }
 0x7d4   : > { %v4710_v8 = vadd.f32 %v4709_v35, %v4669_v32 }
 0x7d6   : > { %v4713_v43 = vmax.f32 %v4710_v8, 0.0 }
 0x7d8   : > { %v4715_v36 = vpack.c.bf16 %v4713_v43, %v4713_v43 }
 0x7da   : > { %4869 = vmatmul.bf16.vlgmr.msra.gmra.mxu1 %v4715_v36 }
 0x837   : > { %v4857_v11 = vpop.f32.mrf.mxu0 }
 0x838   : > { %v4858_v4 = vadd.f32 %v6515_v37, %v4857_v11 }
 0x83f   : > { %v4859_v30 = vpop.f32.mrf.mxu0 }
 0x857   : > { %v4870_v25 = vpop.f32.mrf.mxu1 }
 0x858   : > { %v4871_v57 = vadd.f32 %v4870_v25, %v4858_v4 }
 0x85a   : > { %4875 = vst.msk [vmem:[%s382_s16] sm:$0xf] %vm4874_vm3, %v4871_v57 }
 0x85b   : > { %6543 = shalt.err (!%p6540_p3)
}
 0x85c   : > { %6316 = dma.vmem_to_hbm [thread:$0]  (%p6697_p5), %s4890_s22, 64, %s4892_s14, %s4877_s21  }
 0x85f   : > { %v4872_v14 = vpop.f32.mrf.mxu1 }
 0x860 PF: > { %p6322_p4 = scmp.ge.s32.totalorder %s6578_s20, 2  ;;  %s4903_s0 = sand.u32 1, %s6566_s17  }
 0x861   : > { %s4904_s15 = scalar_lea.sflag [#allocation3], %s4903_s0 }
 0x862   : > { %p6319_p7 = pnand %p6322_p4, %p6701_p6 }
 0x864   : > { %p6320_p8 = pneg %p6319_p7 }
 0x866   : > { %6561 = dma.done.wait (%p6320_p8), %s4904_s15, 64  }
 0x867   : > { %6563 = vsyncadd (%p6320_p8), %s4904_s15, 4294967232  ;;  %p21_p9 = scmp.ge.s32.totalorder %s6684_s23, 4   ;;  %s10050_s17 = smov %s6570_s18 }
 0x868   : > { %s10051_s18 = smov %s6574_s19  ;;  %s10052_s19 = smov %s6695_s26 }
 0x869   : > { %s10053_s20 = smov %s6684_s23  ;;  %23 = sbr.rel (!%p21_p9) target bundleno = 6 (0x6), region = 115 }
 0x86e   :  { %4910 = vsyncpa [#allocation3], 1 }
 0x86f   :  { %4912 = vsyncpa [#allocation3 + $0x1], 1 }

</bundles_post_ra>
